<compile_context>
chip_gen: v6e
topology: v6e:2x2x1
jax: 0.10.0
libtpu: 0.0.40
codegen_flags: <defaults>
</compile_context>

<pallas_src>
import functools

import jax
import jax.numpy as jnp
from jax.experimental import pallas as pl
from jax.experimental.pallas import tpu as pltpu


def _basic_block_kernel(x_ref, w1_ref, w2_ref, s1_ref, b1_ref, s2_ref, b2_ref,
                        out_ref, hbuf_ref, *, fold_kw: bool):
    """One (image, row-tile) step: conv3x3 -> BN -> ReLU -> conv3x3 -> BN -> +id -> ReLU.

    x_ref : (H+4, W+2, C)      bf16, whole padded image (resident per image)
    w1    : (3, 3C, Cout) or (9, C, Cout)   bf16 (folded / unfolded taps)
    w2    : (3, 3Cout, Cout) or (9, Cout, Cout)
    out   : (TH, W, Cout)      row tile of the final output
    hbuf  : (TH+2, W+2, Cout)  bf16 scratch: width-padded conv1 output (+halo rows)
    """
    TH, W, Cout = out_ref.shape
    Wp = x_ref.shape[1]
    C = x_ref.shape[-1]
    t = pl.program_id(1)
    n_t = pl.num_programs(1)

    # Rows needed by this output tile: h rows [t0-1, t0+TH+1)  ->  padded-x rows
    # [t0, t0+TH+4) (x is padded by 2 rows on each side in the wrapper).
    t0 = t * TH
    xs = x_ref[pl.ds(t0, TH + 4), :, :]                      # (TH+4, Wp, C) bf16

    def conv3x3(src, w_ref, out_rows):
        """src: (out_rows+2, Wp, cin) bf16 -> (out_rows*W, Cout) f32, SSA accumulation."""
        cin = src.shape[-1]
        # Hoist the 3 kw-shifted (sublane-offset) slices once per conv; the
        # per-kh slices below are leading-dim selections (no relayout).
        shifted = [src[:, kw:kw + W, :] for kw in range(3)]   # 3x (out_rows+2, W, cin)
        acc = None
        if fold_kw:
            # kw folded into the contraction: K = 3*cin, one matmul per kh.
            # (Gated on cin % 128 == 0 so the lane-dim concat is aligned.)
            folded = jnp.concatenate(shifted, axis=-1)        # (out_rows+2, W, 3*cin)
            for kh in range(3):
                patch = folded[kh:kh + out_rows].reshape(out_rows * W, 3 * cin)
                c = jnp.dot(patch, w_ref[kh], preferred_element_type=jnp.float32)
                acc = c if acc is None else acc + c
        else:
            for kh in range(3):
                for kw in range(3):
                    patch = shifted[kw][kh:kh + out_rows].reshape(out_rows * W, cin)
                    c = jnp.dot(patch, w_ref[kh * 3 + kw],
                                preferred_element_type=jnp.float32)
                    acc = c if acc is None else acc + c
        return acc                                            # (out_rows*W, Cout) f32

    # ---- conv1 over TH+2 rows (includes the 1-row halo conv2 needs) ----
    h = conv3x3(xs, w1_ref, TH + 2)                           # ((TH+2)*W, Cout) f32
    h = jnp.maximum(h * s1_ref[...] + b1_ref[...], 0.0)       # bn1 (folded) + relu
    h = h.reshape(TH + 2, W, Cout).astype(hbuf_ref.dtype)

    # ---- stage h into the width-padded conv2 buffer ----
    hbuf_ref[:, 1:W + 1, :] = h
    zcol = jnp.zeros((TH + 2, 1, Cout), hbuf_ref.dtype)
    hbuf_ref[:, 0:1, :] = zcol
    hbuf_ref[:, W + 1:W + 2, :] = zcol
    # Halo rows that fall outside the image are conv2's zero padding; only the
    # first / last row tile has to overwrite them (aligned full-row stores).
    zrow = jnp.zeros((1, Wp, Cout), hbuf_ref.dtype)

    @pl.when(t == 0)
    def _():
        hbuf_ref[0:1, :, :] = zrow

    @pl.when(t == n_t - 1)
    def _():
        hbuf_ref[TH + 1:TH + 2, :, :] = zrow

    # ---- conv2 over TH rows ----
    o = conv3x3(hbuf_ref[...], w2_ref, TH)                    # (TH*W, Cout) f32

    # ---- bn2 + residual (rebuilt from the resident input block) + relu ----
    res = xs[2:TH + 2, 1:W + 1, :].astype(jnp.float32).reshape(TH * W, C)
    o = jnp.maximum(o * s2_ref[...] + b2_ref[...] + res, 0.0)
    out_ref[...] = o.reshape(TH, W, Cout).astype(out_ref.dtype)


def _fold_bn(bn_params, eps):
    gamma, beta, mean, var = bn_params
    scale = gamma / jnp.sqrt(var + eps)
    bias = beta - mean * scale
    return (scale.reshape(1, -1).astype(jnp.float32),
            bias.reshape(1, -1).astype(jnp.float32))


def _repack_w(w_torch, fold_kw):
    # torch (O, I, 3, 3) -> (kh, kw, I, O); folded: (3, 3*I, O) with contraction
    # index kw*I + c; unfolded: (9, I, O) with tap index kh*3 + kw.
    o, i, _, _ = w_torch.shape
    w = jnp.transpose(w_torch, (2, 3, 1, 0))
    if fold_kw:
        return w.reshape(3, 3 * i, o).astype(jnp.bfloat16)
    return w.reshape(9, i, o).astype(jnp.bfloat16)


def basic_block_pallas(x_nchw, w1, w2, bn1, bn2, eps=1e-5):
    """x_nchw: (N, C, H, W) float32 (PyTorch layout).  Returns NCHW output."""
    N, C, H, W = x_nchw.shape
    Cout = w1.shape[0]
    if w1.shape != (Cout, C, 3, 3) or w2.shape != (Cout, Cout, 3, 3):
        raise ValueError("unexpected conv weight shapes")
    if C != Cout:
        # downsample=None / stride=1 path adds the raw input channel-for-channel.
        raise ValueError("BasicBlock with downsample=None requires inplanes == planes")

    # Fold kw into the MXU contraction only when the lane-dim concat of the
    # kw-shifted slabs is 128-lane aligned (compile-safe); otherwise 9 taps.
    fold_kw = (C % 128 == 0)

    # H row-tile: divides H, prefer >=2 tiles per image (pipeline fill / v7x steps).
    TH = H
    for cand in (32, 16, 8):
        if H % cand == 0 and H > cand:
            TH = cand
            break
    n_t = H // TH

    x_nhwc = jnp.transpose(x_nchw, (0, 2, 3, 1))
    # Pad H by 2 (conv halo + 1 extra so every tile slices a uniform TH+4 rows),
    # W by 1.  Single bf16 input; the residual is reconstructed in-kernel.
    x_pad = jnp.pad(x_nhwc, ((0, 0), (2, 2), (1, 1), (0, 0))).astype(jnp.bfloat16)
    Hp, Wp = H + 4, W + 2

    s1, b1 = _fold_bn(bn1, eps)
    s2, b2 = _fold_bn(bn2, eps)
    w1k = _repack_w(w1, fold_kw)
    w2k = _repack_w(w2, fold_kw)

    # Rough per-step VMEM need (double-buffered blocks + resident weights +
    # scratch) with headroom, capped under every generation's physical VMEM.
    est = (2 * Hp * Wp * C * 2                 # padded input block (bf16)
           + 2 * TH * W * Cout * 4             # output tile (f32), double-buffered
           + int(w1k.size) * 2 + int(w2k.size) * 2
           + 4 * Cout * 4                      # folded BN scale/bias
           + (TH + 2) * Wp * Cout * 2)         # hbuf scratch (bf16)
    vmem_limit = int(min(64 * 1024 * 1024, max(4 * 1024 * 1024, 6 * est)))

    kernel = functools.partial(_basic_block_kernel, fold_kw=fold_kw)

    out_nhwc = pl.pallas_call(
        kernel,
        out_shape=jax.ShapeDtypeStruct((N, H, W, Cout), x_nchw.dtype),
        grid=(N, n_t),
        in_specs=[
            pl.BlockSpec((None, Hp, Wp, C), lambda n, t: (n, 0, 0, 0)),   # x_pad (resident per n)
            pl.BlockSpec(w1k.shape, lambda n, t: (0, 0, 0)),              # conv1 weights
            pl.BlockSpec(w2k.shape, lambda n, t: (0, 0, 0)),              # conv2 weights
            pl.BlockSpec((1, Cout), lambda n, t: (0, 0)),                 # bn1 scale
            pl.BlockSpec((1, Cout), lambda n, t: (0, 0)),                 # bn1 bias
            pl.BlockSpec((1, Cout), lambda n, t: (0, 0)),                 # bn2 scale
            pl.BlockSpec((1, Cout), lambda n, t: (0, 0)),                 # bn2 bias
        ],
        out_specs=pl.BlockSpec((None, TH, W, Cout), lambda n, t: (n, t, 0, 0)),
        scratch_shapes=[
            pltpu.VMEM((TH + 2, Wp, Cout), jnp.bfloat16),   # width-padded conv1 output (+halo)
        ],
        compiler_params=pltpu.CompilerParams(
            dimension_semantics=("parallel", "arbitrary"),
            vmem_limit_bytes=vmem_limit,
        ),
    )(x_pad, w1k, w2k, s1, b1, s2, b2)

    return jnp.transpose(out_nhwc, (0, 3, 1, 2))             # back to NCHW


# ---------------------------- pure-JAX reference ----------------------------
def basic_block_ref(x_nchw, w1, w2, bn1, bn2, eps=1e-5):
    x = jnp.transpose(x_nchw, (0, 2, 3, 1))

    def conv(xin, w):
        wk = jnp.transpose(w, (2, 3, 1, 0))  # HWIO
        return jax.lax.conv_general_dilated(
            xin, wk, window_strides=(1, 1), padding=((1, 1), (1, 1)),
            dimension_numbers=('NHWC', 'HWIO', 'NHWC'),
            precision=jax.lax.Precision.HIGHEST)

    def bn(xin, p):
        g, b, m, v = p
        return (xin - m) / jnp.sqrt(v + eps) * g + b

    h = jax.nn.relu(bn(conv(x, w1), bn1))
    o = jax.nn.relu(bn(conv(h, w2), bn2) + x)
    return jnp.transpose(o, (0, 3, 1, 2))


if __name__ == "__main__":
    # Small shapes consistent with BasicBlock(inplanes=4, planes=4, stride=1,
    # downsample=None): batch=2, channels=4, spatial=16.
    N, C, H, W = 2, 4, 16, 16

    key = jax.random.PRNGKey(0)
    k = jax.random.split(key, 11)

    x = jax.random.normal(k[0], (N, C, H, W), jnp.float32)

    # conv weights: torch layout (out, in, 3, 3), kaiming-ish scale
    wscale = (2.0 / (9 * C)) ** 0.5
    w1 = jax.random.normal(k[1], (C, C, 3, 3), jnp.float32) * wscale
    w2 = jax.random.normal(k[2], (C, C, 3, 3), jnp.float32) * wscale

    # BN params: (gamma, beta, running_mean, running_var)
    bn1 = (jax.random.uniform(k[3], (C,), jnp.float32, 0.5, 1.5),
           jax.random.normal(k[4], (C,), jnp.float32) * 0.1,
           jax.random.normal(k[5], (C,), jnp.float32) * 0.1,
           jax.random.uniform(k[6], (C,), jnp.float32, 0.5, 1.5))
    bn2 = (jax.random.uniform(k[7], (C,), jnp.float32, 0.5, 1.5),
           jax.random.normal(k[8], (C,), jnp.float32) * 0.1,
           jax.random.normal(k[9], (C,), jnp.float32) * 0.1,
           jax.random.uniform(k[10], (C,), jnp.float32, 0.5, 1.5))

    out = jax.block_until_ready(basic_block_pallas(x, w1, w2, bn1, bn2))
    ref = jax.block_until_ready(basic_block_ref(x, w1, w2, bn1, bn2))

    assert out.shape == (N, C, H, W)
    max_err = jnp.max(jnp.abs(out - ref))
    # bf16 MXU operands + bf16-reconstructed residual vs the f32 HIGHEST-precision
    # reference -> loosened tolerance.
    assert jnp.allclose(out, ref, rtol=6e-2, atol=6e-2), f"max abs err = {max_err}"

    print("KERNEL_OK")
</pallas_src>

<mosaic_0001>
module attributes {stable_mosaic.version = 11 : i64} {
  func.func @_basic_block_kernel(%arg0: i32, %arg1: i32, %arg2: memref<1x20x18x4xbf16, #tpu.memory_space<vmem>>, %arg3: memref<9x4x4xbf16, #tpu.memory_space<vmem>>, %arg4: memref<9x4x4xbf16, #tpu.memory_space<vmem>>, %arg5: memref<1x4xf32, #tpu.memory_space<vmem>>, %arg6: memref<1x4xf32, #tpu.memory_space<vmem>>, %arg7: memref<1x4xf32, #tpu.memory_space<vmem>>, %arg8: memref<1x4xf32, #tpu.memory_space<vmem>>, %arg9: memref<1x8x16x4xf32, #tpu.memory_space<vmem>>, %arg10: memref<10x18x4xbf16, #tpu.memory_space<vmem>>) attributes {dimension_semantics = [#tpu.dimension_semantics<parallel>, #tpu.dimension_semantics<arbitrary>], iteration_bounds = array<i64: 2, 2>, scalar_prefetch = 0 : i64, scratch_operands = 1 : i64, tpu.core_type = #tpu.core_type<tc>, window_params = [{transform_indices = @transform_0, window_bounds = array<i64: 1, 20, 18, 4>}, {pipeline_mode = #tpu.pipeline_mode<synchronous>, transform_indices = @transform_1, window_bounds = array<i64: 9, 4, 4>}, {pipeline_mode = #tpu.pipeline_mode<synchronous>, transform_indices = @transform_2, window_bounds = array<i64: 9, 4, 4>}, {pipeline_mode = #tpu.pipeline_mode<synchronous>, transform_indices = @transform_3, window_bounds = array<i64: 1, 4>}, {pipeline_mode = #tpu.pipeline_mode<synchronous>, transform_indices = @transform_4, window_bounds = array<i64: 1, 4>}, {pipeline_mode = #tpu.pipeline_mode<synchronous>, transform_indices = @transform_5, window_bounds = array<i64: 1, 4>}, {pipeline_mode = #tpu.pipeline_mode<synchronous>, transform_indices = @transform_6, window_bounds = array<i64: 1, 4>}, {transform_indices = @transform_7, window_bounds = array<i64: 1, 8, 16, 4>}]} {
    %c8_i32 = arith.constant 8 : i32
    %0 = arith.muli %arg1, %c8_i32 : i32
    %c0 = arith.constant 0 : index
    %1 = arith.index_cast %0 : i32 to index
    %c0_0 = arith.constant 0 : index
    %c0_1 = arith.constant 0 : index
    %2 = vector.load %arg2[%c0, %1, %c0_0, %c0_1] : memref<1x20x18x4xbf16, #tpu.memory_space<vmem>>, vector<1x12x18x4xbf16>
    %3 = vector.shape_cast %2 : vector<1x12x18x4xbf16> to vector<12x18x4xbf16>
    %4 = vector.extract_strided_slice %3 {offsets = [0, 0, 0], sizes = [12, 16, 4], strides = [1, 1, 1]} : vector<12x18x4xbf16> to vector<12x16x4xbf16>
    %5 = vector.extract_strided_slice %3 {offsets = [0, 1, 0], sizes = [12, 16, 4], strides = [1, 1, 1]} : vector<12x18x4xbf16> to vector<12x16x4xbf16>
    %6 = vector.extract_strided_slice %3 {offsets = [0, 2, 0], sizes = [12, 16, 4], strides = [1, 1, 1]} : vector<12x18x4xbf16> to vector<12x16x4xbf16>
    %7 = vector.extract_strided_slice %4 {offsets = [0, 0, 0], sizes = [10, 16, 4], strides = [1, 1, 1]} : vector<12x16x4xbf16> to vector<10x16x4xbf16>
    %8 = vector.shape_cast %7 : vector<10x16x4xbf16> to vector<160x4xbf16>
    %c0_2 = arith.constant 0 : index
    %c0_3 = arith.constant 0 : index
    %c0_4 = arith.constant 0 : index
    %9 = vector.load %arg3[%c0_2, %c0_3, %c0_4] : memref<9x4x4xbf16, #tpu.memory_space<vmem>>, vector<1x4x4xbf16>
    %10 = vector.shape_cast %9 : vector<1x4x4xbf16> to vector<4x4xbf16>
    %cst = arith.constant dense<0.000000e+00> : vector<160x4xf32>
    %11 = tpu.matmul %8, %10, %cst {dimension_numbers = #tpu.dot_dimension_numbers<[1], [0], [0], [1], [0, 0, 1, 1], [], []>} : vector<160x4xbf16>, vector<4x4xbf16>, vector<160x4xf32> -> vector<160x4xf32>
    %12 = vector.extract_strided_slice %5 {offsets = [0, 0, 0], sizes = [10, 16, 4], strides = [1, 1, 1]} : vector<12x16x4xbf16> to vector<10x16x4xbf16>
    %13 = vector.shape_cast %12 : vector<10x16x4xbf16> to vector<160x4xbf16>
    %c1 = arith.constant 1 : index
    %c0_5 = arith.constant 0 : index
    %c0_6 = arith.constant 0 : index
    %14 = vector.load %arg3[%c1, %c0_5, %c0_6] : memref<9x4x4xbf16, #tpu.memory_space<vmem>>, vector<1x4x4xbf16>
    %15 = vector.shape_cast %14 : vector<1x4x4xbf16> to vector<4x4xbf16>
    %cst_7 = arith.constant dense<0.000000e+00> : vector<160x4xf32>
    %16 = tpu.matmul %13, %15, %cst_7 {dimension_numbers = #tpu.dot_dimension_numbers<[1], [0], [0], [1], [0, 0, 1, 1], [], []>} : vector<160x4xbf16>, vector<4x4xbf16>, vector<160x4xf32> -> vector<160x4xf32>
    %17 = arith.addf %11, %16 : vector<160x4xf32>
    %18 = vector.extract_strided_slice %6 {offsets = [0, 0, 0], sizes = [10, 16, 4], strides = [1, 1, 1]} : vector<12x16x4xbf16> to vector<10x16x4xbf16>
    %19 = vector.shape_cast %18 : vector<10x16x4xbf16> to vector<160x4xbf16>
    %c2 = arith.constant 2 : index
    %c0_8 = arith.constant 0 : index
    %c0_9 = arith.constant 0 : index
    %20 = vector.load %arg3[%c2, %c0_8, %c0_9] : memref<9x4x4xbf16, #tpu.memory_space<vmem>>, vector<1x4x4xbf16>
    %21 = vector.shape_cast %20 : vector<1x4x4xbf16> to vector<4x4xbf16>
    %cst_10 = arith.constant dense<0.000000e+00> : vector<160x4xf32>
    %22 = tpu.matmul %19, %21, %cst_10 {dimension_numbers = #tpu.dot_dimension_numbers<[1], [0], [0], [1], [0, 0, 1, 1], [], []>} : vector<160x4xbf16>, vector<4x4xbf16>, vector<160x4xf32> -> vector<160x4xf32>
    %23 = arith.addf %17, %22 : vector<160x4xf32>
    %24 = vector.extract_strided_slice %4 {offsets = [1, 0, 0], sizes = [10, 16, 4], strides = [1, 1, 1]} : vector<12x16x4xbf16> to vector<10x16x4xbf16>
    %25 = vector.shape_cast %24 : vector<10x16x4xbf16> to vector<160x4xbf16>
    %c3 = arith.constant 3 : index
    %c0_11 = arith.constant 0 : index
    %c0_12 = arith.constant 0 : index
    %26 = vector.load %arg3[%c3, %c0_11, %c0_12] : memref<9x4x4xbf16, #tpu.memory_space<vmem>>, vector<1x4x4xbf16>
    %27 = vector.shape_cast %26 : vector<1x4x4xbf16> to vector<4x4xbf16>
    %cst_13 = arith.constant dense<0.000000e+00> : vector<160x4xf32>
    %28 = tpu.matmul %25, %27, %cst_13 {dimension_numbers = #tpu.dot_dimension_numbers<[1], [0], [0], [1], [0, 0, 1, 1], [], []>} : vector<160x4xbf16>, vector<4x4xbf16>, vector<160x4xf32> -> vector<160x4xf32>
    %29 = arith.addf %23, %28 : vector<160x4xf32>
    %30 = vector.extract_strided_slice %5 {offsets = [1, 0, 0], sizes = [10, 16, 4], strides = [1, 1, 1]} : vector<12x16x4xbf16> to vector<10x16x4xbf16>
    %31 = vector.shape_cast %30 : vector<10x16x4xbf16> to vector<160x4xbf16>
    %c4 = arith.constant 4 : index
    %c0_14 = arith.constant 0 : index
    %c0_15 = arith.constant 0 : index
    %32 = vector.load %arg3[%c4, %c0_14, %c0_15] : memref<9x4x4xbf16, #tpu.memory_space<vmem>>, vector<1x4x4xbf16>
    %33 = vector.shape_cast %32 : vector<1x4x4xbf16> to vector<4x4xbf16>
    %cst_16 = arith.constant dense<0.000000e+00> : vector<160x4xf32>
    %34 = tpu.matmul %31, %33, %cst_16 {dimension_numbers = #tpu.dot_dimension_numbers<[1], [0], [0], [1], [0, 0, 1, 1], [], []>} : vector<160x4xbf16>, vector<4x4xbf16>, vector<160x4xf32> -> vector<160x4xf32>
    %35 = arith.addf %29, %34 : vector<160x4xf32>
    %36 = vector.extract_strided_slice %6 {offsets = [1, 0, 0], sizes = [10, 16, 4], strides = [1, 1, 1]} : vector<12x16x4xbf16> to vector<10x16x4xbf16>
    %37 = vector.shape_cast %36 : vector<10x16x4xbf16> to vector<160x4xbf16>
    %c5 = arith.constant 5 : index
    %c0_17 = arith.constant 0 : index
    %c0_18 = arith.constant 0 : index
    %38 = vector.load %arg3[%c5, %c0_17, %c0_18] : memref<9x4x4xbf16, #tpu.memory_space<vmem>>, vector<1x4x4xbf16>
    %39 = vector.shape_cast %38 : vector<1x4x4xbf16> to vector<4x4xbf16>
    %cst_19 = arith.constant dense<0.000000e+00> : vector<160x4xf32>
    %40 = tpu.matmul %37, %39, %cst_19 {dimension_numbers = #tpu.dot_dimension_numbers<[1], [0], [0], [1], [0, 0, 1, 1], [], []>} : vector<160x4xbf16>, vector<4x4xbf16>, vector<160x4xf32> -> vector<160x4xf32>
    %41 = arith.addf %35, %40 : vector<160x4xf32>
    %42 = vector.extract_strided_slice %4 {offsets = [2, 0, 0], sizes = [10, 16, 4], strides = [1, 1, 1]} : vector<12x16x4xbf16> to vector<10x16x4xbf16>
    %43 = vector.shape_cast %42 : vector<10x16x4xbf16> to vector<160x4xbf16>
    %c6 = arith.constant 6 : index
    %c0_20 = arith.constant 0 : index
    %c0_21 = arith.constant 0 : index
    %44 = vector.load %arg3[%c6, %c0_20, %c0_21] : memref<9x4x4xbf16, #tpu.memory_space<vmem>>, vector<1x4x4xbf16>
    %45 = vector.shape_cast %44 : vector<1x4x4xbf16> to vector<4x4xbf16>
    %cst_22 = arith.constant dense<0.000000e+00> : vector<160x4xf32>
    %46 = tpu.matmul %43, %45, %cst_22 {dimension_numbers = #tpu.dot_dimension_numbers<[1], [0], [0], [1], [0, 0, 1, 1], [], []>} : vector<160x4xbf16>, vector<4x4xbf16>, vector<160x4xf32> -> vector<160x4xf32>
    %47 = arith.addf %41, %46 : vector<160x4xf32>
    %48 = vector.extract_strided_slice %5 {offsets = [2, 0, 0], sizes = [10, 16, 4], strides = [1, 1, 1]} : vector<12x16x4xbf16> to vector<10x16x4xbf16>
    %49 = vector.shape_cast %48 : vector<10x16x4xbf16> to vector<160x4xbf16>
    %c7 = arith.constant 7 : index
    %c0_23 = arith.constant 0 : index
    %c0_24 = arith.constant 0 : index
    %50 = vector.load %arg3[%c7, %c0_23, %c0_24] : memref<9x4x4xbf16, #tpu.memory_space<vmem>>, vector<1x4x4xbf16>
    %51 = vector.shape_cast %50 : vector<1x4x4xbf16> to vector<4x4xbf16>
    %cst_25 = arith.constant dense<0.000000e+00> : vector<160x4xf32>
    %52 = tpu.matmul %49, %51, %cst_25 {dimension_numbers = #tpu.dot_dimension_numbers<[1], [0], [0], [1], [0, 0, 1, 1], [], []>} : vector<160x4xbf16>, vector<4x4xbf16>, vector<160x4xf32> -> vector<160x4xf32>
    %53 = arith.addf %47, %52 : vector<160x4xf32>
    %54 = vector.extract_strided_slice %6 {offsets = [2, 0, 0], sizes = [10, 16, 4], strides = [1, 1, 1]} : vector<12x16x4xbf16> to vector<10x16x4xbf16>
    %55 = vector.shape_cast %54 : vector<10x16x4xbf16> to vector<160x4xbf16>
    %c8 = arith.constant 8 : index
    %c0_26 = arith.constant 0 : index
    %c0_27 = arith.constant 0 : index
    %56 = vector.load %arg3[%c8, %c0_26, %c0_27] : memref<9x4x4xbf16, #tpu.memory_space<vmem>>, vector<1x4x4xbf16>
    %57 = vector.shape_cast %56 : vector<1x4x4xbf16> to vector<4x4xbf16>
    %cst_28 = arith.constant dense<0.000000e+00> : vector<160x4xf32>
    %58 = tpu.matmul %55, %57, %cst_28 {dimension_numbers = #tpu.dot_dimension_numbers<[1], [0], [0], [1], [0, 0, 1, 1], [], []>} : vector<160x4xbf16>, vector<4x4xbf16>, vector<160x4xf32> -> vector<160x4xf32>
    %59 = arith.addf %53, %58 : vector<160x4xf32>
    %c0_29 = arith.constant 0 : index
    %c0_30 = arith.constant 0 : index
    %60 = vector.load %arg5[%c0_29, %c0_30] : memref<1x4xf32, #tpu.memory_space<vmem>>, vector<1x4xf32>
    %61 = vector.broadcast %60 : vector<1x4xf32> to vector<160x4xf32>
    %62 = arith.mulf %59, %61 : vector<160x4xf32>
    %c0_31 = arith.constant 0 : index
    %c0_32 = arith.constant 0 : index
    %63 = vector.load %arg6[%c0_31, %c0_32] : memref<1x4xf32, #tpu.memory_space<vmem>>, vector<1x4xf32>
    %64 = vector.broadcast %63 : vector<1x4xf32> to vector<160x4xf32>
    %65 = arith.addf %62, %64 : vector<160x4xf32>
    %cst_33 = arith.constant 0.000000e+00 : f32
    %66 = vector.broadcast %cst_33 : f32 to vector<160x4xf32>
    %67 = arith.maximumf %65, %66 : vector<160x4xf32>
    %68 = vector.shape_cast %67 : vector<160x4xf32> to vector<10x16x4xf32>
    %69 = arith.truncf %68 : vector<10x16x4xf32> to vector<10x16x4xbf16>
    %c0_34 = arith.constant 0 : index
    %c1_35 = arith.constant 1 : index
    %c0_36 = arith.constant 0 : index
    %70 = vector.load %arg10[%c0_34, %c1_35, %c0_36] : memref<10x18x4xbf16, #tpu.memory_space<vmem>>, vector<10x16x4xbf16>
    tpu.vector_store %arg10[%c0_34, %c1_35, %c0_36], %69 {strides = array<i32>} : memref<10x18x4xbf16, #tpu.memory_space<vmem>>, vector<10x16x4xbf16>,
    %cst_37 = arith.constant 0.000000e+00 : bf16
    %71 = vector.broadcast %cst_37 : bf16 to vector<10x1x4xbf16>
    %c0_38 = arith.constant 0 : index
    %c0_39 = arith.constant 0 : index
    %c0_40 = arith.constant 0 : index
    %72 = vector.load %arg10[%c0_38, %c0_39, %c0_40] : memref<10x18x4xbf16, #tpu.memory_space<vmem>>, vector<10x1x4xbf16>
    tpu.vector_store %arg10[%c0_38, %c0_39, %c0_40], %71 {strides = array<i32>} : memref<10x18x4xbf16, #tpu.memory_space<vmem>>, vector<10x1x4xbf16>,
    %c0_41 = arith.constant 0 : index
    %c17 = arith.constant 17 : index
    %c0_42 = arith.constant 0 : index
    %73 = vector.load %arg10[%c0_41, %c17, %c0_42] : memref<10x18x4xbf16, #tpu.memory_space<vmem>>, vector<10x1x4xbf16>
    tpu.vector_store %arg10[%c0_41, %c17, %c0_42], %71 {strides = array<i32>} : memref<10x18x4xbf16, #tpu.memory_space<vmem>>, vector<10x1x4xbf16>,
    %cst_43 = arith.constant 0.000000e+00 : bf16
    %74 = vector.broadcast %cst_43 : bf16 to vector<1x18x4xbf16>
    %c0_i32 = arith.constant 0 : i32
    %75 = arith.cmpi eq, %arg1, %c0_i32 : i32
    %76 = arith.extui %75 : i1 to i32
    %c0_i32_44 = arith.constant 0 : i32
    %77 = arith.cmpi ne, %76, %c0_i32_44 : i32
    scf.if %77 {
      %c0_94 = arith.constant 0 : index
      %c0_95 = arith.constant 0 : index
      %c0_96 = arith.constant 0 : index
      %154 = vector.load %arg10[%c0_94, %c0_95, %c0_96] : memref<10x18x4xbf16, #tpu.memory_space<vmem>>, vector<1x18x4xbf16>
      tpu.vector_store %arg10[%c0_94, %c0_95, %c0_96], %74 {strides = array<i32>} : memref<10x18x4xbf16, #tpu.memory_space<vmem>>, vector<1x18x4xbf16>,
    } else {
    }
    %c1_i32 = arith.constant 1 : i32
    %78 = arith.cmpi eq, %arg1, %c1_i32 : i32
    %79 = arith.extui %78 : i1 to i32
    %c0_i32_45 = arith.constant 0 : i32
    %80 = arith.cmpi ne, %79, %c0_i32_45 : i32
    scf.if %80 {
      %c9 = arith.constant 9 : index
      %c0_94 = arith.constant 0 : index
      %c0_95 = arith.constant 0 : index
      %154 = vector.load %arg10[%c9, %c0_94, %c0_95] : memref<10x18x4xbf16, #tpu.memory_space<vmem>>, vector<1x18x4xbf16>
      tpu.vector_store %arg10[%c9, %c0_94, %c0_95], %74 {strides = array<i32>} : memref<10x18x4xbf16, #tpu.memory_space<vmem>>, vector<1x18x4xbf16>,
    } else {
    }
    %c0_46 = arith.constant 0 : index
    %c0_47 = arith.constant 0 : index
    %c0_48 = arith.constant 0 : index
    %81 = vector.load %arg10[%c0_46, %c0_47, %c0_48] : memref<10x18x4xbf16, #tpu.memory_space<vmem>>, vector<10x18x4xbf16>
    %82 = vector.extract_strided_slice %81 {offsets = [0, 0, 0], sizes = [10, 16, 4], strides = [1, 1, 1]} : vector<10x18x4xbf16> to vector<10x16x4xbf16>
    %83 = vector.extract_strided_slice %81 {offsets = [0, 1, 0], sizes = [10, 16, 4], strides = [1, 1, 1]} : vector<10x18x4xbf16> to vector<10x16x4xbf16>
    %84 = vector.extract_strided_slice %81 {offsets = [0, 2, 0], sizes = [10, 16, 4], strides = [1, 1, 1]} : vector<10x18x4xbf16> to vector<10x16x4xbf16>
    %85 = vector.extract_strided_slice %82 {offsets = [0, 0, 0], sizes = [8, 16, 4], strides = [1, 1, 1]} : vector<10x16x4xbf16> to vector<8x16x4xbf16>
    %86 = vector.shape_cast %85 : vector<8x16x4xbf16> to vector<128x4xbf16>
    %c0_49 = arith.constant 0 : index
    %c0_50 = arith.constant 0 : index
    %c0_51 = arith.constant 0 : index
    %87 = vector.load %arg4[%c0_49, %c0_50, %c0_51] : memref<9x4x4xbf16, #tpu.memory_space<vmem>>, vector<1x4x4xbf16>
    %88 = vector.shape_cast %87 : vector<1x4x4xbf16> to vector<4x4xbf16>
    %cst_52 = arith.constant dense<0.000000e+00> : vector<128x4xf32>
    %89 = tpu.matmul %86, %88, %cst_52 {dimension_numbers = #tpu.dot_dimension_numbers<[1], [0], [0], [1], [0, 0, 1, 1], [], []>} : vector<128x4xbf16>, vector<4x4xbf16>, vector<128x4xf32> -> vector<128x4xf32>
    %90 = vector.extract_strided_slice %83 {offsets = [0, 0, 0], sizes = [8, 16, 4], strides = [1, 1, 1]} : vector<10x16x4xbf16> to vector<8x16x4xbf16>
    %91 = vector.shape_cast %90 : vector<8x16x4xbf16> to vector<128x4xbf16>
    %c1_53 = arith.constant 1 : index
    %c0_54 = arith.constant 0 : index
    %c0_55 = arith.constant 0 : index
    %92 = vector.load %arg4[%c1_53, %c0_54, %c0_55] : memref<9x4x4xbf16, #tpu.memory_space<vmem>>, vector<1x4x4xbf16>
    %93 = vector.shape_cast %92 : vector<1x4x4xbf16> to vector<4x4xbf16>
    %cst_56 = arith.constant dense<0.000000e+00> : vector<128x4xf32>
    %94 = tpu.matmul %91, %93, %cst_56 {dimension_numbers = #tpu.dot_dimension_numbers<[1], [0], [0], [1], [0, 0, 1, 1], [], []>} : vector<128x4xbf16>, vector<4x4xbf16>, vector<128x4xf32> -> vector<128x4xf32>
    %95 = arith.addf %89, %94 : vector<128x4xf32>
    %96 = vector.extract_strided_slice %84 {offsets = [0, 0, 0], sizes = [8, 16, 4], strides = [1, 1, 1]} : vector<10x16x4xbf16> to vector<8x16x4xbf16>
    %97 = vector.shape_cast %96 : vector<8x16x4xbf16> to vector<128x4xbf16>
    %c2_57 = arith.constant 2 : index
    %c0_58 = arith.constant 0 : index
    %c0_59 = arith.constant 0 : index
    %98 = vector.load %arg4[%c2_57, %c0_58, %c0_59] : memref<9x4x4xbf16, #tpu.memory_space<vmem>>, vector<1x4x4xbf16>
    %99 = vector.shape_cast %98 : vector<1x4x4xbf16> to vector<4x4xbf16>
    %cst_60 = arith.constant dense<0.000000e+00> : vector<128x4xf32>
    %100 = tpu.matmul %97, %99, %cst_60 {dimension_numbers = #tpu.dot_dimension_numbers<[1], [0], [0], [1], [0, 0, 1, 1], [], []>} : vector<128x4xbf16>, vector<4x4xbf16>, vector<128x4xf32> -> vector<128x4xf32>
    %101 = arith.addf %95, %100 : vector<128x4xf32>
    %102 = vector.extract_strided_slice %82 {offsets = [1, 0, 0], sizes = [8, 16, 4], strides = [1, 1, 1]} : vector<10x16x4xbf16> to vector<8x16x4xbf16>
    %103 = vector.shape_cast %102 : vector<8x16x4xbf16> to vector<128x4xbf16>
    %c3_61 = arith.constant 3 : index
    %c0_62 = arith.constant 0 : index
    %c0_63 = arith.constant 0 : index
    %104 = vector.load %arg4[%c3_61, %c0_62, %c0_63] : memref<9x4x4xbf16, #tpu.memory_space<vmem>>, vector<1x4x4xbf16>
    %105 = vector.shape_cast %104 : vector<1x4x4xbf16> to vector<4x4xbf16>
    %cst_64 = arith.constant dense<0.000000e+00> : vector<128x4xf32>
    %106 = tpu.matmul %103, %105, %cst_64 {dimension_numbers = #tpu.dot_dimension_numbers<[1], [0], [0], [1], [0, 0, 1, 1], [], []>} : vector<128x4xbf16>, vector<4x4xbf16>, vector<128x4xf32> -> vector<128x4xf32>
    %107 = arith.addf %101, %106 : vector<128x4xf32>
    %108 = vector.extract_strided_slice %83 {offsets = [1, 0, 0], sizes = [8, 16, 4], strides = [1, 1, 1]} : vector<10x16x4xbf16> to vector<8x16x4xbf16>
    %109 = vector.shape_cast %108 : vector<8x16x4xbf16> to vector<128x4xbf16>
    %c4_65 = arith.constant 4 : index
    %c0_66 = arith.constant 0 : index
    %c0_67 = arith.constant 0 : index
    %110 = vector.load %arg4[%c4_65, %c0_66, %c0_67] : memref<9x4x4xbf16, #tpu.memory_space<vmem>>, vector<1x4x4xbf16>
    %111 = vector.shape_cast %110 : vector<1x4x4xbf16> to vector<4x4xbf16>
    %cst_68 = arith.constant dense<0.000000e+00> : vector<128x4xf32>
    %112 = tpu.matmul %109, %111, %cst_68 {dimension_numbers = #tpu.dot_dimension_numbers<[1], [0], [0], [1], [0, 0, 1, 1], [], []>} : vector<128x4xbf16>, vector<4x4xbf16>, vector<128x4xf32> -> vector<128x4xf32>
    %113 = arith.addf %107, %112 : vector<128x4xf32>
    %114 = vector.extract_strided_slice %84 {offsets = [1, 0, 0], sizes = [8, 16, 4], strides = [1, 1, 1]} : vector<10x16x4xbf16> to vector<8x16x4xbf16>
    %115 = vector.shape_cast %114 : vector<8x16x4xbf16> to vector<128x4xbf16>
    %c5_69 = arith.constant 5 : index
    %c0_70 = arith.constant 0 : index
    %c0_71 = arith.constant 0 : index
    %116 = vector.load %arg4[%c5_69, %c0_70, %c0_71] : memref<9x4x4xbf16, #tpu.memory_space<vmem>>, vector<1x4x4xbf16>
    %117 = vector.shape_cast %116 : vector<1x4x4xbf16> to vector<4x4xbf16>
    %cst_72 = arith.constant dense<0.000000e+00> : vector<128x4xf32>
    %118 = tpu.matmul %115, %117, %cst_72 {dimension_numbers = #tpu.dot_dimension_numbers<[1], [0], [0], [1], [0, 0, 1, 1], [], []>} : vector<128x4xbf16>, vector<4x4xbf16>, vector<128x4xf32> -> vector<128x4xf32>
    %119 = arith.addf %113, %118 : vector<128x4xf32>
    %120 = vector.extract_strided_slice %82 {offsets = [2, 0, 0], sizes = [8, 16, 4], strides = [1, 1, 1]} : vector<10x16x4xbf16> to vector<8x16x4xbf16>
    %121 = vector.shape_cast %120 : vector<8x16x4xbf16> to vector<128x4xbf16>
    %c6_73 = arith.constant 6 : index
    %c0_74 = arith.constant 0 : index
    %c0_75 = arith.constant 0 : index
    %122 = vector.load %arg4[%c6_73, %c0_74, %c0_75] : memref<9x4x4xbf16, #tpu.memory_space<vmem>>, vector<1x4x4xbf16>
    %123 = vector.shape_cast %122 : vector<1x4x4xbf16> to vector<4x4xbf16>
    %cst_76 = arith.constant dense<0.000000e+00> : vector<128x4xf32>
    %124 = tpu.matmul %121, %123, %cst_76 {dimension_numbers = #tpu.dot_dimension_numbers<[1], [0], [0], [1], [0, 0, 1, 1], [], []>} : vector<128x4xbf16>, vector<4x4xbf16>, vector<128x4xf32> -> vector<128x4xf32>
    %125 = arith.addf %119, %124 : vector<128x4xf32>
    %126 = vector.extract_strided_slice %83 {offsets = [2, 0, 0], sizes = [8, 16, 4], strides = [1, 1, 1]} : vector<10x16x4xbf16> to vector<8x16x4xbf16>
    %127 = vector.shape_cast %126 : vector<8x16x4xbf16> to vector<128x4xbf16>
    %c7_77 = arith.constant 7 : index
    %c0_78 = arith.constant 0 : index
    %c0_79 = arith.constant 0 : index
    %128 = vector.load %arg4[%c7_77, %c0_78, %c0_79] : memref<9x4x4xbf16, #tpu.memory_space<vmem>>, vector<1x4x4xbf16>
    %129 = vector.shape_cast %128 : vector<1x4x4xbf16> to vector<4x4xbf16>
    %cst_80 = arith.constant dense<0.000000e+00> : vector<128x4xf32>
    %130 = tpu.matmul %127, %129, %cst_80 {dimension_numbers = #tpu.dot_dimension_numbers<[1], [0], [0], [1], [0, 0, 1, 1], [], []>} : vector<128x4xbf16>, vector<4x4xbf16>, vector<128x4xf32> -> vector<128x4xf32>
    %131 = arith.addf %125, %130 : vector<128x4xf32>
    %132 = vector.extract_strided_slice %84 {offsets = [2, 0, 0], sizes = [8, 16, 4], strides = [1, 1, 1]} : vector<10x16x4xbf16> to vector<8x16x4xbf16>
    %133 = vector.shape_cast %132 : vector<8x16x4xbf16> to vector<128x4xbf16>
    %c8_81 = arith.constant 8 : index
    %c0_82 = arith.constant 0 : index
    %c0_83 = arith.constant 0 : index
    %134 = vector.load %arg4[%c8_81, %c0_82, %c0_83] : memref<9x4x4xbf16, #tpu.memory_space<vmem>>, vector<1x4x4xbf16>
    %135 = vector.shape_cast %134 : vector<1x4x4xbf16> to vector<4x4xbf16>
    %cst_84 = arith.constant dense<0.000000e+00> : vector<128x4xf32>
    %136 = tpu.matmul %133, %135, %cst_84 {dimension_numbers = #tpu.dot_dimension_numbers<[1], [0], [0], [1], [0, 0, 1, 1], [], []>} : vector<128x4xbf16>, vector<4x4xbf16>, vector<128x4xf32> -> vector<128x4xf32>
    %137 = arith.addf %131, %136 : vector<128x4xf32>
    %138 = vector.extract_strided_slice %3 {offsets = [2, 1, 0], sizes = [8, 16, 4], strides = [1, 1, 1]} : vector<12x18x4xbf16> to vector<8x16x4xbf16>
    %139 = arith.extf %138 : vector<8x16x4xbf16> to vector<8x16x4xf32>
    %140 = vector.shape_cast %139 : vector<8x16x4xf32> to vector<128x4xf32>
    %c0_85 = arith.constant 0 : index
    %c0_86 = arith.constant 0 : index
    %141 = vector.load %arg7[%c0_85, %c0_86] : memref<1x4xf32, #tpu.memory_space<vmem>>, vector<1x4xf32>
    %142 = vector.broadcast %141 : vector<1x4xf32> to vector<128x4xf32>
    %143 = arith.mulf %137, %142 : vector<128x4xf32>
    %c0_87 = arith.constant 0 : index
    %c0_88 = arith.constant 0 : index
    %144 = vector.load %arg8[%c0_87, %c0_88] : memref<1x4xf32, #tpu.memory_space<vmem>>, vector<1x4xf32>
    %145 = vector.broadcast %144 : vector<1x4xf32> to vector<128x4xf32>
    %146 = arith.addf %143, %145 : vector<128x4xf32>
    %147 = arith.addf %146, %140 : vector<128x4xf32>
    %cst_89 = arith.constant 0.000000e+00 : f32
    %148 = vector.broadcast %cst_89 : f32 to vector<128x4xf32>
    %149 = arith.maximumf %147, %148 : vector<128x4xf32>
    %150 = vector.shape_cast %149 : vector<128x4xf32> to vector<8x16x4xf32>
    %c0_90 = arith.constant 0 : index
    %c0_91 = arith.constant 0 : index
    %c0_92 = arith.constant 0 : index
    %c0_93 = arith.constant 0 : index
    %151 = vector.load %arg9[%c0_90, %c0_91, %c0_92, %c0_93] : memref<1x8x16x4xf32, #tpu.memory_space<vmem>>, vector<1x8x16x4xf32>
    %152 = vector.shape_cast %151 : vector<1x8x16x4xf32> to vector<8x16x4xf32>
    %153 = vector.shape_cast %150 : vector<8x16x4xf32> to vector<1x8x16x4xf32>
    tpu.vector_store %arg9[%c0_90, %c0_91, %c0_92, %c0_93], %153 {strides = array<i32>} : memref<1x8x16x4xf32, #tpu.memory_space<vmem>>, vector<1x8x16x4xf32>,
    return
  }
  func.func @transform_0(%arg0: i32, %arg1: i32) -> (i32, i32, i32, i32) {
    %c0_i32 = arith.constant 0 : i32
    %c0_i32_0 = arith.constant 0 : i32
    %c0_i32_1 = arith.constant 0 : i32
    %c0_i32_2 = arith.constant 0 : i32
    return %arg0, %c0_i32, %c0_i32_0, %c0_i32_1 : i32, i32, i32, i32
  }
  func.func @transform_1(%arg0: i32, %arg1: i32) -> (i32, i32, i32) {
    %c0_i32 = arith.constant 0 : i32
    %c0_i32_0 = arith.constant 0 : i32
    %c0_i32_1 = arith.constant 0 : i32
    %c0_i32_2 = arith.constant 0 : i32
    return %c0_i32, %c0_i32_0, %c0_i32_1 : i32, i32, i32
  }
  func.func @transform_2(%arg0: i32, %arg1: i32) -> (i32, i32, i32) {
    %c0_i32 = arith.constant 0 : i32
    %c0_i32_0 = arith.constant 0 : i32
    %c0_i32_1 = arith.constant 0 : i32
    %c0_i32_2 = arith.constant 0 : i32
    return %c0_i32, %c0_i32_0, %c0_i32_1 : i32, i32, i32
  }
  func.func @transform_3(%arg0: i32, %arg1: i32) -> (i32, i32) {
    %c0_i32 = arith.constant 0 : i32
    %c0_i32_0 = arith.constant 0 : i32
    %c0_i32_1 = arith.constant 0 : i32
    return %c0_i32, %c0_i32_0 : i32, i32
  }
  func.func @transform_4(%arg0: i32, %arg1: i32) -> (i32, i32) {
    %c0_i32 = arith.constant 0 : i32
    %c0_i32_0 = arith.constant 0 : i32
    %c0_i32_1 = arith.constant 0 : i32
    return %c0_i32, %c0_i32_0 : i32, i32
  }
  func.func @transform_5(%arg0: i32, %arg1: i32) -> (i32, i32) {
    %c0_i32 = arith.constant 0 : i32
    %c0_i32_0 = arith.constant 0 : i32
    %c0_i32_1 = arith.constant 0 : i32
    return %c0_i32, %c0_i32_0 : i32, i32
  }
  func.func @transform_6(%arg0: i32, %arg1: i32) -> (i32, i32) {
    %c0_i32 = arith.constant 0 : i32
    %c0_i32_0 = arith.constant 0 : i32
    %c0_i32_1 = arith.constant 0 : i32
    return %c0_i32, %c0_i32_0 : i32, i32
  }
  func.func @transform_7(%arg0: i32, %arg1: i32) -> (i32, i32, i32, i32) {
    %c0_i32 = arith.constant 0 : i32
    %c0_i32_0 = arith.constant 0 : i32
    %c0_i32_1 = arith.constant 0 : i32
    return %arg0, %arg1, %c0_i32, %c0_i32_0 : i32, i32, i32, i32
  }
}

</mosaic_0001>

<bundles_post_ra>
// kernel: tpu_custom_call.1
= control target key start
LH: loop header
LB: loop body
LE: loop exit
PB: predicated region body
PF: predicated region fallthrough
CT: control target
= control target key end

     0   :  { %s5572_s24 = smov 0   ;;  %s5574_s25 = smov 0   ;;  %s7658_s0 = inlined_call_operand.vmem [shape: bf16[2,20,18,4], index: 0, kind: input, shape index: {}]   ;;  %s7659_s1 = inlined_call_operand.vmem [shape: bf16[9,4,4], index: 1, kind: input, shape index: {}]   ;;  %s7660_s2 = inlined_call_operand.vmem [shape: bf16[9,4,4], index: 2, kind: input, shape index: {}]   ;;  %s7661_s3 = inlined_call_operand.vmem [shape: f32[1,4], index: 3, kind: input, shape index: {}]   ;;  %s7662_s4 = inlined_call_operand.vmem [shape: f32[1,4], index: 4, kind: input, shape index: {}]   ;;  %s7663_s5 = inlined_call_operand.vmem [shape: f32[1,4], index: 5, kind: input, shape index: {}]   ;;  %s7664_s6 = inlined_call_operand.vmem [shape: f32[1,4], index: 6, kind: input, shape index: {}]   ;;  %s7665_s7 = inlined_call_operand.vmem [shape: f32[2,16,16,4], index: 7, kind: output, shape index: {}]  }
   0x1   :  { %s5576_s26 = smov 0   ;;  %s5578_s27 = smov 0  }
   0x2   :  { %s5580_s28 = smov 0  }
   0x3 LB: > { %s26_s29 = sadd.s32 1, %s5520_s26  ;;  %s29_s30 = sadd.s32 1, %s5524_s27  ;;  %s5528_s28 = sphi %s5580_s28, %s17_s28   ;;  %s5524_s27 = sphi %s5578_s27, %s7898_s27   ;;  %s5520_s26 = sphi %s5576_s26, %s7897_s26   ;;  %s5516_s25 = sphi %s5574_s25, %s7896_s25   ;;  %s5512_s24 = sphi %s5572_s24, %s7895_s24  }
   0x4   : > { %p27_p0 = scmp.ge.s32.totalorder %s26_s29, 2  ;;  %p4543_p1 = scmp.ge.s32.totalorder %s5528_s28, 1 }
   0x5   : > { %p251_p2 = scmp.lt.s32.totalorder %s5528_s28, 5 }
   0x6   : > { %s7900_s29 = smov (%p27_p0, %s26_s29), 0  ;;  %s7902_s30 = smov (!%p27_p0, %s29_s30), %s5524_s27 }
   0x7   : > { %p252_p3 = pnand %p4543_p1, %p251_p2  ;;  %p31_p4 = scmp.ge.s32.totalorder %s7902_s30, 2 }
   0x9   : > { %s7904_s30 = smov (%p31_p4, %s7902_s30), 0  ;;  %255 = sbr.rel (%p252_p3) target bundleno = 873 (0x369), region = 48 }
   0xe   : > { %v4552_v0 = vld [vmem:[%s7659_s1 + $0x2] sm:$0x3]  ;;  %vm652_vm0 = vcmask 1041408   ;;  %v345_v1 = vld [vmem:[%s7659_s1] sm:$0x3]  ;;  %p288_p5 = scmp.lt.s32.totalorder %s5516_s25, 1 }
   0xf   : > { %5407 = vmatprep.subr.msk.bf16.mxu0 %vm652_vm0, %v4552_v0  ;;  %v654_v2 = vsel %vm652_vm0, %v4552_v0, 0  ;;  %5408 = vmatprep.subr.msk.bf16.mxu1 %vm652_vm0, %v345_v1  ;;  %v850_v3 = vsel %vm652_vm0, %v345_v1, 0  ;;  %s4545_s12 = sshll.u32 %s5512_s24, 3  ;;  %v4603_v4 = vld [vmem:[%s7659_s1 + $0x4] sm:$0x3]  ;;  %s4846_s15 = smul.u32 96, %s5512_s24 }
  0x10   : > { %5048 = vmatpush3.bf16.msra.mxu0 %v654_v2  ;;  %5070 = vmatpush3.bf16.msra.mxu1 %v850_v3  ;;  %s7906_s25 = smov (!%p288_p5, %s5516_s25), 1  ;;  %p296_p6 = scmp.lt.s32.totalorder %s4545_s12, 15  ;;  %v4624_v5 = vld [vmem:[%s7659_s1 + $0x6] sm:$0x3]  ;;  %vm346_vm1 = vsmask.f32 3328 }
  0x11   : > { %5409 = vmatprep.subr.msk.bf16.mxu0 %vm652_vm0, %v4603_v4  ;;  %s5425_s18 = smul.u32 240, %s7906_s25  ;;  %s4547_s19 = sshll.u32 %s7906_s25, 5  ;;  %5410 = vmatprep.subr.msk.bf16.mxu1 %vm652_vm0, %v4624_v5  ;;  %vm347_vm2 = vsmask.f32 7440  ;;  %vm621_vm3 = vcmask 31744   ;;  %v5630_v6 = vsel %vm652_vm0, %v4603_v4, 0 }
  0x12   : > { %s7908_s12 = smov (!%p296_p6, %s4545_s12), 15  ;;  %v1257_v18 = vsel %vm652_vm0, %v4624_v5, 0  ;;  %vm5674_vm4 = vmor %vm346_vm1, %vm347_vm2  ;;  %v7705_v33 = vmov 0  ;;  %v5702_v53 = vld [vmem:[%s7659_s1 + $0xa] sm:$0x3]  ;;  %vm975_vm5 = vcmask 1042432  }
  0x13   : > { %s292_s22 = scalar_lea.vmem %s7658_s0, %s5425_s18  ;;  %s4546_s23 = sshll.u32 %s7908_s12, 1  ;;  %v7706_v33 = vsel %vm5674_vm4, 4294967295, %v7705_v33  ;;  %vm976_vm6 = vcmask 1046532   ;;  %vm2515_vm8 = vcmask 27648   ;;  %vm2516_vm9 = vsmask.f32 7938 }
  0x14   : > { %s5627_s8 = scalar_lea.vmem %s292_s22, %s4846_s15  ;;  %s300_s25 = sadd.s32 %s4547_s19, %s4546_s23  ;;  %7707 = vst [vmem:[#allocation4_spill] sm:$0xff] %v7706_v33  ;;  %vm5921_vm7 = vmor %vm975_vm5, %vm976_vm6  ;;  %vm2312_vm10 = vsmask.f32 256  ;;  %vm2523_vm11 = vcmask 24576   ;;  %vm2313_vm12 = vsmask.f32 4368 }
  0x15   : > { %v5633_v7 = vld [vmem:[%s5627_s8] sm:$0xf]  ;;  %v5636_v8 = vld [vmem:[%s5627_s8 + $0x4] sm:$0xf]  ;;  %v5639_v9 = vld [vmem:[%s5627_s8 + $0x8] sm:$0x1] }
  0x16   : > { %s4548_s9 = sshll.u32 %s300_s25, 3  ;;  %v350_v10 = vshrl.u32 %v5633_v7, 16  ;;  %v353_v11 = vshll.u32 %v5633_v7, 16  ;;  %v359_v12 = vshll.u32 %v5636_v8, 16  ;;  %v363_v13 = vshrl.u32 %v5636_v8, 16  ;;  %vm6580_vm13 = vmand %vm2515_vm8, %vm2516_vm9  ;;  %p4720_p7 = scmp.ne.s32.totalorder %s5512_s24, 0 }
  0x17   : > { %s5648_s12 = scalar_lea.vmem %s7665_s7, %s4548_s9  ;;  %v369_v14 = vshll.u32 %v5639_v9, 16  ;;  %v4573_v15 = vcombine.low %v5633_v7, %v5636_v8  ;;  %v5654_v16 = vld [vmem:[%s5627_s8 + $0xc] sm:$0xf]  ;;  %v5657_v17 = vld [vmem:[%s5627_s8 + $0x10] sm:$0xf]  ;;  %vm6590_vm14 = vmand %vm2523_vm11, %vm2312_vm10 }
  0x18   : > { %v352_v19 = vrot.slane %v350_v10, 4  ;;  %v355_v20 = vrot.slane %v353_v11, 5  ;;  %v361_v21 = vrot.slane %v359_v12, 5  ;;  %v365_v22 = vrot.slane %v363_v13, 4  ;;  %v5661_v23 = vld [vmem:[%s5627_s8 + $0x14] sm:$0x1]  ;;  %vm6598_vm15 = vmor %vm2312_vm10, %vm2313_vm12 }
  0x19   : > { %v371_v24 = vrot.slane %v369_v14, 5  ;;  %5071 = vmatprep.mubr.msk.bf16.mxu1 %vm621_vm3, %v4573_v15  ;;  %v374_v25 = vshrl.u32 %v5654_v16, 16  ;;  %v377_v26 = vshll.u32 %v5654_v16, 16  ;;  %v383_v27 = vshll.u32 %v5657_v17, 16  ;;  %v5670_v32 = vld [vmem:[%s5627_s8 + $0x18] sm:$0xf]  ;;  %vm6639_vm1 = vmand %vm2523_vm11, %vm2516_vm9 }
  0x1a   : > { %v356_v28 = vor.u32 %v355_v20, %v352_v19  ;;  %v366_v29 = vor.u32 %v365_v22, %v361_v21  ;;  %v387_v30 = vshrl.u32 %v5657_v17, 16  ;;  %v393_v31 = vshll.u32 %v5661_v23, 16  ;;  %7704 = vst [vmem:[#allocation3_spill] sm:$0xff] %v5670_v32  ;;  %v5681_v42 = vld [vmem:[%s5627_s8 + $0x1c] sm:$0xf] }
  0x1b   : > { %v376_v35 = vrot.slane %v374_v25, 4  ;;  %v379_v36 = vrot.slane %v377_v26, 5  ;;  %v385_v37 = vrot.slane %v383_v27, 5  ;;  %7708 = vst [vmem:[#allocation5_spill] sm:$0xff] %v5681_v42  ;;  %v5685_v45 = vcombine.low %v5654_v16, %v5657_v17  ;;  %v5688_v46 = vld [vmem:[%s5627_s8 + $0x20] sm:$0x1] }
  0x1c   : > { %v357_v38 = vrot.slane %v356_v28, 4  ;;  %v367_v39 = vrot.slane %v366_v29, 4  ;;  %v389_v40 = vrot.slane %v387_v30, 4  ;;  %v395_v44 = vrot.slane %v393_v31, 5  ;;  %7709 = vst [vmem:[#allocation6_spill] sm:$0xff] %v5688_v46 }
  0x1d   : > { %v380_v43 = vor.u32 %v379_v36, %v376_v35  ;;  %v398_v47 = vshrl.u32 %v5670_v32, 16  ;;  %v401_v51 = vshll.u32 %v5670_v32, 16  ;;  %v5697_v52 = vld [vmem:[%s5627_s8 + $0x24] sm:$0xf]  ;;  %5072 = vmatmul.mubr.msk.bf16.vlgmr.msra.gmra.mxu1 %vm621_vm3, %v5685_v45  ;;  %v407_v57 = vshll.u32 %v5681_v42, 16 }
  0x1e   : > { %v362_v48 = vsel %vm5674_vm4, %v357_v38, %v361_v21  ;;  %v372_v49 = vsel %vm5674_vm4, %v367_v39, %v371_v24  ;;  %v390_v50 = vor.u32 %v389_v40, %v385_v37  ;;  %7710 = vst [vmem:[#allocation7_spill] sm:$0xff] %v5697_v52  ;;  %v411_v60 = vshrl.u32 %v5681_v42, 16  ;;  %v5710_v62 = vld [vmem:[%s5627_s8 + $0x28] sm:$0xf]  ;;  %5114 = vmatpush3.bf16.msra.mxu1 %v1257_v18  ;;  %v5720_v2 = vld [vmem:[%s5627_s8 + $0x2c] sm:$0x1] }
  0x1f   : > { %v4553_v54 = vcombine.low %v362_v48, %v372_v49  ;;  %v381_v55 = vrot.slane %v380_v43, 4  ;;  %v400_v56 = vrot.slane %v398_v47, 4  ;;  %v403_v59 = vrot.slane %v401_v51, 5  ;;  %7711 = vst [vmem:[#allocation8_spill] sm:$0xff] %v5710_v62  ;;  %7712 = vst [vmem:[#allocation9_spill] sm:$0xff] %v5720_v2  ;;  %5412 = vmatprep.subr.msk.bf16.mxu1 %vm652_vm0, %v5702_v53 }
  0x20   : > { %v391_v58 = vrot.slane %v390_v50, 4  ;;  %v417_v61 = vshll.u32 %v5688_v46, 16  ;;  %v409_v0 = vrot.slane %v407_v57, 5  ;;  %v5717_v1 = vcombine.low %v5670_v32, %v5681_v42  ;;  %v5728_v12 = vld [vmem:[%s5627_s8 + $0x30] sm:$0xf] }
  0x21   : > { %5049 = vmatprep.mubr.msk.bf16.mxu0 %vm621_vm3, %v4553_v54  ;;  %v386_v63 = vsel %vm5674_vm4, %v381_v55, %v385_v37  ;;  %v422_v3 = vshrl.u32 %v5697_v52, 16  ;;  %v404_v5 = vor.u32 %v403_v59, %v400_v56  ;;  %v413_v10 = vrot.slane %v411_v60, 4  ;;  %7713 = vst [vmem:[#allocation10_spill] sm:$0xff] %v5728_v12  ;;  %v5739_v19 = vld [vmem:[%s7659_s1 + $0x8] sm:$0x3] }
  0x22   : > { %v396_v4 = vsel %vm5674_vm4, %v391_v58, %v395_v44  ;;  %v419_v11 = vrot.slane %v417_v61, 5  ;;  %5075 = vmatprep.mubr.msk.bf16.mxu1 %vm621_vm3, %v5717_v1  ;;  %v425_v15 = vshll.u32 %v5697_v52, 16  ;;  %v431_v18 = vshll.u32 %v5710_v62, 16  ;;  %v5744_v25 = vld [vmem:[%s5627_s8 + $0x34] sm:$0xf] }
  0x23   : > { %v5730_v13 = vcombine.low %v386_v63, %v396_v4  ;;  %v424_v14 = vrot.slane %v422_v3, 4  ;;  %v405_v20 = vrot.slane %v404_v5, 4  ;;  %v414_v21 = vor.u32 %v413_v10, %v409_v0  ;;  %7714 = vst [vmem:[#allocation11_spill] sm:$0xff] %v5744_v25  ;;  %v5753_v29 = vld [vmem:[%s5627_s8 + $0x38] sm:$0x1] }
  0x24   : > { %v435_v22 = vshrl.u32 %v5710_v62, 16  ;;  %v441_v24 = vshll.u32 %v5720_v2, 16  ;;  %v427_v26 = vrot.slane %v425_v15, 5  ;;  %v433_v27 = vrot.slane %v431_v18, 5  ;;  %7715 = vst [vmem:[#allocation12_spill] sm:$0xff] %v5753_v29 }
  0x25   : > { %5050 = vmatmul.mubr.msk.bf16.vlgmr.msra.gmra.mxu0 %vm621_vm3, %v5730_v13  ;;  %v5750_v28 = vcombine.low %v5697_v52, %v5710_v62  ;;  %v446_v30 = vshrl.u32 %v5728_v12, 16  ;;  %v410_v31 = vsel %vm5674_vm4, %v405_v20, %v409_v0  ;;  %v415_v35 = vrot.slane %v414_v21, 4  ;;  %v5770_v49 = vld [vmem:[%s5627_s8 + $0x3c] sm:$0xf]  ;;  %v5775_v56 = vld [vmem:[%s5627_s8 + $0x40] sm:$0xf] }
  0x26   : > { %5092 = vmatpush3.bf16.msra.mxu0 %v5630_v6  ;;  %v437_v36 = vrot.slane %v435_v22, 4  ;;  %v443_v37 = vrot.slane %v441_v24, 5  ;;  %v428_v38 = vor.u32 %v427_v26, %v424_v14  ;;  %v449_v40 = vshll.u32 %v5728_v12, 16  ;;  %7716 = vst [vmem:[#allocation13_spill] sm:$0xff] %v5770_v49  ;;  %7717 = vst [vmem:[#allocation14_spill] sm:$0xff] %v5775_v56 }
  0x27   : > { %5076 = vmatmul.mubr.msk.bf16.gmra.mxu1 %vm621_vm3, %v5750_v28  ;;  %v448_v39 = vrot.slane %v446_v30, 4  ;;  %v455_v43 = vshll.u32 %v5744_v25, 16  ;;  %5411 = vmatprep.subr.msk.bf16.mxu0 %vm652_vm0, %v5739_v19  ;;  %v420_v6 = vsel %vm5674_vm4, %v415_v35, %v419_v11  ;;  %v459_v47 = vshrl.u32 %v5744_v25, 16  ;;  %v5786_v0 = vld [vmem:[%s5627_s8 + $0x44] sm:$0x1] }
  0x28   : > { %v438_v44 = vor.u32 %v437_v36, %v433_v27  ;;  %v465_v48 = vshll.u32 %v5753_v29, 16  ;;  %v5772_v50 = vcombine.low %v410_v31, %v420_v6  ;;  %v429_v51 = vrot.slane %v428_v38, 4  ;;  %7718 = vst [vmem:[#allocation15_spill] sm:$0xff] %v5786_v0  ;;  %v5797_v15 = vld [vmem:[%s5627_s8 + $0x48] sm:$0xf] }
  0x29   : > { %v451_v54 = vrot.slane %v449_v40, 5  ;;  %v457_v55 = vrot.slane %v455_v43, 5  ;;  %v461_v58 = vrot.slane %v459_v47, 4  ;;  %v5779_v60 = vcombine.low %v5728_v12, %v5744_v25  ;;  %7719 = vst [vmem:[#allocation16_spill] sm:$0xff] %v5797_v15  ;;  %v5803_v31 = vld [vmem:[%s5627_s8 + $0x4c] sm:$0xf] }
  0x2a   : > { %v439_v57 = vrot.slane %v438_v44, 4  ;;  %v467_v59 = vrot.slane %v465_v48, 5  ;;  %5053 = vmatprep.mubr.msk.bf16.mxu0 %vm621_vm3, %v5772_v50  ;;  %v434_v61 = vsel %vm5674_vm4, %v429_v51, %v433_v27  ;;  %v470_v3 = vshrl.u32 %v5770_v49, 16  ;;  %7721 = vst [vmem:[#allocation18_spill] sm:$0xff] %v5803_v31  ;;  %v5814_v38 = vld [vmem:[%s5627_s8 + $0x50] sm:$0x1] }
  0x2b   : > { %v452_v63 = vor.u32 %v451_v54, %v448_v39  ;;  %v473_v4 = vshll.u32 %v5770_v49, 16  ;;  %v462_v10 = vor.u32 %v461_v58, %v457_v55  ;;  %5079 = vmatprep.mubr.msk.bf16.mxu1 %vm621_vm3, %v5779_v60  ;;  %v479_v11 = vshll.u32 %v5775_v56, 16  ;;  %7722 = vst [vmem:[#allocation19_spill] sm:$0xff] %v5814_v38  ;;  %v5821_v47 = vld [vmem:[%s5627_s8 + $0x54] sm:$0xf] }
  0x2c   : > { %v444_v5 = vsel %vm5674_vm4, %v439_v57, %v443_v37  ;;  %v483_v14 = vshrl.u32 %v5775_v56, 16  ;;  %v472_v21 = vrot.slane %v470_v3, 4  ;;  %v489_v30 = vshll.u32 %v5786_v0, 16  ;;  %7723 = vst [vmem:[#allocation20_spill] sm:$0xff] %v5821_v47 }
  0x2d   : > { %v5799_v18 = vcombine.low %v434_v61, %v444_v5  ;;  %v453_v20 = vrot.slane %v452_v63, 4  ;;  %v475_v22 = vrot.slane %v473_v4, 5  ;;  %v463_v24 = vrot.slane %v462_v10, 4  ;;  %v5831_v63 = vld [vmem:[%s5627_s8 + $0x58] sm:$0xf] }
  0x2e   : > { %v481_v26 = vrot.slane %v479_v11, 5  ;;  %v485_v27 = vrot.slane %v483_v14, 4  ;;  %v5811_v37 = vcombine.low %v5770_v49, %v5775_v56  ;;  %v494_v39 = vshrl.u32 %v5797_v15, 16  ;;  %7725 = vst [vmem:[#allocation22_spill] sm:$0xff] %v5831_v63  ;;  %v5842_v10 = vld [vmem:[%s5627_s8 + $0x5c] sm:$0x1] }
  0x2f   : > { %7720 = vst [vmem:[#allocation17_spill] sm:$0xff] %v5799_v18  ;;  %5054 = vmatmul.mubr.msk.bf16.gmra.mxu0 %vm621_vm3, %v5799_v18  ;;  %v458_v35 = vsel %vm5674_vm4, %v453_v20, %v457_v55  ;;  %v476_v36 = vor.u32 %v475_v22, %v472_v21  ;;  %v468_v40 = vsel %vm5674_vm4, %v463_v24, %v467_v59  ;;  %v491_v6 = vrot.slane %v489_v30, 5  ;;  %v5848_v24 = vld [vmem:[%s5627_s8 + $0x60] sm:$0xf] }
  0x30   : > { %v486_v43 = vor.u32 %v485_v27, %v481_v26  ;;  %v497_v44 = vshll.u32 %v5797_v15, 16  ;;  %v5823_v48 = vcombine.low %v458_v35, %v468_v40  ;;  %5080 = vmatmul.mubr.msk.bf16.gmra.mxu1 %vm621_vm3, %v5811_v37  ;;  %v496_v54 = vrot.slane %v494_v39, 4  ;;  %7726 = vst [vmem:[#allocation23_spill] sm:$0xff] %v5842_v10  ;;  %7727 = vst [vmem:[#allocation24_spill] sm:$0xff] %v5848_v24 }
  0x31   : > { %v477_v51 = vrot.slane %v476_v36, 4  ;;  %v503_v55 = vshll.u32 %v5803_v31, 16  ;;  %v507_v59 = vshrl.u32 %v5803_v31, 16  ;;  %v513_v61 = vshll.u32 %v5814_v38, 16 }
  0x32   : > { %7724 = vst [vmem:[#allocation21_spill] sm:$0xff] %v5823_v48  ;;  %v487_v57 = vrot.slane %v486_v43, 4  ;;  %v499_v58 = vrot.slane %v497_v44, 5  ;;  %5057 = vmatprep.mubr.msk.bf16.mxu0 %vm621_vm3, %v5823_v48  ;;  %v5839_v5 = vcombine.low %v5797_v15, %v5803_v31  ;;  %v518_v11 = vshrl.u32 %v5821_v47, 16 }
  0x33   : > { %v482_v3 = vsel %vm5674_vm4, %v477_v51, %v481_v26  ;;  %v505_v4 = vrot.slane %v503_v55, 5  ;;  %v509_v21 = vrot.slane %v507_v59, 4  ;;  %v515_v22 = vrot.slane %v513_v61, 5  ;;  %v5868_v55 = vld [vmem:[%s5627_s8 + $0x68] sm:$0x1] }
  0x34   : > { %v492_v14 = vsel %vm5674_vm4, %v487_v57, %v491_v6  ;;  %v500_v20 = vor.u32 %v499_v58, %v496_v54  ;;  %5083 = vmatprep.mubr.msk.bf16.mxu1 %vm621_vm3, %v5839_v5  ;;  %v520_v26 = vrot.slane %v518_v11, 4  ;;  %v521_v30 = vshll.u32 %v5821_v47, 16  ;;  %v5859_v6 = vld [vmem:[%s5627_s8 + $0x64] sm:$0xf]  ;;  %7730 = vst [vmem:[#allocation27_spill] sm:$0xff] %v5868_v55 }
  0x35   : > { %v5850_v27 = vcombine.low %v482_v3, %v492_v14  ;;  %v527_v35 = vshll.u32 %v5831_v63, 16  ;;  %v510_v39 = vor.u32 %v509_v21, %v505_v4  ;;  %v531_v40 = vshrl.u32 %v5831_v63, 16  ;;  %7729 = vst [vmem:[#allocation26_spill] sm:$0xff] %v5859_v6 }
  0x36   : > { %v501_v36 = vrot.slane %v500_v20, 4  ;;  %v537_v43 = vshll.u32 %v5842_v10, 16  ;;  %v523_v44 = vrot.slane %v521_v30, 5  ;;  %v5865_v54 = vcombine.low %v5821_v47, %v5831_v63 }
  0x37   : > { %7728 = vst [vmem:[#allocation25_spill] sm:$0xff] %v5850_v27  ;;  %5058 = vmatmul.mubr.msk.bf16.gmra.mxu0 %vm621_vm3, %v5850_v27  ;;  %v529_v51 = vrot.slane %v527_v35, 5  ;;  %v542_v57 = vshrl.u32 %v5848_v24, 16  ;;  %v511_v59 = vrot.slane %v510_v39, 4  ;;  %v533_v61 = vrot.slane %v531_v40, 4 }
  0x38   : > { %v506_v58 = vsel %vm5674_vm4, %v501_v36, %v505_v4  ;;  %v539_v3 = vrot.slane %v537_v43, 5  ;;  %v524_v11 = vor.u32 %v523_v44, %v520_v26  ;;  %5084 = vmatmul.mubr.msk.bf16.gmra.mxu1 %vm621_vm3, %v5865_v54  ;;  %v545_v20 = vshll.u32 %v5848_v24, 16  ;;  %v5882_v39 = vld [vmem:[%s5627_s8 + $0x6c] sm:$0xf] }
  0x39   : > { %v544_v14 = vrot.slane %v542_v57, 4  ;;  %v551_v21 = vshll.u32 %v5859_v6, 16  ;;  %v516_v30 = vsel %vm5674_vm4, %v511_v59, %v515_v22  ;;  %v534_v35 = vor.u32 %v533_v61, %v529_v51  ;;  %7731 = vst [vmem:[#allocation28_spill] sm:$0xff] %v5882_v39  ;;  %v5887_v57 = vld [vmem:[%s5627_s8 + $0x70] sm:$0xf] }
  0x3a   : > { %v555_v4 = vshrl.u32 %v5859_v6, 16  ;;  %v561_v36 = vshll.u32 %v5868_v55, 16  ;;  %v5884_v26 = vcombine.low %v506_v58, %v516_v30  ;;  %v525_v40 = vrot.slane %v524_v11, 4  ;;  %7733 = vst [vmem:[#allocation30_spill] sm:$0xff] %v5887_v57  ;;  %v5898_v61 = vld [vmem:[%s5627_s8 + $0x74] sm:$0x1] }
  0x3b   : > { %v547_v43 = vrot.slane %v545_v20, 5  ;;  %v553_v44 = vrot.slane %v551_v21, 5  ;;  %v535_v41 = vrot.slane %v534_v35, 4  ;;  %v5891_v22 = vcombine.low %v5848_v24, %v5859_v6  ;;  %7734 = vst [vmem:[#allocation31_spill] sm:$0xff] %v5898_v61 }
  0x3c   : > { %7732 = vst [vmem:[#allocation29_spill] sm:$0xff] %v5884_v26  ;;  %v557_v34 = vrot.slane %v555_v4, 4  ;;  %v563_v27 = vrot.slane %v561_v36, 5  ;;  %5061 = vmatprep.mubr.msk.bf16.mxu0 %vm621_vm3, %v5884_v26  ;;  %v530_v59 = vsel %vm5674_vm4, %v525_v40, %v529_v51  ;;  %v566_v11 = vshrl.u32 %v5882_v39, 16 }
  0x3d   : > { %v548_v58 = vor.u32 %v547_v43, %v544_v14  ;;  %v569_v20 = vshll.u32 %v5882_v39, 16  ;;  %v540_v21 = vsel %vm5674_vm4, %v535_v41, %v539_v3  ;;  %5087 = vmatprep.mubr.msk.bf16.mxu1 %vm621_vm3, %v5891_v22  ;;  %v575_v35 = vshll.u32 %v5887_v57, 16 }
  0x3e   : > { %v558_v30 = vor.u32 %v557_v34, %v553_v44  ;;  %v579_v4 = vshrl.u32 %v5887_v57, 16  ;;  %v5908_v36 = vcombine.low %v530_v59, %v540_v21  ;;  %v568_v14 = vrot.slane %v566_v11, 4 }
  0x3f   : > { %v549_v51 = vrot.slane %v548_v58, 4  ;;  %v571_v40 = vrot.slane %v569_v20, 5  ;;  %v577_v26 = vrot.slane %v575_v35, 5  ;;  %v585_v18 = vshll.u32 %v5898_v61, 16 }
  0x40   : > { %v559_v43 = vrot.slane %v558_v30, 4  ;;  %v581_v48 = vrot.slane %v579_v4, 4  ;;  %5062 = vmatmul.mubr.msk.bf16.gmra.mxu0 %vm621_vm3, %v5908_v36  ;;  %v5917_v3 = vcombine.low %v5882_v39, %v5887_v57  ;;  %v7735_v59 = vmov 0 }
  0x41   : > { %v554_v34 = vsel %vm5674_vm4, %v549_v51, %v553_v44  ;;  %v572_v41 = vor.u32 %v571_v40, %v568_v14  ;;  %v7736_v59 = vsel %vm5921_vm7, 4294967295, %v7735_v59  ;;  %v4593_v58 = vrot.slane %v5633_v7, 9 }
  0x42   : > { %7737 = vst [vmem:[#allocation32_spill] sm:$0xff] %v7736_v59  ;;  %v564_v11 = vsel %vm5674_vm4, %v559_v43, %v563_v27  ;;  %v582_v20 = vor.u32 %v581_v48, %v577_v26  ;;  %v587_v21 = vrot.slane %v585_v18, 5  ;;  %v980_v44 = vrot.slane %v5636_v8, 5  ;;  %5088 = vmatmul.mubr.msk.bf16.gmra.mxu1 %vm621_vm3, %v5917_v3 }
  0x43   : > { %v5929_v30 = vcombine.low %v554_v34, %v564_v11  ;;  %v573_v35 = vrot.slane %v572_v41, 4  ;;  %5115 = vmatprep.mubr.msk.bf16.mxu1 %vm621_vm3, %v5685_v45  ;;  %v990_v7 = vrot.slane %v5661_v23, 5  ;;  %v4594_v18 = vrot.slane %v5654_v16, 9 }
  0x44   : > { %v583_v4 = vrot.slane %v582_v20, 4  ;;  %v981_v51 = vsel %vm5921_vm7, %v4593_v58, %v980_v44  ;;  %v982_v14 = vrot.slane %v980_v44, 4  ;;  %v994_v48 = vrot.slane %v5681_v42, 5 }
  0x45   : > { %5065 = vmatprep.mubr.msk.bf16.mxu0 %vm621_vm3, %v5929_v30  ;;  %v578_v8 = vsel %vm5674_vm4, %v573_v35, %v577_v26  ;;  %v7738_v40 = vrot.slane %v5639_v9, 5  ;;  %v7739_v23 = vrot.slane %v5657_v17, 5  ;;  %v4595_v34 = vrot.slane %v5670_v32, 9  ;;  %v5971_v35 = vld [vmem:[%s7659_s1 + $0xe] sm:$0x3] }
  0x46   : > { %v588_v27 = vsel %vm5674_vm4, %v583_v4, %v587_v21  ;;  %v996_v58 = vrot.slane %v994_v48, 4  ;;  %v997_v16 = vrot.slane %v5688_v46, 5  ;;  %v1577_v9 = vsel %vm652_vm0, %v5702_v53, 0 }
  0x47   : > { %v984_v45 = vsel %vm5921_vm7, %v982_v14, %v7738_v40  ;;  %v989_v43 = vrot.slane %v7739_v23, 4  ;;  %v5953_v41 = vcombine.low %v578_v8, %v588_v27  ;;  %v7740_v11 = vmov %v7739_v23  ;;  %v5997_v23 = vld [vmem:[%s7659_s1 + $0xc] sm:$0x3] }
  0x48   : > { %v4604_v26 = vcombine.low %v981_v51, %v984_v45  ;;  %v988_v20 = vsel %vm5921_vm7, %v4594_v18, %v7740_v11  ;;  %v1001_v44 = vrot.slane %v5710_v62, 5  ;;  %v995_v53 = vsel %vm5921_vm7, %v4595_v34, %v994_v48 }
  0x49   : > { %5066 = vmatmul.mubr.msk.bf16.gmra.mxu0 %vm621_vm3, %v5953_v41  ;;  %v991_v21 = vsel %vm5921_vm7, %v989_v43, %v990_v7  ;;  %v998_v17 = vsel %vm5921_vm7, %v996_v58, %v997_v16  ;;  %v1008_v4 = vrot.slane %v5744_v25, 5  ;;  %v4596_v7 = vrot.slane %v5697_v52, 9 }
  0x4a   : > { %5093 = vmatprep.mubr.msk.bf16.mxu0 %vm621_vm3, %v4604_v26  ;;  %5116 = vmatmul.mubr.msk.bf16.vlgmr.msra.gmra.mxu1 %vm621_vm3, %v5717_v1  ;;  %v5982_v51 = vcombine.low %v988_v20, %v991_v21  ;;  %v5986_v14 = vcombine.low %v995_v53, %v998_v17  ;;  %v1003_v8 = vrot.slane %v1001_v44, 4  ;;  %v1004_v18 = vrot.slane %v5720_v2, 5  ;;  %v6024_v21 = vld [vmem:[%s5627_s8 + $0x78] sm:$0xf] }
  0x4b   : > { %5119 = vmatprep.mubr.msk.bf16.mxu1 %vm621_vm3, %v5750_v28  ;;  %5158 = vmatpush3.bf16.msra.mxu1 %v1577_v9  ;;  %v1425_v48 = vsel %vm652_vm0, %v5739_v19, 0  ;;  %v4597_v27 = vrot.slane %v5728_v12, 9  ;;  %v1010_v40 = vrot.slane %v1008_v4, 4  ;;  %v1011_v45 = vrot.slane %v5753_v29, 5 }
  0x4c   : > { %5414 = vmatprep.subr.msk.bf16.mxu1 %vm652_vm0, %v5971_v35  ;;  %v1002_v19 = vsel %vm5921_vm7, %v4596_v7, %v1001_v44  ;;  %v1005_v43 = vsel %vm5921_vm7, %v1003_v8, %v1004_v18  ;;  %v1015_v34 = vrot.slane %v5775_v56, 5  ;;  %v1022_v16 = vrot.slane %v5803_v31, 5  ;;  %v6027_v44 = vld [vmem:[%s5627_s8 + $0x7c] sm:$0xf]  ;;  %v6034_v8 = vld [vmem:[%s5627_s8 + $0x80] sm:$0x1] }
  0x4d   : > { %v1009_v26 = vsel %vm5921_vm7, %v4597_v27, %v1008_v4  ;;  %v1012_v58 = vsel %vm5921_vm7, %v1010_v40, %v1011_v45  ;;  %v6019_v9 = vcombine.low %v1002_v19, %v1005_v43  ;;  %v4598_v11 = vrot.slane %v5770_v49, 9 }
  0x4e   : > { %v1018_v20 = vrot.slane %v5786_v0, 5  ;;  %v6029_v53 = vcombine.low %v1009_v26, %v1012_v58  ;;  %v1017_v17 = vrot.slane %v1015_v34, 4  ;;  %v4599_v4 = vrot.slane %v5797_v15, 9 }
  0x4f   : > { %v1025_v7 = vrot.slane %v5814_v38, 5  ;;  %v1024_v18 = vrot.slane %v1022_v16, 4  ;;  %v1563_v27 = vrot.slane %v6027_v44, 5  ;;  %v1566_v40 = vrot.slane %v6034_v8, 5 }
  0x50   : > { %v1016_v43 = vsel %vm5921_vm7, %v4598_v11, %v1015_v34  ;;  %v1019_v26 = vsel %vm5921_vm7, %v1017_v17, %v1018_v20  ;;  %v1029_v58 = vrot.slane %v5831_v63, 5  ;;  %v1023_v38 = vsel %vm5921_vm7, %v4599_v4, %v1022_v16 }
  0x51   : > { %5094 = vmatmul.mubr.msk.bf16.vlgmr.msra.gmra.mxu0 %vm621_vm3, %v5982_v51  ;;  %v1565_v19 = vrot.slane %v1563_v27, 4  ;;  %v6063_v20 = vcombine.low %v1016_v43, %v1019_v26  ;;  %v4600_v31 = vrot.slane %v5821_v47, 9  ;;  %v1032_v4 = vrot.slane %v5842_v10, 5 }
  0x52   : > { %5136 = vmatpush3.bf16.msra.mxu0 %v1425_v48  ;;  %5097 = vmatprep.mubr.msk.bf16.mxu0 %vm621_vm3, %v5986_v14  ;;  %v4648_v48 = vrot.slane %v6024_v21, 9  ;;  %v1031_v16 = vrot.slane %v1029_v58, 4  ;;  %v1043_v43 = vrot.slane %v5887_v57, 5  ;;  %v6116_v10 = vcombine.low %v6024_v21, %v6027_v44 }
  0x53   : > { %5120 = vmatmul.mubr.msk.bf16.gmra.mxu1 %vm621_vm3, %v5779_v60  ;;  %5413 = vmatprep.subr.msk.bf16.mxu0 %vm652_vm0, %v5997_v23  ;;  %v1567_v34 = vsel %vm5921_vm7, %v1565_v19, %v1566_v40  ;;  %v1039_v40 = vrot.slane %v5868_v55, 5  ;;  %v6091_v55 = vld [vmem:[%s5627_s8 + $0x84] sm:$0xf] }
  0x54   : > { %5123 = vmatprep.mubr.msk.bf16.mxu1 %vm621_vm3, %v5811_v37  ;;  %v1564_v45 = vsel %vm5921_vm7, %v4648_v48, %v1563_v27  ;;  %v1026_v48 = vsel %vm5921_vm7, %v1024_v18, %v1025_v7  ;;  %v1036_v27 = vrot.slane %v5859_v6, 5  ;;  %v4601_v7 = vrot.slane %v5848_v24, 9  ;;  %v6094_v6 = vld [vmem:[%s5627_s8 + $0x8c] sm:$0x1] }
  0x55   : > { %v6061_v11 = vcombine.low %v1564_v45, %v1567_v34  ;;  %v6065_v17 = vcombine.low %v1023_v38, %v1026_v48  ;;  %v6074_v45 = vld [vmem:[%s5627_s8 + $0x88] sm:$0xf]  ;;  %v1030_v38 = vsel %vm5921_vm7, %v4600_v31, %v1029_v58  ;;  %v1033_v19 = vsel %vm5921_vm7, %v1031_v16, %v1032_v4 }
  0x56   : > { %v1038_v18 = vrot.slane %v1036_v27, 4  ;;  %v2029_v26 = vrot.slane %v6074_v45, 5  ;;  %v1037_v48 = vsel %vm5921_vm7, %v4601_v7, %v1036_v27  ;;  %v4685_v31 = vrot.slane %v6091_v55, 9 }
  0x57   : > { %v2032_v16 = vrot.slane %v6094_v6, 5  ;;  %v6100_v4 = vcombine.low %v1030_v38, %v1033_v19  ;;  %v4602_v24 = vrot.slane %v5882_v39, 9  ;;  %v1046_v27 = vrot.slane %v5898_v61, 5 }
  0x58   : > { %v1040_v34 = vsel %vm5921_vm7, %v1038_v18, %v1039_v40  ;;  %v2031_v58 = vrot.slane %v2029_v26, 4  ;;  %v1045_v18 = vrot.slane %v1043_v43, 4  ;;  %v6108_v40 = vsel %vm5921_vm7, %v4685_v31, %v2029_v26 }
  0x59   : > { %5098 = vmatmul.mubr.msk.bf16.gmra.mxu0 %vm621_vm3, %v6019_v9  ;;  %v6104_v7 = vcombine.low %v1037_v48, %v1040_v34  ;;  %v1044_v19 = vsel %vm5921_vm7, %v4602_v24, %v1043_v43  ;;  %v1891_v34 = vsel %vm652_vm0, %v5971_v35, 0  ;;  %v1723_v24 = vsel %vm652_vm0, %v5997_v23, 0  ;;  %v7741_v35 = vld [vmem:[#allocation17_spill] sm:$0xff] }
  0x5a   : > { %5101 = vmatprep.mubr.msk.bf16.mxu0 %vm621_vm3, %v6029_v53  ;;  %v6112_v57 = vsel %vm5921_vm7, %v2031_v58, %v2032_v16  ;;  %v1047_v26 = vsel %vm5921_vm7, %v1045_v18, %v1046_v27  ;;  %v1393_v23 = vshrl.u32 %v6024_v21, 16  ;;  %v1396_v43 = vshll.u32 %v6024_v21, 16  ;;  %v7743_v58 = vld [vmem:[#allocation25_spill] sm:$0xff] }
  0x5b   : > { %5124 = vmatmul.mubr.msk.bf16.gmra.mxu1 %vm621_vm3, %v5839_v5  ;;  %v4687_v38 = vcombine.low %v6108_v40, %v6112_v57  ;;  %v6132_v48 = vcombine.low %v1044_v19, %v1047_v26  ;;  %v1406_v31 = vshrl.u32 %v6027_v44, 16  ;;  %v1402_v16 = vshll.u32 %v6027_v44, 16 }
  0x5c   : > { %5127 = vmatprep.mubr.msk.bf16.mxu1 %vm621_vm3, %v5865_v54  ;;  %v1395_v27 = vrot.slane %v1393_v23, 4  ;;  %v1398_v18 = vrot.slane %v1396_v43, 5  ;;  %v1412_v44 = vshll.u32 %v6034_v8, 16 }
  0x5d   : > { %v1404_v19 = vrot.slane %v1402_v16, 5  ;;  %v1408_v26 = vrot.slane %v1406_v31, 4 }
  0x5e   : > { %v1399_v21 = vor.u32 %v1398_v18, %v1395_v27  ;;  %v1414_v16 = vrot.slane %v1412_v44, 5 }
  0x60   : > { %v1400_v23 = vrot.slane %v1399_v21, 4 }
  0x61   : > { %5102 = vmatmul.mubr.msk.bf16.gmra.mxu0 %vm621_vm3, %v6063_v20 }
  0x62   : > { %5105 = vmatprep.mubr.msk.bf16.mxu0 %vm621_vm3, %v6065_v17  ;;  %v1405_v31 = vsel %vm5674_vm4, %v1400_v23, %v1404_v19 }
  0x63   : > { %5128 = vmatmul.mubr.msk.bf16.gmra.mxu1 %vm621_vm3, %v5891_v22 }
  0x64   : > { %5131 = vmatprep.mubr.msk.bf16.mxu1 %vm621_vm3, %v5917_v3 }
  0x69   : > { %5106 = vmatmul.mubr.msk.bf16.gmra.mxu0 %vm621_vm3, %v6100_v4 }
  0x6a   : > { %5109 = vmatprep.mubr.msk.bf16.mxu0 %vm621_vm3, %v6104_v7 }
  0x6b   : > { %5132 = vmatmul.mubr.msk.bf16.gmra.mxu1 %vm621_vm3, %v6116_v10 }
  0x6c   : > { %5159 = vmatprep.mubr.msk.bf16.mxu1 %vm621_vm3, %v5982_v51  ;;  %v4686_v51 = vld [vmem:[%s7659_s1 + $0x10] sm:$0x3] }
  0x6d   : > { %v2043_v18 = vsel %vm652_vm0, %v4686_v51, 0 }
  0x71   : > { %5110 = vmatmul.mubr.msk.bf16.gmra.mxu0 %vm621_vm3, %v6132_v48 }
  0x72   : > { %5137 = vmatprep.mubr.msk.bf16.mxu0 %vm621_vm3, %v5730_v13  ;;  %v7742_v13 = vld [vmem:[#allocation21_spill] sm:$0xff] }
  0x73   : > { %5160 = vmatmul.mubr.msk.bf16.vlgmr.msra.gmra.mxu1 %vm621_vm3, %v5986_v14 }
  0x74   : > { %5163 = vmatprep.mubr.msk.bf16.mxu1 %vm621_vm3, %v6019_v9  ;;  %5202 = vmatpush3.bf16.msra.mxu1 %v1891_v34  ;;  %v7744_v34 = vld [vmem:[#allocation29_spill] sm:$0xff] }
  0x79   : > { %5138 = vmatmul.mubr.msk.bf16.vlgmr.msra.gmra.mxu0 %vm621_vm3, %v5772_v50 }
  0x7a   : > { %5180 = vmatpush3.bf16.msra.mxu0 %v1723_v24  ;;  %5141 = vmatprep.mubr.msk.bf16.mxu0 %vm621_vm3, %v7741_v35  ;;  %v1409_v24 = vor.u32 %v1408_v26, %v1404_v19 }
  0x7b   : > { %5164 = vmatmul.mubr.msk.bf16.gmra.mxu1 %vm621_vm3, %v6029_v53  ;;  %5415 = vmatprep.subr.msk.bf16.mxu0 %vm652_vm0, %v4686_v51  ;;  %v1868_v51 = vshll.u32 %v6074_v45, 16 }
  0x7c   : > { %5167 = vmatprep.mubr.msk.bf16.mxu1 %vm621_vm3, %v6063_v20  ;;  %v1410_v43 = vrot.slane %v1409_v24, 4 }
  0x7d   : > { %v1870_v19 = vrot.slane %v1868_v51, 5 }
  0x7e   : > { %v1415_v8 = vsel %vm5674_vm4, %v1410_v43, %v1414_v16 }
  0x7f   : > { %v4637_v27 = vcombine.low %v1405_v31, %v1415_v8 }
  0x81   : > { %5142 = vmatmul.mubr.msk.bf16.gmra.mxu0 %vm621_vm3, %v7742_v13 }
  0x82   : > { %5145 = vmatprep.mubr.msk.bf16.mxu0 %vm621_vm3, %v7743_v58 }
  0x83   : > { %5168 = vmatmul.mubr.msk.bf16.gmra.mxu1 %vm621_vm3, %v6065_v17 }
  0x84   : > { %5171 = vmatprep.mubr.msk.bf16.mxu1 %vm621_vm3, %v6100_v4 }
  0x89   : > { %5146 = vmatmul.mubr.msk.bf16.gmra.mxu0 %vm621_vm3, %v7744_v34 }
  0x8a   : > { %5149 = vmatprep.mubr.msk.bf16.mxu0 %vm621_vm3, %v5908_v36 }
  0x8b   : > { %5172 = vmatmul.mubr.msk.bf16.gmra.mxu1 %vm621_vm3, %v6104_v7 }
  0x8c   : > { %5175 = vmatprep.mubr.msk.bf16.mxu1 %vm621_vm3, %v6132_v48 }
  0x91   : > { %5150 = vmatmul.mubr.msk.bf16.gmra.mxu0 %vm621_vm3, %v5929_v30 }
  0x92   : > { %5153 = vmatprep.mubr.msk.bf16.mxu0 %vm621_vm3, %v5953_v41 }
  0x93   : > { %5176 = vmatmul.mubr.msk.bf16.gmra.mxu1 %vm621_vm3, %v6061_v11 }
  0x94   : > { %5203 = vmatprep.mubr.msk.bf16.mxu1 %vm621_vm3, %v5772_v50  ;;  %v1862_v50 = vshll.u32 %v6091_v55, 16 }
  0x99   : > { %5154 = vmatmul.mubr.msk.bf16.gmra.mxu0 %vm621_vm3, %v4637_v27 }
  0x9a   : > { %5181 = vmatprep.mubr.msk.bf16.mxu0 %vm621_vm3, %v5717_v1  ;;  %v1859_v1 = vshrl.u32 %v6091_v55, 16 }
  0x9b   : > { %5204 = vmatmul.mubr.msk.bf16.vlgmr.msra.gmra.mxu1 %vm621_vm3, %v7741_v35  ;;  %v1872_v35 = vshrl.u32 %v6074_v45, 16 }
  0x9c   : > { %5207 = vmatprep.mubr.msk.bf16.mxu1 %vm621_vm3, %v7742_v13  ;;  %v1861_v13 = vrot.slane %v1859_v1, 4 }
  0x9d   : > { %v1874_v26 = vrot.slane %v1872_v35, 4 }
  0xa1   : > { %5182 = vmatmul.mubr.msk.bf16.vlgmr.msra.gmra.mxu0 %vm621_vm3, %v5750_v28  ;;  %v1864_v28 = vrot.slane %v1862_v50, 5 }
  0xa2   : > { %5224 = vmatpush3.bf16.msra.mxu0 %v2043_v18  ;;  %5185 = vmatprep.mubr.msk.bf16.mxu0 %vm621_vm3, %v5779_v60 }
  0xa3   : > { %5208 = vmatmul.mubr.msk.bf16.gmra.mxu1 %vm621_vm3, %v7743_v58  ;;  %v1865_v60 = vor.u32 %v1864_v28, %v1861_v13  ;;  %v1875_v58 = vor.u32 %v1874_v26, %v1870_v19 }
  0xa4   : > { %5211 = vmatprep.mubr.msk.bf16.mxu1 %vm621_vm3, %v7744_v34  ;;  %v1878_v34 = vshll.u32 %v6094_v6, 16 }
  0xa5   : > { %v1866_v21 = vrot.slane %v1865_v60, 4  ;;  %v1876_v24 = vrot.slane %v1875_v58, 4 }
  0xa6   : > { %v1880_v44 = vrot.slane %v1878_v34, 5 }
  0xa9   : > { %5186 = vmatmul.mubr.msk.bf16.gmra.mxu0 %vm621_vm3, %v5811_v37  ;;  %v1871_v37 = vsel %vm5674_vm4, %v1866_v21, %v1870_v19 }
  0xaa   : > { %5189 = vmatprep.mubr.msk.bf16.mxu0 %vm621_vm3, %v5839_v5  ;;  %v1881_v5 = vsel %vm5674_vm4, %v1876_v24, %v1880_v44 }
  0xab   : > { %5212 = vmatmul.mubr.msk.bf16.gmra.mxu1 %vm621_vm3, %v5908_v36  ;;  %v4674_v6 = vcombine.low %v1871_v37, %v1881_v5 }
  0xac   : > { %5215 = vmatprep.mubr.msk.bf16.mxu1 %vm621_vm3, %v5929_v30 }
  0xb1   : > { %5190 = vmatmul.mubr.msk.bf16.gmra.mxu0 %vm621_vm3, %v5865_v54  ;;  %v4662_v54 = vcombine.low %v6091_v55, %v6074_v45 }
  0xb2   : > { %5193 = vmatprep.mubr.msk.bf16.mxu0 %vm621_vm3, %v5891_v22 }
  0xb3   : > { %5216 = vmatmul.mubr.msk.bf16.gmra.mxu1 %vm621_vm3, %v5953_v41 }
  0xb4   : > { %5219 = vmatprep.mubr.msk.bf16.mxu1 %vm621_vm3, %v4637_v27 }
  0xb9   : > { %5194 = vmatmul.mubr.msk.bf16.gmra.mxu0 %vm621_vm3, %v5917_v3 }
  0xba   : > { %5197 = vmatprep.mubr.msk.bf16.mxu0 %vm621_vm3, %v6116_v10 }
  0xbb   : > { %5220 = vmatmul.mubr.msk.bf16.gmra.mxu1 %vm621_vm3, %v4674_v6 }
  0xc1   : > { %5198 = vmatmul.mubr.msk.bf16.gmra.mxu0 %vm621_vm3, %v4662_v54 }
  0xc2   : > { %5225 = vmatprep.mubr.msk.bf16.mxu0 %vm621_vm3, %v5986_v14 }
  0xc9   : > { %5226 = vmatmul.mubr.msk.bf16.vlgmr.msra.gmra.mxu0 %vm621_vm3, %v6019_v9 }
  0xca   : > { %5229 = vmatprep.mubr.msk.bf16.mxu0 %vm621_vm3, %v6029_v53 }
  0xd1   : > { %5230 = vmatmul.mubr.msk.bf16.gmra.mxu0 %vm621_vm3, %v6063_v20 }
  0xd2   : > { %5233 = vmatprep.mubr.msk.bf16.mxu0 %vm621_vm3, %v6065_v17 }
  0xd9   : > { %5234 = vmatmul.mubr.msk.bf16.gmra.mxu0 %vm621_vm3, %v6100_v4 }
  0xda   : > { %5237 = vmatprep.mubr.msk.bf16.mxu0 %vm621_vm3, %v6104_v7 }
  0xdd   : > { %v5073_v10 = vpop.f32.mrf.mxu1 }
  0xdf   : > { %v886_v55 = vpop.f32.mrf.mxu1 }
  0xe1   : > { %5238 = vmatmul.mubr.msk.bf16.gmra.mxu0 %vm621_vm3, %v6132_v48  ;;  %v5074_v22 = vpop.f32.mrf.mxu1 }
  0xe2   : > { %5241 = vmatprep.mubr.msk.bf16.mxu0 %vm621_vm3, %v6061_v11 }
  0xe3   : > { %v889_v3 = vpop.f32.mrf.mxu1 }
  0xe5   : > { %v5051_v36 = vpop.f32.mrf.mxu0 }
  0xe6   : > { %v895_v30 = vadd.f32 %v5073_v10, %v5051_v36 }
  0xe7   : > { %v690_v41 = vpop.f32.mrf.mxu0  ;;  %v5077_v14 = vpop.f32.mrf.mxu1 }
  0xe8   : > { %v887_v9 = vadd.f32 %v886_v55, %v690_v41 }
  0xe9   : > { %5242 = vmatmul.mubr.msk.bf16.gmra.mxu0 %vm621_vm3, %v4687_v38  ;;  %v5052_v53 = vpop.f32.mrf.mxu0  ;;  %v902_v20 = vpop.f32.mrf.mxu1 }
  0xea   : > { %v898_v17 = vadd.f32 %v5074_v22, %v5052_v53 }
  0xeb   : > { %v693_v45 = vpop.f32.mrf.mxu0  ;;  %v5078_v4 = vpop.f32.mrf.mxu1 }
  0xec   : > { %v890_v7 = vadd.f32 %v889_v3, %v693_v45 }
  0xed   : > { %v905_v48 = vpop.f32.mrf.mxu1 }
  0xef   : > { %v5055_v11 = vpop.f32.mrf.mxu0 }
  0xf0   : > { %v6261_v23 = vadd.f32 %v5077_v14, %v5055_v11  ;;  %v5081_v16 = vpop.f32.mrf.mxu1 }
  0xf1   : > { %v706_v43 = vpop.f32.mrf.mxu0 }
  0xf2   : > { %v6263_v31 = vadd.f32 %v902_v20, %v706_v43  ;;  %v918_v27 = vpop.f32.mrf.mxu1 }
  0xf3   : > { %v5056_v8 = vpop.f32.mrf.mxu0 }
  0xf4   : > { %v6265_v18 = vadd.f32 %v5078_v4, %v5056_v8  ;;  %v5082_v40 = vpop.f32.mrf.mxu1 }
  0xf5   : > { %v709_v57 = vpop.f32.mrf.mxu0 }
  0xf6   : > { %v6267_v38 = vadd.f32 %v905_v48, %v709_v57  ;;  %v921_v50 = vpop.f32.mrf.mxu1 }
  0xf7   : > { %v5059_v1 = vpop.f32.mrf.mxu0 }
  0xf8   : > { %v6269_v35 = vadd.f32 %v5081_v16, %v5059_v1  ;;  %v5085_v13 = vpop.f32.mrf.mxu1 }
  0xf9   : > { %v722_v51 = vpop.f32.mrf.mxu0 }
  0xfa   : > { %v6271_v28 = vadd.f32 %v918_v27, %v722_v51  ;;  %v934_v26 = vpop.f32.mrf.mxu1 }
  0xfb   : > { %v5060_v19 = vpop.f32.mrf.mxu0 }
  0xfc   : > { %v6273_v60 = vadd.f32 %v5082_v40, %v5060_v19  ;;  %v5086_v34 = vpop.f32.mrf.mxu1 }
  0xfd   : > { %v725_v58 = vpop.f32.mrf.mxu0 }
  0xfe   : > { %v6275_v21 = vadd.f32 %v921_v50, %v725_v58  ;;  %v937_v24 = vpop.f32.mrf.mxu1 }
 0x100   : > { %v5063_v44 = vpop.f32.mrf.mxu0 }
 0x101   : > { %v6277_v37 = vadd.f32 %v5085_v13, %v5063_v44 }
 0x102   : > { %v738_v5 = vpop.f32.mrf.mxu0  ;;  %v5089_v6 = vpop.f32.mrf.mxu1 }
 0x103   : > { %v6279_v54 = vadd.f32 %v934_v26, %v738_v5 }
 0x104   : > { %v5064_v10 = vpop.f32.mrf.mxu0  ;;  %v950_v55 = vpop.f32.mrf.mxu1 }
 0x105   : > { %v6281_v22 = vadd.f32 %v5086_v34, %v5064_v10 }
 0x106   : > { %v741_v36 = vpop.f32.mrf.mxu0  ;;  %v5090_v3 = vpop.f32.mrf.mxu1 }
 0x107   : > { %v6283_v41 = vadd.f32 %v937_v24, %v741_v36 }
 0x108   : > { %v953_v53 = vpop.f32.mrf.mxu1 }
 0x109   : > { %v5067_v14 = vpop.f32.mrf.mxu0 }
 0x10a   : > { %v6285_v20 = vadd.f32 %v5089_v6, %v5067_v14  ;;  %v5117_v4 = vpop.f32.mrf.mxu1 }
 0x10b   : > { %v754_v45 = vpop.f32.mrf.mxu0 }
 0x10c   : > { %v6287_v48 = vadd.f32 %v950_v55, %v754_v45  ;;  %v1293_v43 = vpop.f32.mrf.mxu1 }
 0x10d   : > { %v5068_v11 = vpop.f32.mrf.mxu0 }
 0x10e   : > { %v6289_v16 = vadd.f32 %v5090_v3, %v5068_v11  ;;  %v5118_v27 = vpop.f32.mrf.mxu1 }
 0x10f   : > { %v757_v8 = vpop.f32.mrf.mxu0 }
 0x110   : > { %v6291_v57 = vadd.f32 %v953_v53, %v757_v8  ;;  %v1296_v1 = vpop.f32.mrf.mxu1 }
 0x111   : > { %v5095_v40 = vpop.f32.mrf.mxu0 }
 0x112   : > { %v1228_v50 = vadd.f32 %v5095_v40, %v895_v30 }
 0x113   : > { %v1147_v51 = vpop.f32.mrf.mxu0  ;;  %v5121_v13 = vpop.f32.mrf.mxu1 }
 0x114   : > { %v1226_v19 = vadd.f32 %v1147_v51, %v887_v9  ;;  %v6293_v26 = vadd.f32 %v5117_v4, %v1228_v50 }
 0x115   : > { %v5096_v58 = vpop.f32.mrf.mxu0  ;;  %v1309_v34 = vpop.f32.mrf.mxu1 }
 0x116   : > { %v1229_v24 = vadd.f32 %v5096_v58, %v898_v17  ;;  %v6295_v44 = vadd.f32 %v1293_v43, %v1226_v19 }
 0x117   : > { %v1150_v5 = vpop.f32.mrf.mxu0  ;;  %v5122_v6 = vpop.f32.mrf.mxu1 }
 0x118   : > { %v1227_v10 = vadd.f32 %v1150_v5, %v890_v7  ;;  %v6297_v55 = vadd.f32 %v5118_v27, %v1229_v24 }
 0x119   : > { %v5099_v36 = vpop.f32.mrf.mxu0  ;;  %v1312_v3 = vpop.f32.mrf.mxu1 }
 0x11a   : > { %v1232_v14 = vadd.f32 %v5099_v36, %v6261_v23  ;;  %v6300_v30 = vadd.f32 %v1296_v1, %v1227_v10 }
 0x11b   : > { %v1163_v53 = vpop.f32.mrf.mxu0  ;;  %v5125_v9 = vpop.f32.mrf.mxu1 }
 0x11c   : > { %v1230_v45 = vadd.f32 %v1163_v53, %v6263_v31  ;;  %v6303_v4 = vadd.f32 %v5121_v13, %v1232_v14 }
 0x11d   : > { %v5100_v17 = vpop.f32.mrf.mxu0  ;;  %v1325_v11 = vpop.f32.mrf.mxu1 }
 0x11e   : > { %v1233_v43 = vadd.f32 %v5100_v17, %v6265_v18  ;;  %v6306_v8 = vadd.f32 %v1309_v34, %v1230_v45 }
 0x11f   : > { %v1166_v7 = vpop.f32.mrf.mxu0  ;;  %v5126_v27 = vpop.f32.mrf.mxu1 }
 0x120   : > { %v1231_v40 = vadd.f32 %v1166_v7, %v6267_v38  ;;  %v6309_v50 = vadd.f32 %v5122_v6, %v1233_v43 }
 0x121   : > { %v5103_v23 = vpop.f32.mrf.mxu0  ;;  %v1328_v1 = vpop.f32.mrf.mxu1 }
 0x122   : > { %v1236_v51 = vadd.f32 %v5103_v23, %v6269_v35  ;;  %v6312_v19 = vadd.f32 %v1312_v3, %v1231_v40 }
 0x123   : > { %v1179_v31 = vpop.f32.mrf.mxu0  ;;  %v5129_v13 = vpop.f32.mrf.mxu1 }
 0x124   : > { %v1234_v58 = vadd.f32 %v1179_v31, %v6271_v28  ;;  %v6315_v24 = vadd.f32 %v5125_v9, %v1236_v51 }
 0x125   : > { %v5104_v18 = vpop.f32.mrf.mxu0  ;;  %v1341_v34 = vpop.f32.mrf.mxu1 }
 0x126   : > { %v1237_v5 = vadd.f32 %v5104_v18, %v6273_v60  ;;  %v6318_v10 = vadd.f32 %v1325_v11, %v1234_v58 }
 0x127   : > { %v1182_v38 = vpop.f32.mrf.mxu0  ;;  %v5130_v6 = vpop.f32.mrf.mxu1 }
 0x128   : > { %v1235_v36 = vadd.f32 %v1182_v38, %v6275_v21  ;;  %v6321_v14 = vadd.f32 %v5126_v27, %v1237_v5 }
 0x129   : > { %v5107_v35 = vpop.f32.mrf.mxu0  ;;  %v1344_v3 = vpop.f32.mrf.mxu1 }
 0x12a   : > { %v1240_v53 = vadd.f32 %v5107_v35, %v6277_v37  ;;  %v6324_v45 = vadd.f32 %v1328_v1, %v1235_v36 }
 0x12b   : > { %v1195_v28 = vpop.f32.mrf.mxu0  ;;  %v5133_v9 = vpop.f32.mrf.mxu1 }
 0x12c   : > { %v1238_v17 = vadd.f32 %v1195_v28, %v6279_v54  ;;  %v6327_v43 = vadd.f32 %v5129_v13, %v1240_v53 }
 0x12d   : > { %v5108_v60 = vpop.f32.mrf.mxu0  ;;  %v1357_v11 = vpop.f32.mrf.mxu1 }
 0x12e   : > { %v1241_v7 = vadd.f32 %v5108_v60, %v6281_v22  ;;  %v6330_v40 = vadd.f32 %v1341_v34, %v1238_v17 }
 0x12f   : > { %v1198_v21 = vpop.f32.mrf.mxu0  ;;  %v5134_v27 = vpop.f32.mrf.mxu1 }
 0x130   : > { %v1239_v23 = vadd.f32 %v1198_v21, %v6283_v41  ;;  %v1387_v51 = vadd.f32 %v5130_v6, %v1241_v7 }
 0x131   : > { %v5111_v37 = vpop.f32.mrf.mxu0  ;;  %v1360_v1 = vpop.f32.mrf.mxu1 }
 0x132   : > { %v1244_v31 = vadd.f32 %v5111_v37, %v6285_v20  ;;  %v1385_v58 = vadd.f32 %v1344_v3, %v1239_v23 }
 0x133   : > { %v1211_v18 = vpop.f32.mrf.mxu0  ;;  %v6334_v54 = vpop.f32.mrf.mxu1 }
 0x134   : > { %v1242_v13 = vadd.f32 %v1211_v18, %v6287_v48  ;;  %v1390_v5 = vadd.f32 %v5133_v9, %v1244_v31 }
 0x135   : > { %v5112_v38 = vpop.f32.mrf.mxu0  ;;  %v6337_v22 = vpop.f32.mrf.mxu1 }
 0x136   : > { %v1245_v34 = vadd.f32 %v5112_v38, %v6289_v16  ;;  %v1388_v36 = vadd.f32 %v1357_v11, %v1242_v13 }
 0x137   : > { %v1214_v35 = vpop.f32.mrf.mxu0  ;;  %v6340_v41 = vpop.f32.mrf.mxu1 }
 0x138   : > { %v1243_v6 = vadd.f32 %v1214_v35, %v6291_v57  ;;  %v1391_v53 = vadd.f32 %v5134_v27, %v1245_v34 }
 0x139   : > { %v5139_v20 = vpop.f32.mrf.mxu0  ;;  %v6343_v3 = vpop.f32.mrf.mxu1 }
 0x13a   : > { %v1389_v28 = vadd.f32 %v1360_v1, %v1243_v6  ;;  %v6346_v17 = vadd.f32 %v5139_v20, %v6293_v26 }
 0x13b   : > { %v1461_v48 = vpop.f32.mrf.mxu0  ;;  %v6348_v9 = vpop.f32.mrf.mxu1 }
 0x13c   : > { %v6351_v60 = vadd.f32 %v1461_v48, %v6295_v44 }
 0x13d   : > { %v5140_v16 = vpop.f32.mrf.mxu0  ;;  %v6353_v11 = vpop.f32.mrf.mxu1 }
 0x13e   : > { %v6356_v7 = vadd.f32 %v5140_v16, %v6297_v55 }
 0x13f   : > { %v1464_v57 = vpop.f32.mrf.mxu0  ;;  %v6358_v21 = vpop.f32.mrf.mxu1 }
 0x140   : > { %v6361_v27 = vadd.f32 %v1464_v57, %v6300_v30 }
 0x141   : > { %v5143_v26 = vpop.f32.mrf.mxu0  ;;  %v6363_v23 = vpop.f32.mrf.mxu1 }
 0x142   : > { %v6366_v37 = vadd.f32 %v5143_v26, %v6303_v4 }
 0x143   : > { %v1477_v44 = vpop.f32.mrf.mxu0  ;;  %v6368_v1 = vpop.f32.mrf.mxu1 }
 0x144   : > { %v6371_v31 = vadd.f32 %v1477_v44, %v6306_v8 }
 0x145   : > { %v5144_v55 = vpop.f32.mrf.mxu0  ;;  %v6373_v18 = vpop.f32.mrf.mxu1 }
 0x146   : > { %v6376_v13 = vadd.f32 %v5144_v55, %v6309_v50 }
 0x147   : > { %v1480_v30 = vpop.f32.mrf.mxu0  ;;  %v6378_v38 = vpop.f32.mrf.mxu1 }
 0x148   : > { %v6381_v34 = vadd.f32 %v1480_v30, %v6312_v19 }
 0x149   : > { %v5147_v4 = vpop.f32.mrf.mxu0  ;;  %v6383_v35 = vpop.f32.mrf.mxu1 }
 0x14a   : > { %v6386_v6 = vadd.f32 %v5147_v4, %v6315_v24 }
 0x14b   : > { %v1493_v8 = vpop.f32.mrf.mxu0  ;;  %v6388_v20 = vpop.f32.mrf.mxu1 }
 0x14c   : > { %v6391_v48 = vadd.f32 %v1493_v8, %v6318_v10 }
 0x14d   : > { %v5148_v50 = vpop.f32.mrf.mxu0  ;;  %v6393_v16 = vpop.f32.mrf.mxu1 }
 0x14e   : > { %v6396_v57 = vadd.f32 %v5148_v50, %v6321_v14 }
 0x14f   : > { %v1496_v19 = vpop.f32.mrf.mxu0  ;;  %v6398_v26 = vpop.f32.mrf.mxu1 }
 0x150   : > { %v6401_v44 = vadd.f32 %v1496_v19, %v6324_v45 }
 0x151   : > { %v5151_v24 = vpop.f32.mrf.mxu0  ;;  %v6403_v55 = vpop.f32.mrf.mxu1 }
 0x152   : > { %v6406_v30 = vadd.f32 %v5151_v24, %v6327_v43 }
 0x153   : > { %v1509_v10 = vpop.f32.mrf.mxu0  ;;  %v6408_v4 = vpop.f32.mrf.mxu1 }
 0x154   : > { %v6411_v8 = vadd.f32 %v1509_v10, %v6330_v40 }
 0x155   : > { %v5152_v14 = vpop.f32.mrf.mxu0  ;;  %v6413_v50 = vpop.f32.mrf.mxu1 }
 0x156   : > { %v1555_v61 = vadd.f32 %v5152_v14, %v1387_v51 }
 0x157   : > { %v1512_v39 = vpop.f32.mrf.mxu0  ;;  %v6415_v15 = vpop.f32.mrf.mxu1 }
 0x158   : > { %v6417_v45 = vadd.f32 %v1512_v39, %v1385_v58 }
 0x159   : > { %v5155_v19 = vpop.f32.mrf.mxu0  ;;  %v6419_v63 = vpop.f32.mrf.mxu1 }
 0x15a   : > { %v1558_v43 = vadd.f32 %v5155_v19, %v1390_v5 }
 0x15b   : > { %v1525_v24 = vpop.f32.mrf.mxu0  ;;  %v6421_v47 = vpop.f32.mrf.mxu1 }
 0x15c   : > { %v6423_v29 = vadd.f32 %v1525_v24, %v1388_v36 }
 0x15d   : > { %v5156_v40 = vpop.f32.mrf.mxu0  ;;  %v6425_v10 = vpop.f32.mrf.mxu1 }
 0x15e   : > { %v6427_v0 = vadd.f32 %v5156_v40, %v1391_v53 }
 0x15f   : > { %v1528_v51 = vpop.f32.mrf.mxu0  ;;  %v6429_v14 = vpop.f32.mrf.mxu1 }
 0x160   : > { %7745 = vst [vmem:[#allocation17_spill] sm:$0xff] %v6429_v14  ;;  %v6431_v25 = vadd.f32 %v1528_v51, %v1389_v28 }
 0x161   : > { %v5183_v39 = vpop.f32.mrf.mxu0  ;;  %v6433_v58 = vpop.f32.mrf.mxu1 }
 0x162   : > { %7746 = vst [vmem:[#allocation21_spill] sm:$0xff] %v6433_v58 }
 0x163   : > { %v1759_v12 = vpop.f32.mrf.mxu0  ;;  %v6435_v5 = vpop.f32.mrf.mxu1 }
 0x164   : > { %7747 = vst [vmem:[#allocation25_spill] sm:$0xff] %v6435_v5 }
 0x165   : > { %v5184_v19 = vpop.f32.mrf.mxu0  ;;  %v6437_v56 = vpop.f32.mrf.mxu1 }
 0x166   : > { %7748 = vst [vmem:[#allocation29_spill] sm:$0xff] %v6437_v56 }
 0x167   : > { %v1762_v36 = vpop.f32.mrf.mxu0  ;;  %v6439_v24 = vpop.f32.mrf.mxu1 }
 0x168   : > { %7749 = vst [vmem:[#allocation33_spill] sm:$0xff] %v6439_v24 }
 0x169   : > { %v5187_v49 = vpop.f32.mrf.mxu0  ;;  %v6441_v53 = vpop.f32.mrf.mxu1 }
 0x16a   : > { %7750 = vst [vmem:[#allocation34_spill] sm:$0xff] %v6441_v53 }
 0x16b   : > { %v1775_v40 = vpop.f32.mrf.mxu0  ;;  %v6443_v46 = vpop.f32.mrf.mxu1 }
 0x16c   : > { %7751 = vst [vmem:[#allocation35_spill] sm:$0xff] %v6443_v46 }
 0x16d   : > { %v5188_v28 = vpop.f32.mrf.mxu0  ;;  %v6445_v51 = vpop.f32.mrf.mxu1 }
 0x16e   : > { %7752 = vst [vmem:[#allocation36_spill] sm:$0xff] %v6445_v51 }
 0x16f   : > { %v1778_v2 = vpop.f32.mrf.mxu0  ;;  %v6447_v42 = vpop.f32.mrf.mxu1 }
 0x170   : > { %7753 = vst [vmem:[#allocation37_spill] sm:$0xff] %v6447_v42  ;;  %v1692_v42 = vadd.f32 %v6337_v22, %v6351_v60  ;;  %v1697_v22 = vadd.f32 %v6363_v23, %v6381_v34 }
 0x171   : > { %v5191_v32 = vpop.f32.mrf.mxu0  ;;  %v6449_v62 = vpop.f32.mrf.mxu1 }
 0x172   : > { %7754 = vst [vmem:[#allocation38_spill] sm:$0xff] %v6449_v62  ;;  %v1694_v62 = vadd.f32 %v6334_v54, %v6346_v17  ;;  %v1699_v54 = vadd.f32 %v6358_v21, %v6376_v13  ;;  %v1702_v17 = vadd.f32 %v6368_v1, %v6386_v6  ;;  %v1704_v21 = vadd.f32 %v6393_v16, %v6411_v8  ;;  %v7765_v8 = vld [vmem:[#allocation34_spill] sm:$0xff] }
 0x173   : > { %v1791_v52 = vpop.f32.mrf.mxu0  ;;  %v6451_v33 = vpop.f32.mrf.mxu1  ;;  %v1838_v23 = vadd.f32 %v1759_v12, %v1692_v42  ;;  %v1710_v13 = vadd.f32 %v6408_v4, %v1558_v43 }
 0x174   : > { %7755 = vst [vmem:[#allocation39_spill] sm:$0xff] %v6451_v33  ;;  %v1845_v6 = vadd.f32 %v5188_v28, %v1699_v54 }
 0x175   : > { %v5192_v59 = vpop.f32.mrf.mxu0  ;;  %v6455_v53 = vpop.f32.mrf.mxu1 }
 0x176   : > { %7756 = vst [vmem:[#allocation40_spill] sm:$0xff] %v6455_v53  ;;  %v1695_v53 = vadd.f32 %v6340_v41, %v6356_v7  ;;  %v1700_v41 = vadd.f32 %v6373_v18, %v6391_v48  ;;  %v1840_v7 = vadd.f32 %v5183_v39, %v1694_v62  ;;  %v1705_v18 = vadd.f32 %v6403_v55, %v6417_v45  ;;  %v7766_v45 = vld [vmem:[#allocation35_spill] sm:$0xff] }
 0x177   : > { %v1794_v24 = vpop.f32.mrf.mxu0  ;;  %v6461_v51 = vpop.f32.mrf.mxu1  ;;  %v1843_v62 = vadd.f32 %v1778_v2, %v1697_v22 }
 0x178   : > { %7758 = vst [vmem:[#allocation42_spill] sm:$0xff] %v6461_v51  ;;  %v1698_v51 = vadd.f32 %v6348_v9, %v6366_v37  ;;  %v1701_v9 = vadd.f32 %v6383_v35, %v6401_v44  ;;  %v1841_v37 = vadd.f32 %v5184_v19, %v1695_v53  ;;  %v2008_v42 = vadd.f32 %v6421_v47, %v1840_v7  ;;  %v7761_v47 = vld [vmem:[#allocation21_spill] sm:$0xff] }
 0x179   : > { %v6453_v56 = vpop.f32.mrf.mxu0  ;;  %v6471_v14 = vpop.f32.mrf.mxu1  ;;  %v1846_v12 = vadd.f32 %v1791_v52, %v1700_v41  ;;  %v7771_v7 = vld [vmem:[#allocation38_spill] sm:$0xff] }
 0x17a   : > { %v1844_v34 = vadd.f32 %v5187_v49, %v1698_v51  ;;  %v7760_v49 = vld [vmem:[#allocation17_spill] sm:$0xff] }
 0x17b   : > { %v6457_v5 = vpop.f32.mrf.mxu0  ;;  %v6498_v1 = vpop.f32.mrf.mxu1  ;;  %v2009_v44 = vadd.f32 %v7760_v49, %v1841_v37 }
 0x17c   : > { %v1850_v51 = vadd.f32 %v6457_v5, %v1704_v21 }
 0x17d   : > { %v6459_v46 = vpop.f32.mrf.mxu0  ;;  %v1991_v2 = vpop.f32.mrf.mxu1 }
 0x17e   : > { %7757 = vst [vmem:[#allocation41_spill] sm:$0xff] %v6459_v46  ;;  %v1693_v46 = vadd.f32 %v6343_v3, %v6361_v27  ;;  %v1703_v3 = vadd.f32 %v6378_v38, %v6396_v57  ;;  %v1707_v27 = vadd.f32 %v6398_v26, %v1555_v61  ;;  %v1708_v61 = vadd.f32 %v6413_v50, %v6423_v29  ;;  %v6515_v29 = vld [vmem:[%s7661_s3] ss:$0 sm:$0xff] }
 0x17f   : > { %v6463_v58 = vpop.f32.mrf.mxu0  ;;  %v1711_v57 = vadd.f32 %v6415_v15, %v6427_v0  ;;  %v1709_v26 = vadd.f32 %v6419_v63, %v6431_v25  ;;  %v7763_v15 = vld [vmem:[#allocation29_spill] sm:$0xff]  ;;  %v6524_v50 = vadd.f32 %v7765_v8, %v1843_v62 }
 0x180   : > { %7759 = vst [vmem:[#allocation43_spill] sm:$0xff] %v6463_v58  ;;  %v1696_v58 = vadd.f32 %v6353_v11, %v6371_v31  ;;  %v1706_v11 = vadd.f32 %v6388_v20, %v6406_v30  ;;  %v1839_v38 = vadd.f32 %v1762_v36, %v1693_v46  ;;  %v1848_v20 = vadd.f32 %v5191_v32, %v1702_v17  ;;  %v7764_v25 = vld [vmem:[#allocation33_spill] sm:$0xff] }
 0x181   : > { %v6469_v33 = vpop.f32.mrf.mxu0  ;;  %v1849_v16 = vadd.f32 %v5192_v59, %v1703_v3  ;;  %v2006_v46 = vadd.f32 %v6425_v10, %v1838_v23  ;;  %v7762_v59 = vld [vmem:[#allocation25_spill] sm:$0xff]  ;;  %v1847_v30 = vadd.f32 %v1794_v24, %v1701_v9  ;;  %v6521_v63 = vadd.f32 %v7764_v25, %v1845_v6  ;;  %v6532_v10 = vld [vmem:[%s7662_s4] ss:$0 sm:$0xff]  ;;  %v5222_v3 = vpop.f32.mrf.mxu1 }
 0x182   : > { %v1842_v35 = vadd.f32 %v1775_v40, %v1696_v58  ;;  %v2007_v52 = vadd.f32 %v7761_v47, %v1839_v38  ;;  %v2012_v55 = vadd.f32 %v7762_v59, %v1844_v34  ;;  %v6527_v43 = vadd.f32 %v7766_v45, %v1848_v20  ;;  %v7767_v58 = vld [vmem:[#allocation36_spill] sm:$0xff]  ;;  %v7768_v36 = vld [vmem:[#allocation37_spill] sm:$0xff]  ;;  %v7772_v20 = vld [vmem:[#allocation39_spill] sm:$0xff] }
 0x183   : > { %v1823_v60 = vpop.f32.mrf.mxu0  ;;  %v6535_v19 = vadd.f32 %v7767_v58, %v1846_v12  ;;  %v6538_v24 = vadd.f32 %v7768_v36, %v1849_v16  ;;  %v1852_v28 = vadd.f32 %v6453_v56, %v1706_v11  ;;  %v6546_v23 = vadd.f32 %v7771_v7, %v1847_v30  ;;  %v7773_v12 = vld [vmem:[#allocation40_spill] sm:$0xff] }
 0x184   : > { %v2010_v4 = vadd.f32 %v7763_v15, %v1842_v35  ;;  %v1856_v35 = vadd.f32 %v6469_v33, %v1710_v13  ;;  %v1854_v6 = vadd.f32 %v1823_v60, %v1708_v61  ;;  %v6557_v16 = vadd.f32 %v7773_v12, %v1850_v51  ;;  %v7774_v33 = vld [vmem:[#allocation42_spill] sm:$0xff]  ;;  %v1994_v13 = vpop.f32.mrf.mxu1 }
 0x185   : > { %v5200_v31 = vpop.f32.mrf.mxu0  ;;  %v7769_v54 = vld [vmem:[#allocation41_spill] sm:$0xff] }
 0x186   : > { %v1853_v22 = vadd.f32 %v7769_v54, %v1707_v27  ;;  %v1857_v56 = vadd.f32 %v5200_v31, %v1711_v57  ;;  %v6568_v49 = vadd.f32 %v6498_v1, %v1856_v35 }
 0x187   : > { %v1826_v48 = vpop.f32.mrf.mxu0  ;;  %v7770_v17 = vld [vmem:[#allocation43_spill] sm:$0xff] }
 0x188   : > { %v1851_v41 = vadd.f32 %v7770_v17, %v1705_v18  ;;  %v1855_v11 = vadd.f32 %v1826_v48, %v1709_v26  ;;  %v6560_v60 = vadd.f32 %v7774_v33, %v1853_v22 }
 0x189   : > { %v5227_v32 = vpop.f32.mrf.mxu0 }
 0x18a   : > { %v2160_v0 = vadd.f32 %v5227_v32, %v2008_v42  ;;  %v6554_v42 = vadd.f32 %v7772_v20, %v1852_v28  ;;  %v6563_v31 = vadd.f32 %v6471_v14, %v1851_v41  ;;  %v6572_v32 = vadd.f32 %v5222_v3, %v1857_v56 }
 0x18b   : > { %v2079_v39 = vpop.f32.mrf.mxu0  ;;  %v6574_v59 = vadd.f32 %v1994_v13, %v1855_v11 }
 0x18c   : > { %v2187_v53 = vmul.f32 %v6515_v29, %v2160_v0  ;;  %v2158_v40 = vadd.f32 %v2079_v39, %v2006_v46 }
 0x18d   : > { %v5228_v9 = vpop.f32.mrf.mxu0 }
 0x18e   : > { %v2214_v37 = vadd.f32 %v6532_v10, %v2187_v53  ;;  %v2185_v38 = vmul.f32 %v6515_v29, %v2158_v40  ;;  %v2161_v34 = vadd.f32 %v5228_v9, %v2009_v44  ;;  %v6570_v44 = vadd.f32 %v1991_v2, %v1854_v6  ;;  %v2528_v53 = vld [vmem:[#allocation2 + $0xc] sm:$0xf]  ;;  %v2518_v9 = vld [vmem:[#allocation2] sm:$0xf] }
 0x18f   : > { %v2082_v5 = vpop.f32.mrf.mxu0 }
 0x190   : > { %v2234_v21 = vmax.f32 %v2214_v37, 0.0  ;;  %v2212_v27 = vadd.f32 %v6532_v10, %v2185_v38  ;;  %v2188_v18 = vmul.f32 %v6515_v29, %v2161_v34  ;;  %v2159_v62 = vadd.f32 %v2082_v5, %v2007_v52 }
 0x191   : > { %v5231_v48 = vpop.f32.mrf.mxu0 }
 0x192   : > { %v4849_v61 = vpack.c.bf16 %v2234_v21, %v2234_v21  ;;  %v2232_v57 = vmax.f32 %v2212_v27, 0.0  ;;  %v2215_v26 = vadd.f32 %v6532_v10, %v2188_v18  ;;  %v2186_v46 = vmul.f32 %v6515_v29, %v2159_v62  ;;  %v2532_v27 = vld [vmem:[#allocation2 + $0x14] sm:$0x1] }
 0x193   : > { %v2164_v47 = vadd.f32 %v5231_v48, %v2012_v55  ;;  %v2095_v52 = vpop.f32.mrf.mxu0 }
 0x194   : > { %v2333_v14 = vshrl.u32 %v4849_v61, 16  ;;  %v4847_v30 = vpack.c.bf16 %v2232_v57, %v2232_v57  ;;  %v2235_v0 = vmax.f32 %v2215_v26, 0.0  ;;  %v2336_v15 = vshll.u32 %v4849_v61, 16 }
 0x195   : > { %v2213_v25 = vadd.f32 %v6532_v10, %v2186_v46  ;;  %v2191_v8 = vmul.f32 %v6515_v29, %v2164_v47  ;;  %v2162_v45 = vadd.f32 %v2095_v52, %v2010_v4  ;;  %v5232_v39 = vpop.f32.mrf.mxu0 }
 0x196   : > { %v2335_v1 = vrot.slane %v2333_v14, 7  ;;  %v2316_v58 = vshrl.u32 %v4847_v30, 16  ;;  %v2319_v2 = vshll.u32 %v4847_v30, 16  ;;  %v4850_v36 = vpack.c.bf16 %v2235_v0, %v2235_v0 }
 0x197   : > { %v2233_v40 = vmax.f32 %v2213_v25, 0.0  ;;  %v2218_v28 = vadd.f32 %v6532_v10, %v2191_v8  ;;  %v2189_v51 = vmul.f32 %v6515_v29, %v2162_v45  ;;  %v2165_v54 = vadd.f32 %v5232_v39, %v6521_v63  ;;  %v2098_v4 = vpop.f32.mrf.mxu0 }
 0x198   : > { %v2338_v22 = vor.u32 %v2336_v15, %v2335_v1  ;;  %v2339_v17 = vrot.slane %v2335_v1, 4  ;;  %v2318_v41 = vrot.slane %v2316_v58, 7  ;;  %v2341_v3 = vshrl.u32 %v4850_v36, 16  ;;  %v2525_v15 = vld [vmem:[#allocation2 + $0x8] sm:$0x1] }
 0x199   : > { %v2344_v7 = vshll.u32 %v4850_v36, 16  ;;  %v4848_v37 = vpack.c.bf16 %v2233_v40, %v2233_v40  ;;  %v2238_v38 = vmax.f32 %v2218_v28, 0.0  ;;  %v2216_v34 = vadd.f32 %v6532_v10, %v2189_v51  ;;  %v5235_v35 = vpop.f32.mrf.mxu0  ;;  %v2542_v36 = vld [vmem:[#allocation2 + $0x24] sm:$0xf] }
 0x19a   : > { %v2529_v63 = vsel %vm6580_vm13, %v2338_v22, %v2528_v53  ;;  %v2321_v56 = vor.u32 %v2319_v2, %v2318_v41  ;;  %v2322_v11 = vrot.slane %v2318_v41, 4  ;;  %v2343_v5 = vrot.slane %v2341_v3, 7 }
 0x19b   : > { %2530 = vst [vmem:[#allocation2 + $0xc] sm:$0xf] %v2529_v63  ;;  %v2324_v18 = vshrl.u32 %v4848_v37, 16  ;;  %v2327_v62 = vshll.u32 %v4848_v37, 16  ;;  %v4853_v20 = vpack.c.bf16 %v2238_v38, %v2238_v38  ;;  %v2236_v12 = vmax.f32 %v2216_v34, 0.0  ;;  %v2111_v33 = vpop.f32.mrf.mxu0 }
 0x19c   : > { %v2519_v13 = vsel %vm6580_vm13, %v2321_v56, %v2518_v9  ;;  %v2346_v48 = vor.u32 %v2344_v7, %v2343_v5  ;;  %v2348_v61 = vrot.slane %v2343_v5, 4  ;;  %v2192_v57 = vmul.f32 %v6515_v29, %v2165_v54  ;;  %v2535_v34 = vld [vmem:[#allocation2 + $0x18] sm:$0xf] }
 0x19d   : > { %2520 = vst [vmem:[#allocation2] sm:$0xf] %v2519_v13  ;;  %v2326_v26 = vrot.slane %v2324_v18, 7  ;;  %v2367_v46 = vshrl.u32 %v4853_v20, 16  ;;  %v2370_v47 = vshll.u32 %v4853_v20, 16  ;;  %v4851_v52 = vpack.c.bf16 %v2236_v12, %v2236_v12  ;;  %v5236_v14 = vpop.f32.mrf.mxu0 }
 0x19e   : > { %v2347_v30 = vsel %vm6598_vm15, %v2339_v17, %v2346_v48  ;;  %v2533_v0 = vsel %vm6590_vm14, %v2348_v61, %v2532_v27  ;;  %v2219_v25 = vadd.f32 %v6532_v10, %v2192_v57  ;;  %v2163_v8 = vadd.f32 %v2098_v4, %v6524_v50 }
 0x19f   : > { %2531 = vst.msk [vmem:[#allocation2 + $0x10] sm:$0xf] %vm2515_vm8, %v2347_v30  ;;  %2534 = vst [vmem:[#allocation2 + $0x14] sm:$0x1] %v2533_v0  ;;  %v2329_v45 = vor.u32 %v2327_v62, %v2326_v26  ;;  %v2331_v39 = vrot.slane %v2326_v26, 4  ;;  %v6612_v1 = vrot.slane %v2367_v46, 7  ;;  %v2114_v2 = vpop.f32.mrf.mxu0  ;;  %v2168_v51 = vadd.f32 %v5235_v35, %v6527_v43 }
 0x1a0   : > { %v2350_v58 = vshrl.u32 %v4851_v52, 16  ;;  %v2353_v53 = vshll.u32 %v4851_v52, 16  ;;  %v2239_v40 = vmax.f32 %v2219_v25, 0.0  ;;  %v2190_v28 = vmul.f32 %v6515_v29, %v2163_v8  ;;  %v2546_v52 = vld [vmem:[#allocation2 + $0x2c] sm:$0x1] }
 0x1a1   : > { %v2330_v54 = vsel %vm6598_vm15, %v2322_v11, %v2329_v45  ;;  %v2526_v50 = vsel %vm6590_vm14, %v2331_v39, %v2525_v15  ;;  %v2372_v4 = vor.u32 %v2370_v47, %v6612_v1  ;;  %v2373_v22 = vrot.slane %v6612_v1, 4  ;;  %v6622_v17 = vpop.f32.mrf.mxu0 }
 0x1a2   : > { %v2594_v41 = vld [vmem:[#allocation2 + $0xc] sm:$0x1]  ;;  %2522 = vst.msk [vmem:[#allocation2 + $0x4] sm:$0xf] %vm2515_vm8, %v2330_v54  ;;  %2527 = vst [vmem:[#allocation2 + $0x8] sm:$0x1] %v2526_v50  ;;  %v4854_v9 = vpack.c.bf16 %v2239_v40, %v2239_v40  ;;  %v2217_v43 = vadd.f32 %v6532_v10, %v2190_v28  ;;  %v2195_v7 = vmul.f32 %v6515_v29, %v2168_v51 }
 0x1a3   : > { %v6625_v3 = vrot.slane %v2350_v58, 7  ;;  %v2595_v37 = vsel %vm6590_vm14, 0, %v2594_v41  ;;  %v2543_v38 = vsel %vm6580_vm13, %v2372_v4, %v2542_v36  ;;  %v2166_v35 = vadd.f32 %v2111_v33, %v6535_v19  ;;  %v6635_v56 = vpop.f32.mrf.mxu0 }
 0x1a4   : > { %v2169_v63 = vadd.f32 %v5236_v14, %v6538_v24  ;;  %2596 = vst [vmem:[#allocation2 + $0xc] sm:$0x1] %v2595_v37  ;;  %v2591_v5 = vld [vmem:[#allocation2] sm:$0x1]  ;;  %2544 = vst [vmem:[#allocation2 + $0x24] sm:$0xf] %v2543_v38  ;;  %v2222_v12 = vadd.f32 %v6532_v10, %v2195_v7  ;;  %v2167_v46 = vadd.f32 %v2114_v2, %v6546_v23 }
 0x1a5   : > { %v2355_v27 = vor.u32 %v2353_v53, %v6625_v3  ;;  %v2356_v18 = vrot.slane %v6625_v3, 4  ;;  %v2375_v62 = vshrl.u32 %v4854_v9, 16  ;;  %v2378_v20 = vshll.u32 %v4854_v9, 16  ;;  %v6649_v13 = vpop.f32.mrf.mxu0  ;;  %v2539_v7 = vld [vmem:[#allocation2 + $0x20] sm:$0x1] }
 0x1a6   : > { %v2592_v19 = vsel %vm6590_vm14, 0, %v2591_v5  ;;  %v2237_v24 = vmax.f32 %v2217_v43, 0.0  ;;  %v2193_v33 = vmul.f32 %v6515_v29, %v2166_v35  ;;  %v2625_v48 = vld [vmem:[#allocation2 + $0x14] sm:$0x1]  ;;  %v2196_v26 = vmul.f32 %v6515_v29, %v2169_v63  ;;  %v2556_v5 = vld [vmem:[#allocation2 + $0x3c] sm:$0xf] }
 0x1a7   : > { %2593 = vst [vmem:[#allocation2] sm:$0x1] %v2592_v19  ;;  %v2536_v61 = vsel %vm6580_vm13, %v2355_v27, %v2535_v34  ;;  %v2377_v57 = vrot.slane %v2375_v62, 7  ;;  %v2626_v47 = vsel %vm6639_vm1, 0, %v2625_v48  ;;  %v2242_v30 = vmax.f32 %v2222_v12, 0.0  ;;  %v6658_v15 = vpop.f32.mrf.mxu0 }
 0x1a8   : > { %2537 = vst [vmem:[#allocation2 + $0x18] sm:$0xf] %v2536_v61  ;;  %v4852_v14 = vpack.c.bf16 %v2237_v24, %v2237_v24  ;;  %v2220_v0 = vadd.f32 %v6532_v10, %v2193_v33  ;;  %2627 = vst [vmem:[#allocation2 + $0x14] sm:$0x1] %v2626_v47  ;;  %v2223_v45 = vadd.f32 %v6532_v10, %v2196_v26 }
 0x1a9   : > { %v2380_v25 = vor.u32 %v2378_v20, %v2377_v57  ;;  %v2382_v8 = vrot.slane %v2377_v57, 4  ;;  %v2194_v39 = vmul.f32 %v6515_v29, %v2167_v46  ;;  %v2622_v1 = vld [vmem:[#allocation2 + $0x8] sm:$0x1]  ;;  %v4857_v2 = vpack.c.bf16 %v2242_v30, %v2242_v30  ;;  %v5243_v9 = vpop.f32.mrf.mxu0  ;;  %v2560_v30 = vld [vmem:[#allocation2 + $0x44] sm:$0x1] }
 0x1aa   : > { %v2358_v23 = vshrl.u32 %v4852_v14, 16  ;;  %v2361_v58 = vshll.u32 %v4852_v14, 16  ;;  %v2240_v36 = vmax.f32 %v2220_v0, 0.0  ;;  %v2623_v53 = vsel %vm6639_vm1, 0, %v2622_v1  ;;  %v2549_v14 = vld [vmem:[#allocation2 + $0x30] sm:$0xf] }
 0x1ab   : > { %v2381_v40 = vsel %vm6598_vm15, %v2373_v22, %v2380_v25  ;;  %v2547_v28 = vsel %vm6590_vm14, %v2382_v8, %v2546_v52  ;;  %v2243_v51 = vmax.f32 %v2223_v45, 0.0  ;;  %2624 = vst [vmem:[#allocation2 + $0x8] sm:$0x1] %v2623_v53  ;;  %v2600_v54 = vld [vmem:[#allocation2 + $0x24] sm:$0x1]  ;;  %v2401_v4 = vshrl.u32 %v4857_v2, 16  ;;  %v2143_v61 = vpop.f32.mrf.mxu0 }
 0x1ac   : > { %2545 = vst.msk [vmem:[#allocation2 + $0x28] sm:$0xf] %vm2515_vm8, %v2381_v40  ;;  %2548 = vst [vmem:[#allocation2 + $0x2c] sm:$0x1] %v2547_v28  ;;  %v2360_v50 = vrot.slane %v2358_v23, 7  ;;  %v2404_v41 = vshll.u32 %v4857_v2, 16  ;;  %v4855_v3 = vpack.c.bf16 %v2240_v36, %v2240_v36  ;;  %v2221_v22 = vadd.f32 %v6532_v10, %v2194_v39 }
 0x1ad   : > { %v2601_v43 = vsel %vm6590_vm14, 0, %v2600_v54  ;;  %v4858_v37 = vpack.c.bf16 %v2243_v51, %v2243_v51  ;;  %v2172_v38 = vadd.f32 %v6622_v17, %v6554_v42  ;;  %v2403_v63 = vrot.slane %v2401_v4, 7  ;;  %v5244_v40 = vpop.f32.mrf.mxu0  ;;  %v2553_v4 = vld [vmem:[#allocation2 + $0x38] sm:$0x1] }
 0x1ae   : > { %2602 = vst [vmem:[#allocation2 + $0x24] sm:$0x1] %v2601_v43  ;;  %v2363_v34 = vor.u32 %v2361_v58, %v2360_v50  ;;  %v2365_v35 = vrot.slane %v2360_v50, 4  ;;  %v2384_v27 = vshrl.u32 %v4855_v3, 16  ;;  %v2387_v20 = vshll.u32 %v4855_v3, 16 }
 0x1af   : > { %v2597_v62 = vld [vmem:[#allocation2 + $0x18] sm:$0x1]  ;;  %v2409_v19 = vshrl.u32 %v4858_v37, 16  ;;  %v2412_v24 = vshll.u32 %v4858_v37, 16  ;;  %v2241_v12 = vmax.f32 %v2221_v22, 0.0  ;;  %v2406_v17 = vor.u32 %v2404_v41, %v2403_v63 }
 0x1b0   : > { %v2598_v33 = vsel %vm6590_vm14, 0, %v2597_v62  ;;  %v2364_v48 = vsel %vm6598_vm15, %v2356_v18, %v2363_v34  ;;  %v2540_v42 = vsel %vm6590_vm14, %v2365_v35, %v2539_v7  ;;  %v2407_v57 = vrot.slane %v2403_v63, 4 }
 0x1b1   : > { %2599 = vst [vmem:[#allocation2 + $0x18] sm:$0x1] %v2598_v33  ;;  %2538 = vst.msk [vmem:[#allocation2 + $0x1c] sm:$0xf] %vm2515_vm8, %v2364_v48  ;;  %v2386_v26 = vrot.slane %v2384_v27, 7  ;;  %v2411_v46 = vrot.slane %v2409_v19, 7  ;;  %v4856_v47 = vpack.c.bf16 %v2241_v12, %v2241_v12  ;;  %v2557_v52 = vsel %vm6580_vm13, %v2406_v17, %v2556_v5  ;;  %v2146_v12 = vpop.f32.mrf.mxu0 }
 0x1b2   : > { %2541 = vst [vmem:[#allocation2 + $0x20] sm:$0x1] %v2540_v42  ;;  %v2199_v18 = vmul.f32 %v6515_v29, %v2172_v38  ;;  %v2170_v0 = vadd.f32 %v6635_v56, %v6557_v16  ;;  %v2173_v25 = vadd.f32 %v6649_v13, %v6560_v60  ;;  %2558 = vst [vmem:[#allocation2 + $0x3c] sm:$0xf] %v2557_v52  ;;  %v2570_v48 = vld [vmem:[#allocation2 + $0x54] sm:$0xf] }
 0x1b3   : > { %v2631_v8 = vld [vmem:[#allocation2 + $0x2c] sm:$0x1]  ;;  %v2389_v45 = vor.u32 %v2387_v20, %v2386_v26  ;;  %v2390_v39 = vrot.slane %v2386_v26, 4  ;;  %v2414_v1 = vor.u32 %v2412_v24, %v2411_v46  ;;  %v2416_v23 = vrot.slane %v2411_v46, 4 }
 0x1b4   : > { %v2632_v58 = vsel %vm6639_vm1, 0, %v2631_v8  ;;  %v2392_v2 = vshrl.u32 %v4856_v47, 16  ;;  %v2395_v36 = vshll.u32 %v4856_v47, 16  ;;  %v2226_v53 = vadd.f32 %v6532_v10, %v2199_v18 }
 0x1b5   : > { %2633 = vst [vmem:[#allocation2 + $0x2c] sm:$0x1] %v2632_v58  ;;  %v2550_v16 = vsel %vm6580_vm13, %v2389_v45, %v2549_v14  ;;  %v2415_v60 = vsel %vm6598_vm15, %v2407_v57, %v2414_v1  ;;  %v2561_v56 = vsel %vm6590_vm14, %v2416_v23, %v2560_v30  ;;  %v2197_v13 = vmul.f32 %v6515_v29, %v2170_v0  ;;  %v2563_v23 = vld [vmem:[#allocation2 + $0x48] sm:$0xf] }
 0x1b6   : > { %2551 = vst [vmem:[#allocation2 + $0x30] sm:$0xf] %v2550_v16  ;;  %2559 = vst.msk [vmem:[#allocation2 + $0x40] sm:$0xf] %vm2515_vm8, %v2415_v60  ;;  %v2394_v28 = vrot.slane %v2392_v2, 7  ;;  %v2246_v51 = vmax.f32 %v2226_v53, 0.0  ;;  %v2200_v54 = vmul.f32 %v6515_v29, %v2173_v25  ;;  %v2171_v50 = vadd.f32 %v6658_v15, %v6563_v31 }
 0x1b7   : > { %2562 = vst [vmem:[#allocation2 + $0x44] sm:$0x1] %v2561_v56  ;;  %v2224_v41 = vadd.f32 %v6532_v10, %v2197_v13  ;;  %v2176_v3 = vadd.f32 %v5243_v9, %v6568_v49  ;;  %v2174_v43 = vadd.f32 %v2143_v61, %v6570_v44  ;;  %v2177_v7 = vadd.f32 %v5244_v40, %v6572_v32  ;;  %v2574_v56 = vld [vmem:[#allocation2 + $0x5c] sm:$0x1] }
 0x1b8   : > { %v2397_v22 = vor.u32 %v2395_v36, %v2394_v28  ;;  %v2399_v38 = vrot.slane %v2394_v28, 4  ;;  %v4861_v34 = vpack.c.bf16 %v2246_v51, %v2246_v51  ;;  %v2227_v35 = vadd.f32 %v6532_v10, %v2200_v54 }
 0x1b9   : > { %v2628_v37 = vld [vmem:[#allocation2 + $0x20] sm:$0x1]  ;;  %v2244_v5 = vmax.f32 %v2224_v41, 0.0  ;;  %v2198_v31 = vmul.f32 %v6515_v29, %v2171_v50  ;;  %v2203_v15 = vmul.f32 %v6515_v29, %v2176_v3  ;;  %v2606_v49 = vld [vmem:[#allocation2 + $0x3c] sm:$0x1]  ;;  %v2201_v17 = vmul.f32 %v6515_v29, %v2174_v43 }
 0x1ba   : > { %v2629_v63 = vsel %vm6639_vm1, 0, %v2628_v37  ;;  %v2398_v44 = vsel %vm6598_vm15, %v2390_v39, %v2397_v22  ;;  %v2554_v32 = vsel %vm6590_vm14, %v2399_v38, %v2553_v4  ;;  %v2435_v9 = vshrl.u32 %v4861_v34, 16 }
 0x1bb   : > { %2630 = vst [vmem:[#allocation2 + $0x20] sm:$0x1] %v2629_v63  ;;  %v2438_v27 = vshll.u32 %v4861_v34, 16  ;;  %v2607_v62 = vsel %vm6590_vm14, 0, %v2606_v49  ;;  %2552 = vst.msk [vmem:[#allocation2 + $0x34] sm:$0xf] %vm2515_vm8, %v2398_v44  ;;  %v4859_v20 = vpack.c.bf16 %v2244_v5, %v2244_v5  ;;  %v2225_v24 = vadd.f32 %v6532_v10, %v2198_v31 }
 0x1bc   : > { %2555 = vst [vmem:[#allocation2 + $0x38] sm:$0x1] %v2554_v32  ;;  %v2247_v19 = vmax.f32 %v2227_v35, 0.0  ;;  %2608 = vst [vmem:[#allocation2 + $0x3c] sm:$0x1] %v2607_v62  ;;  %v2437_v33 = vrot.slane %v2435_v9, 7  ;;  %v2230_v42 = vadd.f32 %v6532_v10, %v2203_v15  ;;  %v2204_v61 = vmul.f32 %v6515_v29, %v2177_v7 }
 0x1bd   : > { %v2603_v57 = vld [vmem:[#allocation2 + $0x30] sm:$0x1]  ;;  %v2418_v46 = vshrl.u32 %v4859_v20, 16  ;;  %v2421_v47 = vshll.u32 %v4859_v20, 16  ;;  %v2175_v0 = vadd.f32 %v2146_v12, %v6574_v59  ;;  %v2245_v39 = vmax.f32 %v2225_v24, 0.0 }
 0x1be   : > { %v2637_v26 = vld [vmem:[#allocation2 + $0x44] sm:$0x1]  ;;  %v4862_v52 = vpack.c.bf16 %v2247_v19, %v2247_v19  ;;  %v2604_v14 = vsel %vm6590_vm14, 0, %v2603_v57  ;;  %v2440_v18 = vor.u32 %v2438_v27, %v2437_v33  ;;  %v2441_v25 = vrot.slane %v2437_v33, 4  ;;  %v2567_v63 = vld [vmem:[#allocation2 + $0x50] sm:$0x1] }
 0x1bf   : > { %v2638_v30 = vsel %vm6639_vm1, 0, %v2637_v26  ;;  %2605 = vst [vmem:[#allocation2 + $0x30] sm:$0x1] %v2604_v14  ;;  %v2420_v8 = vrot.slane %v2418_v46, 7  ;;  %v2250_v58 = vmax.f32 %v2230_v42, 0.0  ;;  %v2228_v2 = vadd.f32 %v6532_v10, %v2201_v17 }
 0x1c0   : > { %2639 = vst [vmem:[#allocation2 + $0x44] sm:$0x1] %v2638_v30  ;;  %v2443_v45 = vshrl.u32 %v4862_v52, 16  ;;  %v2571_v1 = vsel %vm6580_vm13, %v2440_v18, %v2570_v48  ;;  %v2231_v36 = vadd.f32 %v6532_v10, %v2204_v61  ;;  %v2446_v16 = vshll.u32 %v4862_v52, 16  ;;  %v2584_v44 = vld [vmem:[#allocation2 + $0x6c] sm:$0xf] }
 0x1c1   : > { %2572 = vst [vmem:[#allocation2 + $0x54] sm:$0xf] %v2571_v1  ;;  %v2423_v53 = vor.u32 %v2421_v47, %v2420_v8  ;;  %v4860_v59 = vpack.c.bf16 %v2245_v39, %v2245_v39  ;;  %v4865_v13 = vpack.c.bf16 %v2250_v58, %v2250_v58  ;;  %v2248_v28 = vmax.f32 %v2228_v2, 0.0  ;;  %v2577_v26 = vld [vmem:[#allocation2 + $0x60] sm:$0xf] }
 0x1c2   : > { %v2445_v40 = vrot.slane %v2443_v45, 7  ;;  %v2251_v51 = vmax.f32 %v2231_v36, 0.0  ;;  %v2202_v54 = vmul.f32 %v6515_v29, %v2175_v0  ;;  %v2424_v49 = vrot.slane %v2420_v8, 4  ;;  %v2588_v46 = vld [vmem:[#allocation2 + $0x74] sm:$0x1] }
 0x1c3   : > { %v2634_v60 = vld [vmem:[#allocation2 + $0x38] sm:$0x1]  ;;  %v2564_v4 = vsel %vm6580_vm13, %v2423_v53, %v2563_v23  ;;  %v2426_v43 = vshrl.u32 %v4860_v59, 16  ;;  %v2429_v7 = vshll.u32 %v4860_v59, 16  ;;  %v2469_v37 = vshrl.u32 %v4865_v13, 16 }
 0x1c4   : > { %v2635_v50 = vsel %vm6639_vm1, 0, %v2634_v60  ;;  %v2448_v41 = vor.u32 %v2446_v16, %v2445_v40  ;;  %v2450_v3 = vrot.slane %v2445_v40, 4  ;;  %2565 = vst [vmem:[#allocation2 + $0x48] sm:$0xf] %v2564_v4  ;;  %v4863_v29 = vpack.c.bf16 %v2248_v28, %v2248_v28  ;;  %v2581_v53 = vld [vmem:[#allocation2 + $0x68] sm:$0x1] }
 0x1c5   : > { %2636 = vst [vmem:[#allocation2 + $0x38] sm:$0x1] %v2635_v50  ;;  %v4866_v34 = vpack.c.bf16 %v2251_v51, %v2251_v51  ;;  %v2428_v35 = vrot.slane %v2426_v43, 7  ;;  %v2471_v5 = vrot.slane %v2469_v37, 7  ;;  %v2472_v31 = vshll.u32 %v4865_v13, 16 }
 0x1c6   : > { %v2449_v22 = vsel %vm6598_vm15, %v2441_v25, %v2448_v41  ;;  %v2575_v38 = vsel %vm6590_vm14, %v2450_v3, %v2574_v56  ;;  %v2229_v15 = vadd.f32 %v6532_v10, %v2202_v54  ;;  %v2452_v32 = vshrl.u32 %v4863_v29, 16 }
 0x1c7   : > { %2573 = vst.msk [vmem:[#allocation2 + $0x58] sm:$0xf] %vm2515_vm8, %v2449_v22  ;;  %2576 = vst [vmem:[#allocation2 + $0x5c] sm:$0x1] %v2575_v38  ;;  %v2455_v9 = vshll.u32 %v4863_v29, 16  ;;  %v2477_v27 = vshrl.u32 %v4866_v34, 16  ;;  %v2431_v20 = vor.u32 %v2429_v7, %v2428_v35  ;;  %v2474_v24 = vor.u32 %v2472_v31, %v2471_v5 }
 0x1c8   : > { %v2612_v62 = vld [vmem:[#allocation2 + $0x54] sm:$0x1]  ;;  %v2433_v19 = vrot.slane %v2428_v35, 4  ;;  %v2480_v12 = vshll.u32 %v4866_v34, 16  ;;  %v2454_v48 = vrot.slane %v2452_v32, 7  ;;  %v2249_v17 = vmax.f32 %v2229_v15, 0.0 }
 0x1c9   : > { %v2613_v33 = vsel %vm6590_vm14, 0, %v2612_v62  ;;  %v2479_v42 = vrot.slane %v2477_v27, 7  ;;  %v2432_v10 = vsel %vm6598_vm15, %v2424_v49, %v2431_v20  ;;  %v2585_v57 = vsel %vm6580_vm13, %v2474_v24, %v2584_v44 }
 0x1ca   : > { %2614 = vst [vmem:[#allocation2 + $0x54] sm:$0x1] %v2613_v33  ;;  %v2568_v61 = vsel %vm6590_vm14, %v2433_v19, %v2567_v63  ;;  %2566 = vst.msk [vmem:[#allocation2 + $0x4c] sm:$0xf] %vm2515_vm8, %v2432_v10  ;;  %v2475_v52 = vrot.slane %v2471_v5, 4  ;;  %v2457_v14 = vor.u32 %v2455_v9, %v2454_v48  ;;  %v4864_v25 = vpack.c.bf16 %v2249_v17, %v2249_v17 }
 0x1cb   : > { %v2609_v47 = vld [vmem:[#allocation2 + $0x48] sm:$0x1]  ;;  %2569 = vst [vmem:[#allocation2 + $0x50] sm:$0x1] %v2568_v61  ;;  %2586 = vst [vmem:[#allocation2 + $0x6c] sm:$0xf] %v2585_v57  ;;  %v2482_v30 = vor.u32 %v2480_v12, %v2479_v42 }
 0x1cc   : > { %v2484_v18 = vrot.slane %v2479_v42, 4  ;;  %v2610_v0 = vsel %vm6590_vm14, 0, %v2609_v47  ;;  %v2578_v45 = vsel %vm6580_vm13, %v2457_v14, %v2577_v26  ;;  %v2460_v58 = vshrl.u32 %v4864_v25, 16 }
 0x1cd   : > { %2611 = vst [vmem:[#allocation2 + $0x48] sm:$0x1] %v2610_v0  ;;  %v2483_v39 = vsel %vm6598_vm15, %v2475_v52, %v2482_v30  ;;  %2579 = vst [vmem:[#allocation2 + $0x60] sm:$0xf] %v2578_v45  ;;  %v2463_v36 = vshll.u32 %v4864_v25, 16  ;;  %v2458_v16 = vrot.slane %v2454_v48, 4 }
 0x1ce   : > { %v2643_v8 = vld [vmem:[#allocation2 + $0x5c] sm:$0x1]  ;;  %v2589_v1 = vsel %vm6590_vm14, %v2484_v18, %v2588_v46  ;;  %2587 = vst.msk [vmem:[#allocation2 + $0x70] sm:$0xf] %vm2515_vm8, %v2483_v39  ;;  %v2462_v2 = vrot.slane %v2460_v58, 7 }
 0x1cf   : > { %v2644_v23 = vsel %vm6639_vm1, 0, %v2643_v8  ;;  %2590 = vst [vmem:[#allocation2 + $0x74] sm:$0x1] %v2589_v1 }
 0x1d0   : > { %2645 = vst [vmem:[#allocation2 + $0x5c] sm:$0x1] %v2644_v23  ;;  %v2465_v59 = vor.u32 %v2463_v36, %v2462_v2  ;;  %v2467_v60 = vrot.slane %v2462_v2, 4 }
 0x1d2   : > { %v2640_v55 = vld [vmem:[#allocation2 + $0x50] sm:$0x1]  ;;  %v2618_v40 = vld [vmem:[#allocation2 + $0x6c] sm:$0x1]  ;;  %v2466_v28 = vsel %vm6598_vm15, %v2458_v16, %v2465_v59  ;;  %v2582_v51 = vsel %vm6590_vm14, %v2467_v60, %v2581_v53 }
 0x1d3   : > { %v2641_v56 = vsel %vm6639_vm1, 0, %v2640_v55  ;;  %v2619_v13 = vsel %vm6590_vm14, 0, %v2618_v40  ;;  %2580 = vst.msk [vmem:[#allocation2 + $0x64] sm:$0xf] %vm2515_vm8, %v2466_v28  ;;  %2583 = vst [vmem:[#allocation2 + $0x68] sm:$0x1] %v2582_v51 }
 0x1d4   : > { %2642 = vst [vmem:[#allocation2 + $0x50] sm:$0x1] %v2641_v56  ;;  %2620 = vst [vmem:[#allocation2 + $0x6c] sm:$0x1] %v2619_v13  ;;  %v2615_v54 = vld [vmem:[#allocation2 + $0x60] sm:$0x1] }
 0x1d5   : > { %v2616_v4 = vsel %vm6590_vm14, 0, %v2615_v54 }
 0x1d6   : > { %v2649_v50 = vld [vmem:[#allocation2 + $0x74] sm:$0x1]  ;;  %2617 = vst [vmem:[#allocation2 + $0x60] sm:$0x1] %v2616_v4 }
 0x1d7   : > { %v2650_v41 = vsel %vm6639_vm1, 0, %v2649_v50 }
 0x1d8   : > { %2651 = vst [vmem:[#allocation2 + $0x74] sm:$0x1] %v2650_v41  ;;  %2655 = sbr.rel (%p4720_p7) target bundleno = 480 (0x1e0), region = 52 }
 0x1da   : > { %v2646_v3 = vld [vmem:[#allocation2 + $0x68] sm:$0x1] }
 0x1db   : > { %v2647_v21 = vsel %vm6639_vm1, 0, %v2646_v3 }
 0x1dc   : > { %2648 = vst [vmem:[#allocation2 + $0x68] sm:$0x1] %v2647_v21 }
 0x1dd   : > { %v5530_v43 = vmov 0  }
 0x1de   : > { %2656 = vst.msk [vmem:[#allocation2] sm:$0xf] %vm2515_vm8, %v5530_v43  ;;  %2657 = vst.msk [vmem:[#allocation2 + $0x4] sm:$0xf] %vm2515_vm8, %v5530_v43 }
 0x1df   : > { %2659 = vst.msk [vmem:[#allocation2 + $0x8] sm:$0x1] %vm2523_vm11, %v5530_v43 }
 0x1e0 PF: > { %p4721_p8 = scmp.ne.s32.totalorder %s5512_s24, 1 }
 0x1e2   : > { %2663 = sbr.rel (%p4721_p8) target bundleno = 490 (0x1ea), region = 56 }
 0x1e7   : > { %v5531_v6 = vmov 0  }
 0x1e8   : > { %2665 = vst.msk [vmem:[#allocation2 + $0x6c] sm:$0xf] %vm2515_vm8, %v5531_v6  ;;  %2666 = vst.msk [vmem:[#allocation2 + $0x70] sm:$0xf] %vm2515_vm8, %v5531_v6 }
 0x1e9   : > { %2668 = vst.msk [vmem:[#allocation2 + $0x74] sm:$0x1] %vm2523_vm11, %v5531_v6 }
 0x1ea PF: > { %v4722_v11 = vld [vmem:[%s7660_s2 + $0x2] sm:$0x3]  ;;  %v6790_v37 = vld [vmem:[#allocation2 + $0x4] sm:$0xf]  ;;  %v6794_v38 = vld [vmem:[#allocation2 + $0x8] sm:$0x1] }
 0x1eb   : > { %v6788_v7 = vld [vmem:[#allocation2] sm:$0xf]  ;;  %5416 = vmatprep.subr.msk.bf16.mxu1 %vm652_vm0, %v4722_v11  ;;  %v2943_v22 = vsel %vm652_vm0, %v4722_v11, 0  ;;  %v2710_v35 = vshll.u32 %v6790_v37, 16  ;;  %v2714_v63 = vshrl.u32 %v6790_v37, 16  ;;  %v2720_v5 = vshll.u32 %v6794_v38, 16 }
 0x1ec   : > { %v2701_v29 = vshrl.u32 %v6788_v7, 16  ;;  %v2704_v34 = vshll.u32 %v6788_v7, 16  ;;  %5246 = vmatpush3.bf16.msra.mxu1 %v2943_v22  ;;  %v2699_v31 = vld [vmem:[%s7660_s2] sm:$0x3]  ;;  %v6804_v15 = vld [vmem:[#allocation2 + $0xc] sm:$0xf] }
 0x1ed   : > { %v2712_v32 = vrot.slane %v2710_v35, 5  ;;  %5417 = vmatprep.subr.msk.bf16.mxu1 %vm652_vm0, %v2699_v31  ;;  %v6807_v9 = vld [vmem:[#allocation2 + $0x10] sm:$0xf]  ;;  %v2716_v27 = vrot.slane %v2714_v63, 4  ;;  %v3107_v62 = vsel %vm652_vm0, %v2699_v31, 0  ;;  %v2725_v19 = vshrl.u32 %v6804_v15, 16 }
 0x1ee   : > { %v2703_v49 = vrot.slane %v2701_v29, 4  ;;  %v2706_v44 = vrot.slane %v2704_v34, 5  ;;  %v6810_v20 = vld [vmem:[#allocation2 + $0x14] sm:$0x1]  ;;  %v2728_v24 = vshll.u32 %v6804_v15, 16  ;;  %v2734_v33 = vshll.u32 %v6807_v9, 16 }
 0x1ef   : > { %v2738_v48 = vshrl.u32 %v6807_v9, 16  ;;  %v2744_v42 = vshll.u32 %v6810_v20, 16  ;;  %v6817_v17 = vld [vmem:[#allocation2 + $0x18] sm:$0xf]  ;;  %v2717_v10 = vor.u32 %v2716_v27, %v2712_v32  ;;  %v2722_v61 = vrot.slane %v2720_v5, 5 }
 0x1f0   : > { %v2707_v12 = vor.u32 %v2706_v44, %v2703_v49  ;;  %v2727_v57 = vrot.slane %v2725_v19, 4  ;;  %v2730_v26 = vrot.slane %v2728_v24, 5  ;;  %v6819_v46 = vld [vmem:[#allocation2 + $0x1c] sm:$0xf]  ;;  %v2736_v52 = vrot.slane %v2734_v33, 5 }
 0x1f1   : > { %v2740_v14 = vrot.slane %v2738_v48, 4  ;;  %v2746_v30 = vrot.slane %v2744_v42, 5  ;;  %v2718_v18 = vrot.slane %v2717_v10, 4  ;;  %v2749_v25 = vshrl.u32 %v6817_v17, 16  ;;  %v6825_v23 = vld [vmem:[#allocation2 + $0x20] sm:$0x1] }
 0x1f2   : > { %v2708_v47 = vrot.slane %v2707_v12, 4  ;;  %v2731_v0 = vor.u32 %v2730_v26, %v2727_v57  ;;  %v2752_v8 = vshll.u32 %v6817_v17, 16  ;;  %v2758_v58 = vshll.u32 %v6819_v46, 16  ;;  %v6829_v36 = vld [vmem:[#allocation2 + $0x24] sm:$0xf] }
 0x1f3   : > { %v2741_v1 = vor.u32 %v2740_v14, %v2736_v52  ;;  %v2762_v2 = vshrl.u32 %v6819_v46, 16  ;;  %v2723_v53 = vsel %vm5674_vm4, %v2718_v18, %v2722_v61  ;;  %v2751_v40 = vrot.slane %v2749_v25, 4  ;;  %v6833_v59 = vld [vmem:[#allocation2 + $0x28] sm:$0xf]  ;;  %v6842_v21 = vld [vmem:[#allocation2 + $0x2c] sm:$0x1] }
 0x1f4   : > { %v2713_v39 = vsel %vm5674_vm4, %v2708_v47, %v2712_v32  ;;  %v2732_v55 = vrot.slane %v2731_v0, 4  ;;  %v2754_v16 = vrot.slane %v2752_v8, 5  ;;  %v2760_v13 = vrot.slane %v2758_v58, 5  ;;  %v6846_v11 = vld [vmem:[#allocation2 + $0x30] sm:$0xf] }
 0x1f5   : > { %v4723_v60 = vcombine.low %v2713_v39, %v2723_v53  ;;  %v2742_v56 = vrot.slane %v2741_v1, 4  ;;  %v2764_v28 = vrot.slane %v2762_v2, 4  ;;  %v2768_v50 = vshll.u32 %v6825_v23, 16  ;;  %v6850_v63 = vld [vmem:[#allocation2 + $0x34] sm:$0xf] }
 0x1f6   : > { %v2737_v51 = vsel %vm5674_vm4, %v2732_v55, %v2736_v52  ;;  %v2755_v54 = vor.u32 %v2754_v16, %v2751_v40  ;;  %v2773_v4 = vshrl.u32 %v6829_v36, 16  ;;  %v2776_v43 = vshll.u32 %v6829_v36, 16  ;;  %v6858_v19 = vld [vmem:[#allocation2 + $0x38] sm:$0x1]  ;;  %v6865_v61 = vld [vmem:[#allocation2 + $0x3c] sm:$0xf] }
 0x1f7   : > { %5247 = vmatprep.mubr.msk.bf16.mxu1 %vm621_vm3, %v4723_v60  ;;  %v2747_v41 = vsel %vm5674_vm4, %v2742_v56, %v2746_v30  ;;  %v2765_v3 = vor.u32 %v2764_v28, %v2760_v13  ;;  %v2782_v6 = vshll.u32 %v6833_v59, 16  ;;  %v2770_v34 = vrot.slane %v2768_v50, 5  ;;  %v6867_v57 = vld [vmem:[#allocation2 + $0x40] sm:$0xf]  ;;  %v6882_v8 = vld [vmem:[%s7660_s2 + $0x6] sm:$0x3] }
 0x1f8   : > { %v6848_v22 = vcombine.low %v2737_v51, %v2747_v41  ;;  %v2756_v29 = vrot.slane %v2755_v54, 4  ;;  %v2775_v35 = vrot.slane %v2773_v4, 4  ;;  %v2778_v31 = vrot.slane %v2776_v43, 5  ;;  %v6893_v16 = vld [vmem:[#allocation2 + $0x44] sm:$0x1] }
 0x1f9   : > { %v2766_v5 = vrot.slane %v2765_v3, 4  ;;  %v2784_v49 = vrot.slane %v2782_v6, 5  ;;  %v2786_v44 = vshrl.u32 %v6833_v59, 16  ;;  %v2792_v27 = vshll.u32 %v6842_v21, 16  ;;  %v6896_v54 = vld [vmem:[#allocation2 + $0x48] sm:$0xf] }
 0x1fa   : > { %5248 = vmatmul.mubr.msk.bf16.vlgmr.msra.gmra.mxu1 %vm621_vm3, %v6848_v22  ;;  %v2761_v32 = vsel %vm5674_vm4, %v2756_v29, %v2760_v13  ;;  %v2797_v24 = vshrl.u32 %v6846_v11, 16  ;;  %v2800_v12 = vshll.u32 %v6846_v11, 16  ;;  %v2779_v48 = vor.u32 %v2778_v31, %v2775_v35  ;;  %v6901_v43 = vld [vmem:[#allocation2 + $0x4c] sm:$0xf] }
 0x1fb   : > { %5264 = vmatpush3.bf16.msra.mxu1 %v3107_v62  ;;  %v2771_v33 = vsel %vm5674_vm4, %v2766_v5, %v2770_v34  ;;  %v2788_v42 = vrot.slane %v2786_v44, 4  ;;  %v2806_v10 = vshll.u32 %v6850_v63, 16  ;;  %v2794_v47 = vrot.slane %v2792_v27, 5  ;;  %v6874_v62 = vld [vmem:[%s7660_s2 + $0x4] sm:$0x3] }
 0x1fc   : > { %v6869_v26 = vcombine.low %v2761_v32, %v2771_v33  ;;  %v2799_v52 = vrot.slane %v2797_v24, 4  ;;  %v2802_v14 = vrot.slane %v2800_v12, 5  ;;  %v2780_v30 = vrot.slane %v2779_v48, 4  ;;  %5418 = vmatprep.subr.msk.bf16.mxu0 %vm652_vm0, %v6874_v62  ;;  %5419 = vmatprep.subr.msk.bf16.mxu1 %vm652_vm0, %v6882_v8  ;;  %v6916_v48 = vld [vmem:[#allocation2 + $0x54] sm:$0xf] }
 0x1fd   : > { %v2789_v18 = vor.u32 %v2788_v42, %v2784_v49  ;;  %v2808_v0 = vrot.slane %v2806_v10, 5  ;;  %v2810_v25 = vshrl.u32 %v6850_v63, 16  ;;  %v2816_v1 = vshll.u32 %v6858_v19, 16 }
 0x1fe   : > { %5251 = vmatprep.mubr.msk.bf16.mxu1 %vm621_vm3, %v6869_v26  ;;  %v2803_v39 = vor.u32 %v2802_v14, %v2799_v52  ;;  %v2821_v58 = vshrl.u32 %v6865_v61, 16  ;;  %v2824_v2 = vshll.u32 %v6865_v61, 16  ;;  %v2785_v53 = vsel %vm5674_vm4, %v2780_v30, %v2784_v49  ;;  %v6908_v49 = vld [vmem:[#allocation2 + $0x50] sm:$0x1]  ;;  %v6920_v14 = vld [vmem:[#allocation2 + $0x58] sm:$0xf] }
 0x1ff   : > { %v2790_v55 = vrot.slane %v2789_v18, 4  ;;  %v2812_v40 = vrot.slane %v2810_v25, 4  ;;  %v2830_v60 = vshll.u32 %v6867_v57, 16  ;;  %v2818_v13 = vrot.slane %v2816_v1, 5 }
 0x200   : > { %v2804_v56 = vrot.slane %v2803_v39, 4  ;;  %v2823_v28 = vrot.slane %v2821_v58, 4  ;;  %v2826_v51 = vrot.slane %v2824_v2, 5  ;;  %v2834_v3 = vshrl.u32 %v6867_v57, 16 }
 0x201   : > { %v2795_v50 = vsel %vm5674_vm4, %v2790_v55, %v2794_v47  ;;  %v2813_v4 = vor.u32 %v2812_v40, %v2808_v0  ;;  %v2832_v41 = vrot.slane %v2830_v60, 5  ;;  %v2840_v35 = vshll.u32 %v6893_v16, 16  ;;  %v6930_v55 = vld [vmem:[#allocation2 + $0x5c] sm:$0x1] }
 0x202   : > { %v6903_v6 = vcombine.low %v2785_v53, %v2795_v50  ;;  %v2809_v29 = vsel %vm5674_vm4, %v2804_v56, %v2808_v0  ;;  %v2827_v34 = vor.u32 %v2826_v51, %v2823_v28  ;;  %v2836_v31 = vrot.slane %v2834_v3, 4 }
 0x203   : > { %v2814_v5 = vrot.slane %v2813_v4, 4  ;;  %v2845_v44 = vshrl.u32 %v6896_v54, 16  ;;  %v2848_v32 = vshll.u32 %v6896_v54, 16  ;;  %v2842_v24 = vrot.slane %v2840_v35, 5 }
 0x204   : > { %5252 = vmatmul.mubr.msk.bf16.gmra.mxu1 %vm621_vm3, %v6903_v6  ;;  %v2828_v27 = vrot.slane %v2827_v34, 4  ;;  %v2854_v12 = vshll.u32 %v6901_v43, 16  ;;  %v2858_v33 = vshrl.u32 %v6901_v43, 16  ;;  %v2837_v10 = vor.u32 %v2836_v31, %v2832_v41  ;;  %v4790_v34 = vld [vmem:[%s7660_s2 + $0x8] sm:$0x3] }
 0x205   : > { %v2819_v42 = vsel %vm5674_vm4, %v2814_v5, %v2818_v13  ;;  %v2847_v47 = vrot.slane %v2845_v44, 4  ;;  %v2850_v52 = vrot.slane %v2848_v32, 5  ;;  %v2864_v58 = vshll.u32 %v6908_v49, 16 }
 0x206   : > { %v6922_v30 = vcombine.low %v2809_v29, %v2819_v42  ;;  %v2833_v18 = vsel %vm5674_vm4, %v2828_v27, %v2832_v41  ;;  %v2856_v0 = vrot.slane %v2854_v12, 5  ;;  %v2860_v25 = vrot.slane %v2858_v33, 4 }
 0x207   : > { %v2838_v39 = vrot.slane %v2837_v10, 4  ;;  %v2851_v1 = vor.u32 %v2850_v52, %v2847_v47  ;;  %v2869_v2 = vshrl.u32 %v6916_v48, 16  ;;  %v2872_v40 = vshll.u32 %v6916_v48, 16 }
 0x208   : > { %5255 = vmatprep.mubr.msk.bf16.mxu1 %vm621_vm3, %v6922_v30  ;;  %v2861_v53 = vor.u32 %v2860_v25, %v2856_v0  ;;  %v2878_v60 = vshll.u32 %v6920_v14, 16  ;;  %v2882_v56 = vshrl.u32 %v6920_v14, 16  ;;  %v2866_v51 = vrot.slane %v2864_v58, 5 }
 0x209   : > { %v2843_v13 = vsel %vm5674_vm4, %v2838_v39, %v2842_v24  ;;  %v2852_v28 = vrot.slane %v2851_v1, 4  ;;  %v2871_v50 = vrot.slane %v2869_v2, 4  ;;  %v2874_v3 = vrot.slane %v2872_v40, 5 }
 0x20a   : > { %v6937_v4 = vcombine.low %v2833_v18, %v2843_v13  ;;  %v2862_v41 = vrot.slane %v2861_v53, 4  ;;  %v2880_v29 = vrot.slane %v2878_v60, 5  ;;  %v2884_v5 = vrot.slane %v2882_v56, 4 }
 0x20b   : > { %v2857_v35 = vsel %vm5674_vm4, %v2852_v28, %v2856_v0  ;;  %v2888_v31 = vshll.u32 %v6930_v55, 16  ;;  %v3321_v44 = vsel %vm652_vm0, %v6874_v62, 0  ;;  %v2875_v27 = vor.u32 %v2874_v3, %v2871_v50 }
 0x20c   : > { %5256 = vmatmul.mubr.msk.bf16.gmra.mxu1 %vm621_vm3, %v6937_v4  ;;  %v2867_v32 = vsel %vm5674_vm4, %v2862_v41, %v2866_v51  ;;  %5282 = vmatpush3.bf16.msra.mxu0 %v3321_v44  ;;  %v4755_v24 = vrot.slane %v6788_v7, 9  ;;  %v3216_v12 = vrot.slane %v6790_v37, 5  ;;  %v2885_v42 = vor.u32 %v2884_v5, %v2880_v29 }
 0x20d   : > { %v6953_v33 = vcombine.low %v2857_v35, %v2867_v32  ;;  %v2890_v10 = vrot.slane %v2888_v31, 5  ;;  %v3219_v47 = vrot.slane %v6794_v38, 5  ;;  %5420 = vmatprep.subr.msk.bf16.mxu0 %vm652_vm0, %v4790_v34  ;;  %v2876_v62 = vrot.slane %v2875_v27, 4 }
 0x20e   : > { %v3217_v18 = vsel %vm5921_vm7, %v4755_v24, %v3216_v12  ;;  %v3218_v0 = vrot.slane %v3216_v12, 4  ;;  %v4756_v25 = vrot.slane %v6804_v15, 9  ;;  %v2886_v39 = vrot.slane %v2885_v42, 4 }
 0x20f   : > { %5259 = vmatprep.mubr.msk.bf16.mxu1 %vm621_vm3, %v6953_v33  ;;  %v3223_v1 = vrot.slane %v6807_v9, 5  ;;  %v3226_v58 = vrot.slane %v6810_v20, 5  ;;  %v2881_v38 = vsel %vm5674_vm4, %v2876_v62, %v2880_v29  ;;  %v4739_v53 = vcombine.low %v6788_v7, %v6790_v37 }
 0x210   : > { %v3220_v2 = vsel %vm5921_vm7, %v3218_v0, %v3219_v47  ;;  %v4757_v40 = vrot.slane %v6817_v17, 9  ;;  %v2891_v60 = vsel %vm5674_vm4, %v2886_v39, %v2890_v10  ;;  %v3230_v51 = vrot.slane %v6819_v46, 5 }
 0x211   : > { %v4764_v56 = vcombine.low %v3217_v18, %v3220_v2  ;;  %v3224_v13 = vsel %vm5921_vm7, %v4756_v25, %v3223_v1  ;;  %v3225_v28 = vrot.slane %v3223_v1, 4  ;;  %v6975_v20 = vcombine.low %v2881_v38, %v2891_v60 }
 0x212   : > { %v3233_v50 = vrot.slane %v6825_v23, 5  ;;  %v4758_v41 = vrot.slane %v6829_v36, 9  ;;  %v3237_v37 = vrot.slane %v6833_v59, 5  ;;  %v3240_v3 = vrot.slane %v6842_v21, 5  ;;  %v4811_v21 = vld [vmem:[%s7660_s2 + $0xc] sm:$0x3] }
 0x213   : > { %5283 = vmatprep.mubr.msk.bf16.mxu0 %vm621_vm3, %v4764_v56  ;;  %v3227_v7 = vsel %vm5921_vm7, %v3225_v28, %v3226_v58  ;;  %v3595_v35 = vsel %vm652_vm0, %v4790_v34, 0  ;;  %v3231_v23 = vsel %vm5921_vm7, %v4757_v40, %v3230_v51  ;;  %v3232_v5 = vrot.slane %v3230_v51, 4 }
 0x214   : > { %5260 = vmatmul.mubr.msk.bf16.gmra.mxu1 %vm621_vm3, %v6975_v20  ;;  %v6987_v29 = vcombine.low %v3224_v13, %v3227_v7  ;;  %v3239_v31 = vrot.slane %v3237_v37, 4  ;;  %v4759_v44 = vrot.slane %v6846_v11, 9  ;;  %v3244_v32 = vrot.slane %v6850_v63, 5 }
 0x215   : > { %5265 = vmatprep.mubr.msk.bf16.mxu1 %vm621_vm3, %v4739_v53  ;;  %v3234_v34 = vsel %vm5921_vm7, %v3232_v5, %v3233_v50  ;;  %v3238_v27 = vsel %vm5921_vm7, %v4758_v41, %v3237_v37  ;;  %v3247_v24 = vrot.slane %v6858_v19, 5  ;;  %v3251_v47 = vrot.slane %v6867_v57, 5  ;;  %v4832_v37 = vld [vmem:[%s7660_s2 + $0x10] sm:$0x3] }
 0x216   : > { %5284 = vmatmul.mubr.msk.bf16.vlgmr.msra.gmra.mxu0 %vm621_vm3, %v6987_v29  ;;  %v7005_v12 = vcombine.low %v3231_v23, %v3234_v34  ;;  %v3241_v42 = vsel %vm5921_vm7, %v3239_v31, %v3240_v3  ;;  %v3246_v10 = vrot.slane %v3244_v32, 4  ;;  %v4740_v62 = vcombine.low %v6804_v15, %v6807_v9 }
 0x217   : > { %5318 = vmatpush3.bf16.msra.mxu0 %v3595_v35  ;;  %v3245_v18 = vsel %vm5921_vm7, %v4759_v44, %v3244_v32  ;;  %v7019_v19 = vcombine.low %v6817_v17, %v6819_v46  ;;  %v3447_v25 = vsel %vm652_vm0, %v6882_v8, 0  ;;  %v7025_v39 = vcombine.low %v3238_v27, %v3241_v42  ;;  %v4801_v17 = vld [vmem:[%s7660_s2 + $0xa] sm:$0x3]  ;;  %v4821_v32 = vld [vmem:[%s7660_s2 + $0xe] sm:$0x3] }
 0x218   : > { %5422 = vmatprep.subr.msk.bf16.mxu0 %vm652_vm0, %v4811_v21  ;;  %5287 = vmatprep.mubr.msk.bf16.mxu0 %vm621_vm3, %v7005_v12  ;;  %v3248_v0 = vsel %vm5921_vm7, %v3246_v10, %v3247_v24  ;;  %v3258_v15 = vrot.slane %v6901_v43, 5  ;;  %v4760_v1 = vrot.slane %v6865_v61, 9  ;;  %v3253_v58 = vrot.slane %v3251_v47, 4 }
 0x219   : > { %v7028_v9 = vcombine.low %v3245_v18, %v3248_v0  ;;  %v3254_v38 = vrot.slane %v6893_v16, 5  ;;  %v4761_v46 = vrot.slane %v6896_v54, 9  ;;  %v3261_v2 = vrot.slane %v6908_v49, 5 }
 0x21a   : > { %v3260_v8 = vrot.slane %v3258_v15, 4  ;;  %v3252_v16 = vsel %vm5921_vm7, %v4760_v1, %v3251_v47  ;;  %v3265_v49 = vrot.slane %v6920_v14, 5  ;;  %v7052_v40 = vcombine.low %v6829_v36, %v6833_v59 }
 0x21b   : > { %v3255_v53 = vsel %vm5921_vm7, %v3253_v58, %v3254_v38  ;;  %v3259_v60 = vsel %vm5921_vm7, %v4761_v46, %v3258_v15  ;;  %v7060_v13 = vcombine.low %v6846_v11, %v6850_v63  ;;  %v4762_v50 = vrot.slane %v6916_v48, 9  ;;  %v2697_v58 = vld [vmem:[#allocation2 + $0x70] sm:$0xf] }
 0x21c   : > { %5266 = vmatmul.mubr.msk.bf16.vlgmr.msra.gmra.mxu1 %vm621_vm3, %v4740_v62  ;;  %v3262_v56 = vsel %vm5921_vm7, %v3260_v8, %v3261_v2  ;;  %v7062_v28 = vcombine.low %v3252_v16, %v3255_v53  ;;  %v3267_v41 = vrot.slane %v3265_v49, 4  ;;  %v3268_v36 = vrot.slane %v6930_v55, 5 }
 0x21d   : > { %5300 = vmatpush3.bf16.msra.mxu1 %v3447_v25  ;;  %5269 = vmatprep.mubr.msk.bf16.mxu1 %vm621_vm3, %v7019_v19  ;;  %v7064_v51 = vcombine.low %v3259_v60, %v3262_v56  ;;  %v3266_v59 = vsel %vm5921_vm7, %v4762_v50, %v3265_v49  ;;  %v7082_v63 = vcombine.low %v6865_v61, %v6867_v57  ;;  %v3853_v57 = vsel %vm652_vm0, %v4811_v21, 0  ;;  %v2695_v21 = vld [vmem:[#allocation2 + $0x68] sm:$0x1] }
 0x21e   : > { %5288 = vmatmul.mubr.msk.bf16.gmra.mxu0 %vm621_vm3, %v7025_v39  ;;  %5421 = vmatprep.subr.msk.bf16.mxu1 %vm652_vm0, %v4801_v17  ;;  %v3269_v11 = vsel %vm5921_vm7, %v3267_v41, %v3268_v36  ;;  %v7086_v55 = vcombine.low %v6896_v54, %v6901_v43  ;;  %v4746_v61 = vcombine.low %v6916_v48, %v6920_v14  ;;  %v7102_v54 = vld [vmem:[#allocation2 + $0x60] sm:$0xf]  ;;  %v7104_v43 = vld [vmem:[#allocation2 + $0x64] sm:$0xf]  ;;  %v3727_v35 = vsel %vm652_vm0, %v4801_v17, 0 }
 0x21f   : > { %5291 = vmatprep.mubr.msk.bf16.mxu0 %vm621_vm3, %v7028_v9  ;;  %v7088_v7 = vcombine.low %v3266_v59, %v3269_v11  ;;  %v3566_v48 = vshll.u32 %v7102_v54, 16  ;;  %v3572_v14 = vshll.u32 %v7104_v43, 16  ;;  %v3576_v3 = vshrl.u32 %v7104_v43, 16 }
 0x220   : > { %v3582_v24 = vshll.u32 %v2695_v21, 16  ;;  %v4781_v25 = vcombine.low %v7102_v54, %v7104_v43  ;;  %v4133_v15 = vsel %vm652_vm0, %v4832_v37, 0  ;;  %v4001_v1 = vsel %vm652_vm0, %v4821_v32, 0 }
 0x221   : > { %v3568_v5 = vrot.slane %v3566_v48, 5  ;;  %v3574_v31 = vrot.slane %v3572_v14, 5  ;;  %v3578_v44 = vrot.slane %v3576_v3, 4  ;;  %v4800_v38 = vrot.slane %v7102_v54, 9 }
 0x222   : > { %v3584_v47 = vrot.slane %v3582_v24, 5  ;;  %v3716_v46 = vrot.slane %v2695_v21, 5  ;;  %v3982_v60 = vshrl.u32 %v2697_v58, 16 }
 0x223   : > { %v3579_v27 = vor.u32 %v3578_v44, %v3574_v31 }
 0x224   : > { %5270 = vmatmul.mubr.msk.bf16.gmra.mxu1 %vm621_vm3, %v7052_v40  ;;  %v3984_v50 = vrot.slane %v3982_v60, 4 }
 0x225   : > { %5273 = vmatprep.mubr.msk.bf16.mxu1 %vm621_vm3, %v7060_v13  ;;  %v3580_v10 = vrot.slane %v3579_v27, 4 }
 0x226   : > { %5292 = vmatmul.mubr.msk.bf16.gmra.mxu0 %vm621_vm3, %v7062_v28 }
 0x227   : > { %5295 = vmatprep.mubr.msk.bf16.mxu0 %vm621_vm3, %v7064_v51  ;;  %v3585_v18 = vsel %vm5674_vm4, %v3580_v10, %v3584_v47 }
 0x22c   : > { %5274 = vmatmul.mubr.msk.bf16.gmra.mxu1 %vm621_vm3, %v7082_v63 }
 0x22d   : > { %5277 = vmatprep.mubr.msk.bf16.mxu1 %vm621_vm3, %v7086_v55 }
 0x22e   : > { %5296 = vmatmul.mubr.msk.bf16.gmra.mxu0 %vm621_vm3, %v7088_v7 }
 0x22f   : > { %5319 = vmatprep.mubr.msk.bf16.mxu0 %vm621_vm3, %v6848_v22  ;;  %v3563_v22 = vshrl.u32 %v7102_v54, 16 }
 0x231   : > { %v3565_v23 = vrot.slane %v3563_v22, 4 }
 0x233   : > { %v3569_v34 = vor.u32 %v3568_v5, %v3565_v23 }
 0x234   : > { %5278 = vmatmul.mubr.msk.bf16.gmra.mxu1 %vm621_vm3, %v4746_v61 }
 0x235   : > { %5301 = vmatprep.mubr.msk.bf16.mxu1 %vm621_vm3, %v4740_v62  ;;  %v3570_v42 = vrot.slane %v3569_v34, 4 }
 0x236   : > { %5320 = vmatmul.mubr.msk.bf16.vlgmr.msra.gmra.mxu0 %vm621_vm3, %v6869_v26 }
 0x237   : > { %5354 = vmatpush3.bf16.msra.mxu0 %v3853_v57  ;;  %5323 = vmatprep.mubr.msk.bf16.mxu0 %vm621_vm3, %v6903_v6  ;;  %v3575_v62 = vsel %vm5674_vm4, %v3570_v42, %v3574_v31 }
 0x238   : > { %5424 = vmatprep.subr.msk.bf16.mxu0 %vm652_vm0, %v4832_v37  ;;  %v7144_v0 = vcombine.low %v3575_v62, %v3585_v18 }
 0x23c   : > { %5302 = vmatmul.mubr.msk.bf16.vlgmr.msra.gmra.mxu1 %vm621_vm3, %v7019_v19 }
 0x23d   : > { %5336 = vmatpush3.bf16.msra.mxu1 %v3727_v35  ;;  %5305 = vmatprep.mubr.msk.bf16.mxu1 %vm621_vm3, %v7052_v40 }
 0x23e   : > { %5324 = vmatmul.mubr.msk.bf16.gmra.mxu0 %vm621_vm3, %v6922_v30  ;;  %5423 = vmatprep.subr.msk.bf16.mxu1 %vm652_vm0, %v4821_v32  ;;  %vm4296_vm0 = vcmask 1046528  }
 0x23f   : > { %5327 = vmatprep.mubr.msk.bf16.mxu0 %vm621_vm3, %v6937_v4 }
 0x244   : > { %5306 = vmatmul.mubr.msk.bf16.gmra.mxu1 %vm621_vm3, %v7060_v13 }
 0x245   : > { %5309 = vmatprep.mubr.msk.bf16.mxu1 %vm621_vm3, %v7082_v63 }
 0x246   : > { %5328 = vmatmul.mubr.msk.bf16.gmra.mxu0 %vm621_vm3, %v6953_v33 }
 0x247   : > { %5331 = vmatprep.mubr.msk.bf16.mxu0 %vm621_vm3, %v6975_v20 }
 0x24c   : > { %5310 = vmatmul.mubr.msk.bf16.gmra.mxu1 %vm621_vm3, %v7086_v55 }
 0x24d   : > { %5313 = vmatprep.mubr.msk.bf16.mxu1 %vm621_vm3, %v4746_v61 }
 0x24e   : > { %5332 = vmatmul.mubr.msk.bf16.gmra.mxu0 %vm621_vm3, %v7144_v0 }
 0x24f   : > { %5355 = vmatprep.mubr.msk.bf16.mxu0 %vm621_vm3, %v7019_v19  ;;  %v2696_v19 = vld [vmem:[#allocation2 + $0x6c] sm:$0xf] }
 0x250   : > { %v4812_v8 = vcombine.low %v2696_v19, %v2697_v58  ;;  %v3969_v49 = vshrl.u32 %v2696_v19, 16 }
 0x252   : > { %v3971_v56 = vrot.slane %v3969_v49, 4 }
 0x254   : > { %5314 = vmatmul.mubr.msk.bf16.gmra.mxu1 %vm621_vm3, %v4781_v25 }
 0x255   : > { %5337 = vmatprep.mubr.msk.bf16.mxu1 %vm621_vm3, %v6987_v29  ;;  %v3713_v29 = vrot.slane %v7104_v43, 5 }
 0x256   : > { %5356 = vmatmul.mubr.msk.bf16.vlgmr.msra.gmra.mxu0 %vm621_vm3, %v7052_v40  ;;  %v3978_v40 = vshll.u32 %v2697_v58, 16 }
 0x257   : > { %5390 = vmatpush3.bf16.msra.mxu0 %v4133_v15  ;;  %5359 = vmatprep.mubr.msk.bf16.mxu0 %vm621_vm3, %v7060_v13  ;;  %v3715_v17 = vrot.slane %v3713_v29, 4  ;;  %v3714_v2 = vsel %vm5921_vm7, %v4800_v38, %v3713_v29 }
 0x258   : > { %v3980_v13 = vrot.slane %v3978_v40, 5 }
 0x259   : > { %v3717_v16 = vsel %vm5921_vm7, %v3715_v17, %v3716_v46 }
 0x25a   : > { %v4802_v53 = vcombine.low %v3714_v2, %v3717_v16 }
 0x25c   : > { %5338 = vmatmul.mubr.msk.bf16.vlgmr.msra.gmra.mxu1 %vm621_vm3, %v7005_v12 }
 0x25d   : > { %5372 = vmatpush3.bf16.msra.mxu1 %v4001_v1  ;;  %5341 = vmatprep.mubr.msk.bf16.mxu1 %vm621_vm3, %v7025_v39 }
 0x25e   : > { %5360 = vmatmul.mubr.msk.bf16.gmra.mxu0 %vm621_vm3, %v7082_v63 }
 0x25f   : > { %5363 = vmatprep.mubr.msk.bf16.mxu0 %vm621_vm3, %v7086_v55 }
 0x264   : > { %5342 = vmatmul.mubr.msk.bf16.gmra.mxu1 %vm621_vm3, %v7028_v9 }
 0x265   : > { %5345 = vmatprep.mubr.msk.bf16.mxu1 %vm621_vm3, %v7062_v28 }
 0x266   : > { %5364 = vmatmul.mubr.msk.bf16.gmra.mxu0 %vm621_vm3, %v4746_v61 }
 0x267   : > { %5367 = vmatprep.mubr.msk.bf16.mxu0 %vm621_vm3, %v4781_v25 }
 0x26c   : > { %5346 = vmatmul.mubr.msk.bf16.gmra.mxu1 %vm621_vm3, %v7064_v51 }
 0x26d   : > { %5349 = vmatprep.mubr.msk.bf16.mxu1 %vm621_vm3, %v7088_v7 }
 0x26e   : > { %5368 = vmatmul.mubr.msk.bf16.gmra.mxu0 %vm621_vm3, %v4812_v8 }
 0x26f   : > { %5391 = vmatprep.mubr.msk.bf16.mxu0 %vm621_vm3, %v7005_v12  ;;  %v3972_v12 = vshll.u32 %v2696_v19, 16 }
 0x274   : > { %5350 = vmatmul.mubr.msk.bf16.gmra.mxu1 %vm621_vm3, %v4802_v53 }
 0x275   : > { %5373 = vmatprep.mubr.msk.bf16.mxu1 %vm621_vm3, %v6869_v26  ;;  %v4119_v26 = vrot.slane %v2697_v58, 5 }
 0x276   : > { %5392 = vmatmul.mubr.msk.bf16.vlgmr.msra.gmra.mxu0 %vm621_vm3, %v7025_v39  ;;  %v2698_v39 = vld [vmem:[#allocation2 + $0x74] sm:$0x1] }
 0x277   : > { %5395 = vmatprep.mubr.msk.bf16.mxu0 %vm621_vm3, %v7028_v9  ;;  %v3974_v9 = vrot.slane %v3972_v12, 5  ;;  %v4121_v41 = vrot.slane %v4119_v26, 4  ;;  %v4122_v36 = vrot.slane %v2698_v39, 5  ;;  %v3988_v59 = vshll.u32 %v2698_v39, 16 }
 0x279   : > { %v4123_v11 = vsel %vm5921_vm7, %v4121_v41, %v4122_v36 }
 0x27c   : > { %5374 = vmatmul.mubr.msk.bf16.vlgmr.msra.gmra.mxu1 %vm621_vm3, %v6903_v6  ;;  %v4831_v6 = vrot.slane %v2696_v19, 9 }
 0x27d   : > { %5377 = vmatprep.mubr.msk.bf16.mxu1 %vm621_vm3, %v6922_v30  ;;  %v3975_v30 = vor.u32 %v3974_v9, %v3971_v56 }
 0x27e   : > { %5396 = vmatmul.mubr.msk.bf16.gmra.mxu0 %vm621_vm3, %v7062_v28  ;;  %v3985_v28 = vor.u32 %v3984_v50, %v3980_v13 }
 0x27f   : > { %5399 = vmatprep.mubr.msk.bf16.mxu0 %vm621_vm3, %v7064_v51  ;;  %v4120_v51 = vsel %vm5921_vm7, %v4831_v6, %v4119_v26  ;;  %v3976_v63 = vrot.slane %v3975_v30, 4 }
 0x280   : > { %v3986_v55 = vrot.slane %v3985_v28, 4  ;;  %v4833_v61 = vcombine.low %v4120_v51, %v4123_v11 }
 0x284   : > { %5378 = vmatmul.mubr.msk.bf16.gmra.mxu1 %vm621_vm3, %v6937_v4  ;;  %v3990_v4 = vrot.slane %v3988_v59, 5 }
 0x285   : > { %5381 = vmatprep.mubr.msk.bf16.mxu1 %vm621_vm3, %v6953_v33  ;;  %v3981_v33 = vsel %vm5674_vm4, %v3976_v63, %v3980_v13 }
 0x286   : > { %5400 = vmatmul.mubr.msk.bf16.gmra.mxu0 %vm621_vm3, %v7088_v7  ;;  %v3991_v7 = vsel %vm5674_vm4, %v3986_v55, %v3990_v4 }
 0x287   : > { %5403 = vmatprep.mubr.msk.bf16.mxu0 %vm621_vm3, %v4802_v53  ;;  %v4822_v52 = vcombine.low %v3981_v33, %v3991_v7 }
 0x28c   : > { %5382 = vmatmul.mubr.msk.bf16.gmra.mxu1 %vm621_vm3, %v6975_v20 }
 0x28d   : > { %5385 = vmatprep.mubr.msk.bf16.mxu1 %vm621_vm3, %v7144_v0 }
 0x28e   : > { %5404 = vmatmul.mubr.msk.bf16.gmra.mxu0 %vm621_vm3, %v4833_v61 }
 0x294   : > { %5386 = vmatmul.mubr.msk.bf16.gmra.mxu1 %vm621_vm3, %v4822_v52 }
 0x2ba   : > { %v5249_v57 = vpop.f32.mrf.mxu1 }
 0x2bc   : > { %v2979_v54 = vpop.f32.mrf.mxu1 }
 0x2be   : > { %v5250_v43 = vpop.f32.mrf.mxu1 }
 0x2c0   : > { %v2982_v37 = vpop.f32.mrf.mxu1 }
 0x2c4   : > { %v5253_v22 = vpop.f32.mrf.mxu1 }
 0x2c6   : > { %v2995_v20 = vpop.f32.mrf.mxu1 }
 0x2c8   : > { %v5254_v48 = vpop.f32.mrf.mxu1 }
 0x2ca   : > { %v2998_v14 = vpop.f32.mrf.mxu1 }
 0x2cc   : > { %v5257_v3 = vpop.f32.mrf.mxu1 }
 0x2ce   : > { %v3011_v35 = vpop.f32.mrf.mxu1 }
 0x2d0   : > { %v5258_v23 = vpop.f32.mrf.mxu1 }
 0x2d2   : > { %v3014_v5 = vpop.f32.mrf.mxu1 }
 0x2d4   : > { %v5261_v31 = vpop.f32.mrf.mxu1 }
 0x2d6   : > { %v3027_v45 = vpop.f32.mrf.mxu1  ;;  %v5285_v44 = vpop.f32.mrf.mxu0 }
 0x2d8   : > { %v5262_v32 = vpop.f32.mrf.mxu1  ;;  %v3357_v21 = vpop.f32.mrf.mxu0 }
 0x2da   : > { %v7227_v34 = vpop.f32.mrf.mxu1  ;;  %v5286_v27 = vpop.f32.mrf.mxu0 }
 0x2dc   : > { %v5267_v24 = vpop.f32.mrf.mxu1  ;;  %v3360_v42 = vpop.f32.mrf.mxu0 }
 0x2dd   : > { %v3152_v10 = vadd.f32 %v5267_v24, %v5249_v57 }
 0x2de   : > { %v3143_v47 = vpop.f32.mrf.mxu1  ;;  %v5289_v62 = vpop.f32.mrf.mxu0 }
 0x2df   : > { %v3144_v18 = vadd.f32 %v3143_v47, %v2979_v54  ;;  %v7229_v0 = vadd.f32 %v5285_v44, %v3152_v10 }
 0x2e0   : > { %v5268_v25 = vpop.f32.mrf.mxu1  ;;  %v3373_v15 = vpop.f32.mrf.mxu0 }
 0x2e1   : > { %v3155_v1 = vadd.f32 %v5268_v25, %v5250_v43  ;;  %v7231_v29 = vadd.f32 %v3357_v21, %v3144_v18 }
 0x2e2   : > { %v3146_v19 = vpop.f32.mrf.mxu1  ;;  %v5290_v58 = vpop.f32.mrf.mxu0 }
 0x2e3   : > { %v3147_v38 = vadd.f32 %v3146_v19, %v2982_v37  ;;  %v7233_v17 = vadd.f32 %v5286_v27, %v3155_v1 }
 0x2e4   : > { %v5271_v46 = vpop.f32.mrf.mxu1  ;;  %v3376_v8 = vpop.f32.mrf.mxu0 }
 0x2e5   : > { %v3168_v2 = vadd.f32 %v5271_v46, %v5253_v22  ;;  %v7235_v16 = vadd.f32 %v3360_v42, %v3147_v38 }
 0x2e6   : > { %v3159_v53 = vpop.f32.mrf.mxu1  ;;  %v5293_v49 = vpop.f32.mrf.mxu0 }
 0x2e7   : > { %v3160_v12 = vadd.f32 %v3159_v53, %v2995_v20  ;;  %v7237_v40 = vadd.f32 %v5289_v62, %v3168_v2 }
 0x2e8   : > { %v5272_v60 = vpop.f32.mrf.mxu1  ;;  %v3389_v26 = vpop.f32.mrf.mxu0 }
 0x2e9   : > { %v3171_v39 = vadd.f32 %v5272_v60, %v5254_v48  ;;  %v7239_v56 = vadd.f32 %v3373_v15, %v3160_v12 }
 0x2ea   : > { %v3162_v9 = vpop.f32.mrf.mxu1  ;;  %v5294_v13 = vpop.f32.mrf.mxu0 }
 0x2eb   : > { %v3163_v50 = vadd.f32 %v3162_v9, %v2998_v14  ;;  %v7241_v6 = vadd.f32 %v5290_v58, %v3171_v39 }
 0x2ec   : > { %v5275_v41 = vpop.f32.mrf.mxu1  ;;  %v3392_v36 = vpop.f32.mrf.mxu0 }
 0x2ed   : > { %v3184_v30 = vadd.f32 %v5275_v41, %v5257_v3  ;;  %v7243_v28 = vadd.f32 %v3376_v8, %v3163_v50 }
 0x2ee   : > { %v3175_v59 = vpop.f32.mrf.mxu1  ;;  %v5297_v51 = vpop.f32.mrf.mxu0 }
 0x2ef   : > { %v3176_v11 = vadd.f32 %v3175_v59, %v3011_v35  ;;  %v7245_v63 = vadd.f32 %v5293_v49, %v3184_v30 }
 0x2f0   : > { %v5276_v55 = vpop.f32.mrf.mxu1  ;;  %v3405_v4 = vpop.f32.mrf.mxu0 }
 0x2f1   : > { %v3187_v61 = vadd.f32 %v5276_v55, %v5258_v23  ;;  %v7247_v33 = vadd.f32 %v3389_v26, %v3176_v11 }
 0x2f2   : > { %v3178_v7 = vpop.f32.mrf.mxu1  ;;  %v5298_v52 = vpop.f32.mrf.mxu0 }
 0x2f3   : > { %v3179_v57 = vadd.f32 %v3178_v7, %v3014_v5  ;;  %v7249_v54 = vadd.f32 %v5294_v13, %v3187_v61 }
 0x2f4   : > { %v5279_v43 = vpop.f32.mrf.mxu1  ;;  %v3408_v37 = vpop.f32.mrf.mxu0 }
 0x2f5   : > { %v3200_v22 = vadd.f32 %v5279_v43, %v5261_v31  ;;  %v7251_v20 = vadd.f32 %v3392_v36, %v3179_v57 }
 0x2f6   : > { %v3191_v48 = vpop.f32.mrf.mxu1  ;;  %v7253_v14 = vpop.f32.mrf.mxu0 }
 0x2f7   : > { %v3192_v3 = vadd.f32 %v3191_v48, %v3027_v45  ;;  %v7255_v35 = vadd.f32 %v5297_v51, %v3200_v22 }
 0x2f8   : > { %v5280_v44 = vpop.f32.mrf.mxu1  ;;  %v7257_v23 = vpop.f32.mrf.mxu0 }
 0x2f9   : > { %7785 = vst [vmem:[#allocation17_spill] sm:$0xff] %v7255_v35  ;;  %v3203_v21 = vadd.f32 %v5280_v44, %v5262_v32  ;;  %v7259_v27 = vadd.f32 %v3405_v4, %v3192_v3 }
 0x2fa   : > { %v3194_v5 = vpop.f32.mrf.mxu1  ;;  %v7261_v24 = vpop.f32.mrf.mxu0 }
 0x2fb   : > { %7786 = vst [vmem:[#allocation21_spill] sm:$0xff] %v7259_v27  ;;  %v3195_v42 = vadd.f32 %v3194_v5, %v7227_v34  ;;  %v7264_v31 = vadd.f32 %v5298_v52, %v3203_v21  ;;  %v7814_v21 = vld [vmem:[#allocation7_spill] sm:$0xff] }
 0x2fc   : > { %v7266_v10 = vpop.f32.mrf.mxu1  ;;  %v7268_v47 = vpop.f32.mrf.mxu0  ;;  %v4251_v5 = vunpack.c.l.bf16 %v7814_v21 }
 0x2fd   : > { %7787 = vst [vmem:[#allocation25_spill] sm:$0xff] %v7264_v31  ;;  %v7270_v45 = vadd.f32 %v3408_v37, %v3195_v42  ;;  %v7815_v42 = vld [vmem:[#allocation8_spill] sm:$0xff] }
 0x2fe   : > { %v7272_v62 = vpop.f32.mrf.mxu1  ;;  %v7274_v18 = vpop.f32.mrf.mxu0 }
 0x2ff   : > { %7788 = vst [vmem:[#allocation29_spill] sm:$0xff] %v7270_v45  ;;  %7789 = vst [vmem:[#allocation33_spill] sm:$0xff] %v7274_v18 }
 0x300   : > { %v7276_v32 = vpop.f32.mrf.mxu1  ;;  %v7278_v25 = vpop.f32.mrf.mxu0 }
 0x301   : > { %7790 = vst [vmem:[#allocation34_spill] sm:$0xff] %v7278_v25 }
 0x302   : > { %v7280_v15 = vpop.f32.mrf.mxu1  ;;  %v7282_v1 = vpop.f32.mrf.mxu0 }
 0x303   : > { %7791 = vst [vmem:[#allocation35_spill] sm:$0xff] %v7282_v1 }
 0x304   : > { %v7284_v34 = vpop.f32.mrf.mxu1  ;;  %v7286_v19 = vpop.f32.mrf.mxu0 }
 0x305   : > { %7792 = vst [vmem:[#allocation36_spill] sm:$0xff] %v7286_v19 }
 0x306   : > { %v7288_v58 = vpop.f32.mrf.mxu1  ;;  %v7290_v38 = vpop.f32.mrf.mxu0 }
 0x307   : > { %7793 = vst [vmem:[#allocation37_spill] sm:$0xff] %v7290_v38 }
 0x308   : > { %v7292_v46 = vpop.f32.mrf.mxu1  ;;  %v7294_v8 = vpop.f32.mrf.mxu0 }
 0x309   : > { %7794 = vst [vmem:[#allocation41_spill] sm:$0xff] %v7294_v8 }
 0x30a   : > { %v7296_v2 = vpop.f32.mrf.mxu1  ;;  %v7298_v53 = vpop.f32.mrf.mxu0 }
 0x30b   : > { %7795 = vst [vmem:[#allocation43_spill] sm:$0xff] %v7298_v53 }
 0x30c   : > { %v7300_v49 = vpop.f32.mrf.mxu1  ;;  %v7302_v12 = vpop.f32.mrf.mxu0 }
 0x30d   : > { %7796 = vst [vmem:[#allocation38_spill] sm:$0xff] %v7302_v12 }
 0x30e   : > { %v7304_v60 = vpop.f32.mrf.mxu1  ;;  %v7306_v26 = vpop.f32.mrf.mxu0 }
 0x30f   : > { %7797 = vst [vmem:[#allocation39_spill] sm:$0xff] %v7306_v26 }
 0x310   : > { %v7308_v39 = vpop.f32.mrf.mxu1  ;;  %v7310_v9 = vpop.f32.mrf.mxu0 }
 0x311   : > { %7798 = vst [vmem:[#allocation40_spill] sm:$0xff] %v7310_v9 }
 0x312   : > { %v7312_v13 = vpop.f32.mrf.mxu1  ;;  %v7314_v50 = vpop.f32.mrf.mxu0 }
 0x313   : > { %7799 = vst [vmem:[#allocation42_spill] sm:$0xff] %v7314_v50 }
 0x314   : > { %v7316_v41 = vpop.f32.mrf.mxu1  ;;  %v7318_v36 = vpop.f32.mrf.mxu0 }
 0x315   : > { %7800 = vst [vmem:[#allocation4_spill] sm:$0xff] %v7316_v41  ;;  %7801 = vst [vmem:[#allocation32_spill] sm:$0xff] %v7318_v36  ;;  %v4252_v36 = vunpack.c.l.bf16 %v7815_v42 }
 0x316   : > { %v7320_v30 = vpop.f32.mrf.mxu1  ;;  %v7322_v59 = vpop.f32.mrf.mxu0 }
 0x317   : > { %7802 = vst [vmem:[#allocation44_spill] sm:$0xff] %v7320_v30 }
 0x318   : > { %v7324_v51 = vpop.f32.mrf.mxu1  ;;  %v7326_v11 = vpop.f32.mrf.mxu0 }
 0x319   : > { %7803 = vst [vmem:[#allocation45_spill] sm:$0xff] %v7324_v51  ;;  %7804 = vst [vmem:[#allocation46_spill] sm:$0xff] %v7326_v11 }
 0x31a   : > { %v7328_v55 = vpop.f32.mrf.mxu1  ;;  %v7330_v4 = vpop.f32.mrf.mxu0 }
 0x31b   : > { %7805 = vst [vmem:[#allocation47_spill] sm:$0xff] %v7328_v55  ;;  %7806 = vst [vmem:[#allocation48_spill] sm:$0xff] %v7330_v4 }
 0x31c   : > { %v7332_v61 = vpop.f32.mrf.mxu1  ;;  %v7334_v7 = vpop.f32.mrf.mxu0 }
 0x31d   : > { %7807 = vst [vmem:[#allocation49_spill] sm:$0xff] %v7334_v7  ;;  %v7819_v7 = vld [vmem:[#allocation5_spill] sm:$0xff] }
 0x31e   : > { %v7336_v52 = vpop.f32.mrf.mxu1  ;;  %v7338_v57 = vpop.f32.mrf.mxu0 }
 0x31f   : > { %7808 = vst [vmem:[#allocation50_spill] sm:$0xff] %v7338_v57  ;;  %v7818_v57 = vld [vmem:[#allocation3_spill] sm:$0xff] }
 0x320   : > { %v7340_v43 = vpop.f32.mrf.mxu1  ;;  %v7342_v37 = vpop.f32.mrf.mxu0  ;;  %v4248_v26 = vunpack.c.l.bf16 %v7818_v57  ;;  %v7826_v57 = vld [vmem:[#allocation13_spill] sm:$0xff] }
 0x321   : > { %7809 = vst [vmem:[#allocation51_spill] sm:$0xff] %v7342_v37  ;;  %v4249_v37 = vunpack.c.l.bf16 %v7819_v7  ;;  %v4257_v4 = vunpack.c.l.bf16 %v7826_v57  ;;  %v7836_v57 = vld [vmem:[#allocation22_spill] sm:$0xff] }
 0x322   : > { %v7344_v22 = vpop.f32.mrf.mxu1  ;;  %v7346_v48 = vpop.f32.mrf.mxu0  ;;  %v4297_v21 = vrot.slane %v4248_v26, 1  ;;  %v4264_v27 = vunpack.c.l.bf16 %v7836_v57 }
 0x323   : > { %7810 = vst [vmem:[#allocation52_spill] sm:$0xff] %v7344_v22  ;;  %7811 = vst [vmem:[#allocation53_spill] sm:$0xff] %v7346_v48  ;;  %v4302_v48 = vrot.slane %v4251_v5, 1  ;;  %v4298_v42 = vrot.slane %v4249_v37, 1 }
 0x324   : > { %v7348_v3 = vpop.f32.mrf.mxu1  ;;  %v7350_v44 = vpop.f32.mrf.mxu0 }
 0x325   : > { %7812 = vst [vmem:[#allocation54_spill] sm:$0xff] %v7348_v3  ;;  %7813 = vst [vmem:[#allocation55_spill] sm:$0xff] %v7350_v44  ;;  %v4303_v3 = vrot.slane %v4252_v36, 1  ;;  %v7830_v36 = vld [vmem:[#allocation10_spill] sm:$0xff] }
 0x326   : > { %v7354_v50 = vpop.f32.mrf.mxu1  ;;  %v7356_v9 = vpop.f32.mrf.mxu0  ;;  %v4254_v53 = vunpack.c.l.bf16 %v7830_v36  ;;  %v7840_v36 = vld [vmem:[#allocation18_spill] sm:$0xff] }
 0x327   : > { %7816 = vst [vmem:[#allocation7_spill] sm:$0xff] %v7354_v50  ;;  %7817 = vst [vmem:[#allocation8_spill] sm:$0xff] %v7356_v9  ;;  %v7824_v50 = vld [vmem:[#allocation9_spill] sm:$0xff]  ;;  %v7825_v9 = vld [vmem:[#allocation6_spill] sm:$0xff]  ;;  %v7380_v26 = vsel %vm4296_vm0, %v4302_v48, %v4303_v3  ;;  %v4261_v35 = vunpack.c.l.bf16 %v7840_v36  ;;  %v7394_v48 = vsel %vm4296_vm0, %v4297_v21, %v4298_v42  ;;  %v3548_v36 = vadd.f32 %v7266_v10, %v7229_v0 }
 0x328   : > { %v7360_v12 = vpop.f32.mrf.mxu1  ;;  %v7362_v55 = vpop.f32.mrf.mxu0  ;;  %v4253_v51 = vunpack.c.l.bf16 %v7824_v50  ;;  %v4250_v31 = vunpack.c.l.bf16 %v7825_v9  ;;  %7833 = vst [vmem:[#allocation13_spill] sm:$0xff] %v7380_v26  ;;  %v7834_v50 = vld [vmem:[#allocation12_spill] sm:$0xff] }
 0x329   : > { %7820 = vst [vmem:[#allocation3_spill] sm:$0xff] %v7360_v12  ;;  %7821 = vst [vmem:[#allocation5_spill] sm:$0xff] %v7362_v55  ;;  %v7829_v55 = vld [vmem:[#allocation14_spill] sm:$0xff]  ;;  %v4256_v37 = vunpack.c.l.bf16 %v7834_v50  ;;  %v7835_v9 = vld [vmem:[#allocation20_spill] sm:$0xff] }
 0x32a   : > { %v7364_v45 = vpop.f32.mrf.mxu1  ;;  %v7366_v44 = vpop.f32.mrf.mxu0  ;;  %v4258_v5 = vunpack.c.l.bf16 %v7829_v55  ;;  %v4263_v30 = vunpack.c.l.bf16 %v7835_v9  ;;  %v7839_v55 = vld [vmem:[#allocation16_spill] sm:$0xff]  ;;  %v4305_v50 = vrot.slane %v4253_v51, 1  ;;  %v4300_v26 = vrot.slane %v4250_v31, 1 }
 0x32b   : > { %7822 = vst [vmem:[#allocation56_spill] sm:$0xff] %v7364_v45  ;;  %7823 = vst [vmem:[#allocation57_spill] sm:$0xff] %v7366_v44  ;;  %v7831_v45 = vld [vmem:[#allocation11_spill] sm:$0xff]  ;;  %v4260_v41 = vunpack.c.l.bf16 %v7839_v55  ;;  %v4312_v9 = vrot.slane %v4257_v4, 1  ;;  %v4318_v51 = vrot.slane %v4261_v35, 1  ;;  %v7844_v0 = vld [vmem:[#allocation28_spill] sm:$0xff] }
 0x32c   : > { %v7371_v7 = vpop.f32.mrf.mxu1  ;;  %v7373_v12 = vpop.f32.mrf.mxu0  ;;  %v4255_v8 = vunpack.c.l.bf16 %v7831_v45  ;;  %v7832_v44 = vld [vmem:[#allocation15_spill] sm:$0xff]  ;;  %v4322_v25 = vrot.slane %v4263_v30, 1  ;;  %v4269_v10 = vunpack.c.l.bf16 %v7844_v0  ;;  %v3549_v30 = vadd.f32 %v7276_v32, %v7233_v17  ;;  %v7846_v17 = vld [vmem:[#allocation24_spill] sm:$0xff] }
 0x32d   : > { %7827 = vst [vmem:[#allocation9_spill] sm:$0xff] %v7371_v7  ;;  %7828 = vst [vmem:[#allocation6_spill] sm:$0xff] %v7373_v12  ;;  %v4259_v38 = vunpack.c.l.bf16 %v7832_v44  ;;  %v7841_v45 = vld [vmem:[#allocation23_spill] sm:$0xff]  ;;  %v4317_v31 = vrot.slane %v4260_v41, 1  ;;  %v3547_v32 = vadd.f32 %v7280_v15, %v7235_v16  ;;  %v3551_v16 = vadd.f32 %v7296_v2, %v7243_v28 }
 0x32e   : > { %v7385_v7 = vpop.f32.mrf.mxu1  ;;  %v7387_v12 = vpop.f32.mrf.mxu0  ;;  %v4265_v11 = vunpack.c.l.bf16 %v7841_v45  ;;  %v7842_v44 = vld [vmem:[#allocation19_spill] sm:$0xff]  ;;  %v4308_v1 = vrot.slane %v4255_v8, 1  ;;  %v4310_v45 = vrot.slane %v4256_v37, 1  ;;  %v7409_v8 = vsel %vm4296_vm0, %v4303_v3, %v4305_v50 }
 0x32f   : > { %7837 = vst [vmem:[#allocation14_spill] sm:$0xff] %v7385_v7  ;;  %7838 = vst [vmem:[#allocation10_spill] sm:$0xff] %v7387_v12  ;;  %v4262_v19 = vunpack.c.l.bf16 %v7842_v44  ;;  %v4313_v7 = vrot.slane %v4258_v5, 1  ;;  %v4307_v12 = vrot.slane %v4254_v53, 1  ;;  %v4315_v55 = vrot.slane %v4259_v38, 1  ;;  %v7852_v0 = vld [vmem:[#allocation35_spill] sm:$0xff] }
 0x330   : > { %v7396_v22 = vpop.f32.mrf.mxu1  ;;  %v7398_v57 = vpop.f32.mrf.mxu0  ;;  %v4323_v44 = vrot.slane %v4264_v27, 1  ;;  %v4325_v4 = vrot.slane %v4265_v11, 1  ;;  %v3546_v5 = vadd.f32 %v7272_v62, %v7231_v29  ;;  %v7412_v38 = vsel %vm4296_vm0, %v4298_v42, %v4300_v26  ;;  %v7845_v62 = vld [vmem:[#allocation30_spill] sm:$0xff] }
 0x331   : > { %7843 = vst [vmem:[#allocation11_spill] sm:$0xff] %v7396_v22  ;;  %v4320_v22 = vrot.slane %v4262_v19, 1  ;;  %v7420_v41 = vsel %vm4296_vm0, %v4312_v9, %v4313_v7  ;;  %v7423_v35 = vsel %vm4296_vm0, %v4307_v12, %v4308_v1  ;;  %v7426_v29 = vsel %vm4296_vm0, %v4313_v7, %v4315_v55 }
 0x332   : > { %v7402_v18 = vpop.f32.mrf.mxu1  ;;  %v7404_v21 = vpop.f32.mrf.mxu0  ;;  %v4270_v19 = vunpack.c.l.bf16 %v7845_v62  ;;  %v3696_v11 = vadd.f32 %v7253_v14, %v3548_v36  ;;  %v7433_v3 = vsel %vm4296_vm0, %v4308_v1, %v4310_v45  ;;  %v7436_v42 = vsel %vm4296_vm0, %v4322_v25, %v4323_v44 }
 0x333   : > { %v7441_v37 = vsel %vm4296_vm0, %v4317_v31, %v4318_v51  ;;  %v7444_v7 = vsel %vm4296_vm0, %v4323_v44, %v4325_v4  ;;  %v7447_v50 = vsel %vm4296_vm0, %v4318_v51, %v4320_v22  ;;  %v4266_v14 = vunpack.c.l.bf16 %v7846_v17  ;;  %v7849_v51 = vld [vmem:[#allocation31_spill] sm:$0xff]  ;;  %v7855_v17 = vld [vmem:[#allocation46_spill] sm:$0xff] }
 0x334   : > { %v7415_v27 = vpop.f32.mrf.mxu1  ;;  %v7417_v53 = vpop.f32.mrf.mxu0  ;;  %v3828_v25 = vadd.f32 %v7332_v61, %v3696_v11  ;;  %v3694_v1 = vadd.f32 %v7257_v23, %v3546_v5  ;;  %v7454_v9 = vrot.slane %v4269_v10, 1  ;;  %v3552_v55 = vadd.f32 %v7284_v34, %v7237_v40  ;;  %v7847_v61 = vld [vmem:[#allocation26_spill] sm:$0xff] }
 0x335   : > { %v3550_v36 = vadd.f32 %v7288_v58, %v7239_v56  ;;  %v3553_v22 = vadd.f32 %v7292_v46, %v7241_v6  ;;  %v7464_v31 = vrot.slane %v4270_v19, 1  ;;  %v3697_v15 = vadd.f32 %v7261_v24, %v3549_v30  ;;  %v7853_v30 = vld [vmem:[#allocation52_spill] sm:$0xff] }
 0x336   : > { %v7438_v26 = vpop.f32.mrf.mxu1  ;;  %v5393_v12 = vpop.f32.mrf.mxu0  ;;  %v3826_v23 = vadd.f32 %v7336_v52, %v3694_v1  ;;  %v3556_v56 = vadd.f32 %v7300_v49, %v7245_v63  ;;  %v3554_v6 = vadd.f32 %v7304_v60, %v7247_v33  ;;  %v7477_v46 = vrot.slane %v4266_v14, 1  ;;  %v7850_v33 = vld [vmem:[#allocation33_spill] sm:$0xff]  ;;  %v7851_v60 = vld [vmem:[#allocation34_spill] sm:$0xff] }
 0x337   : > { %v3557_v28 = vadd.f32 %v7308_v39, %v7249_v54  ;;  %v3829_v24 = vadd.f32 %v7340_v43, %v3697_v15  ;;  %v3695_v2 = vadd.f32 %v7268_v47, %v3547_v32  ;;  %v3954_v52 = vadd.f32 %v7322_v59, %v3828_v25  ;;  %v7854_v54 = vld [vmem:[#allocation36_spill] sm:$0xff]  ;;  %v7856_v14 = vld [vmem:[#allocation17_spill] sm:$0xff] }
 0x338   : > { %v7462_v45 = vpop.f32.mrf.mxu1  ;;  %v4169_v44 = vpop.f32.mrf.mxu0  ;;  %7848 = vst [vmem:[#allocation15_spill] sm:$0xff] %v7477_v46  ;;  %v3555_v63 = vadd.f32 %v7312_v13, %v7251_v20  ;;  %v3700_v49 = vadd.f32 %v7850_v33, %v3552_v55  ;;  %v3698_v5 = vadd.f32 %v7851_v60, %v3550_v36  ;;  %v3701_v10 = vadd.f32 %v7852_v0, %v3553_v22  ;;  %v7857_v59 = vld [vmem:[#allocation4_spill] sm:$0xff]  ;;  %v7858_v25 = vld [vmem:[#allocation21_spill] sm:$0xff] }
 0x339   : > { %v3827_v11 = vadd.f32 %v7853_v30, %v3695_v2  ;;  %v3699_v39 = vadd.f32 %v7854_v54, %v3551_v16  ;;  %v3952_v47 = vadd.f32 %v7855_v17, %v3826_v23  ;;  %v3560_v32 = vadd.f32 %v7857_v59, %v7856_v14  ;;  %v7859_v20 = vld [vmem:[#allocation44_spill] sm:$0xff]  ;;  %v7860_v1 = vld [vmem:[#allocation37_spill] sm:$0xff] }
 0x33a   : > { %v7475_v34 = vpop.f32.mrf.mxu1  ;;  %v5394_v58 = vpop.f32.mrf.mxu0  ;;  %v3558_v13 = vadd.f32 %v7859_v20, %v7858_v25  ;;  %v3704_v55 = vadd.f32 %v7860_v1, %v3556_v56  ;;  %v7861_v36 = vld [vmem:[#allocation41_spill] sm:$0xff]  ;;  %v7502_v22 = vld [vmem:[%s7663_s5] ss:$0 sm:$0xff]  ;;  %v7867_v56 = vld [vmem:[#allocation47_spill] sm:$0xff] }
 0x33b   : > { %v3702_v15 = vadd.f32 %v7861_v36, %v3554_v6  ;;  %v7863_v0 = vld [vmem:[#allocation48_spill] sm:$0xff]  ;;  %v7864_v30 = vld [vmem:[#allocation25_spill] sm:$0xff]  ;;  %v7868_v6 = vld [vmem:[#allocation54_spill] sm:$0xff] }
 0x33c   : > { %v5375_v62 = vpop.f32.mrf.mxu1  ;;  %v4172_v19 = vpop.f32.mrf.mxu0  ;;  %v7865_v54 = vld [vmem:[#allocation45_spill] sm:$0xff]  ;;  %v3832_v25 = vadd.f32 %v7868_v6, %v3700_v49  ;;  %v7869_v20 = vld [vmem:[#allocation38_spill] sm:$0xff]  ;;  %v7515_v36 = vld [vmem:[%s7664_s6] ss:$0 sm:$0xff] }
 0x33d   : > { %v4102_v43 = vadd.f32 %v5375_v62, %v3954_v52  ;;  %v7862_v52 = vld [vmem:[#allocation43_spill] sm:$0xff]  ;;  %v3955_v62 = vadd.f32 %v7863_v0, %v3829_v24  ;;  %v3561_v17 = vadd.f32 %v7865_v54, %v7864_v30  ;;  %v7866_v14 = vld [vmem:[#allocation29_spill] sm:$0xff]  ;;  %v3703_v1 = vadd.f32 %v7869_v20, %v3555_v63  ;;  %v7874_v63 = vld [vmem:[#allocation40_spill] sm:$0xff] }
 0x33e   : > { %v4037_v2 = vpop.f32.mrf.mxu1  ;;  %v5397_v16 = vpop.f32.mrf.mxu0  ;;  %v3705_v33 = vadd.f32 %v7862_v52, %v3557_v28  ;;  %v3559_v59 = vadd.f32 %v7867_v56, %v7866_v14  ;;  %v7871_v0 = vld [vmem:[#allocation7_spill] sm:$0xff]  ;;  %v7523_v6 = vadd.f32 %v7874_v63, %v3558_v13 }
 0x33f   : > { %v4234_v23 = vadd.f32 %v5393_v12, %v4102_v43  ;;  %v4100_v60 = vadd.f32 %v4037_v2, %v3952_v47  ;;  %v7870_v2 = vld [vmem:[#allocation49_spill] sm:$0xff]  ;;  %v3830_v30 = vadd.f32 %v7871_v0, %v3698_v5  ;;  %v7872_v54 = vld [vmem:[#allocation3_spill] sm:$0xff]  ;;  %v7877_v5 = vld [vmem:[#allocation32_spill] sm:$0xff] }
 0x340   : > { %v5376_v28 = vpop.f32.mrf.mxu1  ;;  %v4185_v12 = vpop.f32.mrf.mxu0  ;;  %v3953_v52 = vadd.f32 %v7870_v2, %v3827_v11  ;;  %v3833_v14 = vadd.f32 %v7872_v54, %v3701_v10  ;;  %v7873_v49 = vld [vmem:[#allocation39_spill] sm:$0xff]  ;;  %v7876_v11 = vld [vmem:[#allocation42_spill] sm:$0xff]  ;;  %v7532_v10 = vadd.f32 %v7877_v5, %v3559_v59  ;;  %v7879_v54 = vld [vmem:[#allocation13_spill] sm:$0xff] }
 0x341   : > { %v4362_v43 = vmul.f32 %v7502_v22, %v4234_v23  ;;  %v4232_v24 = vadd.f32 %v4169_v44, %v4100_v60  ;;  %v4103_v47 = vadd.f32 %v5376_v28, %v3955_v62  ;;  %v3708_v56 = vadd.f32 %v7873_v49, %v3560_v32  ;;  %v7875_v60 = vld [vmem:[#allocation56_spill] sm:$0xff]  ;;  %v7878_v32 = vld [vmem:[#allocation50_spill] sm:$0xff]  ;;  %v7882_v59 = vld [vmem:[#allocation53_spill] sm:$0xff] }
 0x342   : > { %v4040_v20 = vpop.f32.mrf.mxu1  ;;  %v5398_v4 = vpop.f32.mrf.mxu0  ;;  %v3831_v62 = vadd.f32 %v7875_v60, %v3699_v39  ;;  %v7529_v28 = vadd.f32 %v7876_v11, %v3561_v17  ;;  %v3958_v2 = vadd.f32 %v7878_v32, %v3832_v25  ;;  %v7881_v17 = vld [vmem:[#allocation51_spill] sm:$0xff]  ;;  %v3959_v60 = vadd.f32 %v7882_v59, %v3833_v14  ;;  %v7883_v32 = vld [vmem:[#allocation14_spill] sm:$0xff] }
 0x343   : > { %v4385_v40 = vadd.f32 %v7515_v36, %v4362_v43  ;;  %v4360_v46 = vmul.f32 %v7502_v22, %v4232_v24  ;;  %v4235_v23 = vadd.f32 %v5394_v58, %v4103_v47  ;;  %v4101_v44 = vadd.f32 %v4040_v20, %v3953_v52  ;;  %v7880_v47 = vld [vmem:[#allocation9_spill] sm:$0xff] }
 0x344   : > { %v5379_v13 = vpop.f32.mrf.mxu1  ;;  %v4188_v0 = vpop.f32.mrf.mxu0  ;;  %v3836_v52 = vadd.f32 %v7880_v47, %v3704_v55  ;;  %v3956_v63 = vadd.f32 %v7881_v17, %v3830_v30  ;;  %v7886_v47 = vld [vmem:[#allocation8_spill] sm:$0xff]  ;;  %v3835_v59 = vadd.f32 %v7402_v18, %v3703_v1 }
 0x345   : > { %v4401_v49 = vadd.f32 %v4385_v40, %v7879_v54  ;;  %v4383_v43 = vadd.f32 %v7515_v36, %v4360_v46  ;;  %v4363_v24 = vmul.f32 %v7502_v22, %v4235_v23  ;;  %v4233_v58 = vadd.f32 %v4172_v19, %v4101_v44 }
 0x346   : > { %v4106_v39 = vadd.f32 %v5379_v13, %v3958_v2  ;;  %v4053_v20 = vpop.f32.mrf.mxu1  ;;  %v5401_v11 = vpop.f32.mrf.mxu0  ;;  %v3834_v23 = vadd.f32 %v7883_v32, %v3702_v15  ;;  %v7884_v2 = vld [vmem:[#allocation55_spill] sm:$0xff] }
 0x347   : > { %v4417_v25 = vmax.f32 %v4401_v49, 0.0  ;;  %v4399_v5 = vadd.f32 %v4383_v43, %v7394_v48  ;;  %v4386_v40 = vadd.f32 %v7515_v36, %v4363_v24  ;;  %v4361_v46 = vmul.f32 %v7502_v22, %v4233_v58  ;;  %v7885_v43 = vld [vmem:[#allocation11_spill] sm:$0xff] }
 0x348   : > { %v4238_v19 = vadd.f32 %v5397_v16, %v4106_v39  ;;  %v4104_v55 = vadd.f32 %v4053_v20, %v3956_v63  ;;  %v5380_v44 = vpop.f32.mrf.mxu1  ;;  %v3957_v13 = vadd.f32 %v7884_v2, %v3831_v62  ;;  %v4201_v30 = vpop.f32.mrf.mxu0  ;;  %v3837_v24 = vadd.f32 %v7885_v43, %v3705_v33 }
 0x349   : > { %4433 = vst.msk [vmem:[%s5648_s12 + $0x10] sm:$0xff] %vm621_vm3, %v4417_v25  ;;  %v4415_v14 = vmax.f32 %v4399_v5, 0.0  ;;  %v4402_v54 = vadd.f32 %v4386_v40, %v7409_v8  ;;  %v4384_v48 = vadd.f32 %v7515_v36, %v4361_v46  ;;  %v4107_v49 = vadd.f32 %v5380_v44, %v3959_v60 }
 0x34a   : > { %v4366_v58 = vmul.f32 %v7502_v22, %v4238_v19  ;;  %v4236_v15 = vadd.f32 %v4185_v12, %v4104_v55  ;;  %v4056_v16 = vpop.f32.mrf.mxu1  ;;  %v3962_v39 = vadd.f32 %v7886_v47, %v3836_v52  ;;  %v5402_v17 = vpop.f32.mrf.mxu0  ;;  %v7887_v12 = vld [vmem:[#allocation5_spill] sm:$0xff] }
 0x34b   : > { %4431 = vst.msk [vmem:[%s5648_s12] sm:$0xff] %vm621_vm3, %v4415_v14  ;;  %v4418_v62 = vmax.f32 %v4402_v54, 0.0  ;;  %v4400_v63 = vadd.f32 %v4384_v48, %v7412_v38  ;;  %v4239_v20 = vadd.f32 %v5398_v4, %v4107_v49  ;;  %v4105_v8 = vadd.f32 %v4056_v16, %v3957_v13  ;;  %v7888_v55 = vld [vmem:[#allocation57_spill] sm:$0xff]  ;;  %v7889_v48 = vld [vmem:[#allocation6_spill] sm:$0xff] }
 0x34c   : > { %v4389_v33 = vadd.f32 %v7515_v36, %v4366_v58  ;;  %v4364_v60 = vmul.f32 %v7502_v22, %v4236_v15  ;;  %v5383_v25 = vpop.f32.mrf.mxu1  ;;  %v3960_v5 = vadd.f32 %v7887_v12, %v3834_v23  ;;  %v4204_v40 = vpop.f32.mrf.mxu0  ;;  %v3840_v4 = vadd.f32 %v7415_v27, %v3708_v56  ;;  %v7890_v16 = vld [vmem:[#allocation10_spill] sm:$0xff] }
 0x34d   : > { %4434 = vst.msk [vmem:[%s5648_s12 + $0x18] sm:$0xff] %vm621_vm3, %v4418_v62  ;;  %v4416_v52 = vmax.f32 %v4400_v63, 0.0  ;;  %v4367_v46 = vmul.f32 %v7502_v22, %v4239_v20  ;;  %v4237_v32 = vadd.f32 %v4188_v0, %v4105_v8  ;;  %v4110_v38 = vadd.f32 %v5383_v25, %v3962_v39 }
 0x34e   : > { %v4405_v18 = vadd.f32 %v4389_v33, %v7420_v41  ;;  %v4387_v1 = vadd.f32 %v7515_v36, %v4364_v60  ;;  %v4069_v19 = vpop.f32.mrf.mxu1  ;;  %v3963_v44 = vadd.f32 %v7888_v55, %v3837_v24  ;;  %v3838_v0 = vadd.f32 %v7438_v26, %v7523_v6  ;;  %v5405_v54 = vpop.f32.mrf.mxu0 }
 0x34f   : > { %4432 = vst.msk [vmem:[%s5648_s12 + $0x8] sm:$0xff] %vm621_vm3, %v4416_v52  ;;  %v4390_v23 = vadd.f32 %v7515_v36, %v4367_v46  ;;  %v4365_v2 = vmul.f32 %v7502_v22, %v4237_v32  ;;  %v4242_v13 = vadd.f32 %v5401_v11, %v4110_v38  ;;  %v4108_v14 = vadd.f32 %v4069_v19, %v3960_v5 }
 0x350   : > { %v4421_v27 = vmax.f32 %v4405_v18, 0.0  ;;  %v4403_v41 = vadd.f32 %v4387_v1, %v7423_v35  ;;  %v5384_v56 = vpop.f32.mrf.mxu1  ;;  %v3961_v49 = vadd.f32 %v7889_v48, %v3835_v59  ;;  %v3841_v11 = vadd.f32 %v7462_v45, %v7529_v28  ;;  %v4217_v20 = vpop.f32.mrf.mxu0 }
 0x351   : > { %v4406_v43 = vadd.f32 %v4390_v23, %v7426_v29  ;;  %v4388_v24 = vadd.f32 %v7515_v36, %v4365_v2  ;;  %v4370_v58 = vmul.f32 %v7502_v22, %v4242_v13  ;;  %v4240_v15 = vadd.f32 %v4201_v30, %v4108_v14 }
 0x352   : > { %4437 = vst.msk [vmem:[%s5648_s12 + $0x30] sm:$0xff] %vm621_vm3, %v4421_v27  ;;  %v4419_v26 = vmax.f32 %v4403_v41, 0.0  ;;  %v4111_v35 = vadd.f32 %v5384_v56, %v3963_v44  ;;  %v4072_v6 = vpop.f32.mrf.mxu1  ;;  %v3966_v47 = vadd.f32 %v7890_v16, %v3840_v4  ;;  %v3839_v30 = vadd.f32 %v7475_v34, %v7532_v10  ;;  %v5406_v18 = vpop.f32.mrf.mxu0 }
 0x353   : > { %v4422_v39 = vmax.f32 %v4406_v43, 0.0  ;;  %v4404_v62 = vadd.f32 %v4388_v24, %v7433_v3  ;;  %v4393_v29 = vadd.f32 %v7515_v36, %v4370_v58  ;;  %v4368_v63 = vmul.f32 %v7502_v22, %v4240_v15 }
 0x354   : > { %4435 = vst.msk [vmem:[%s5648_s12 + $0x20] sm:$0xff] %vm621_vm3, %v4419_v26  ;;  %v4243_v45 = vadd.f32 %v5402_v17, %v4111_v35  ;;  %v4109_v28 = vadd.f32 %v4072_v6, %v3961_v49  ;;  %v5387_v8 = vpop.f32.mrf.mxu1  ;;  %v3964_v59 = vadd.f32 %v7398_v57, %v3838_v0  ;;  %v7891_v17 = vunpack.c.l.bf16 %v7847_v61  ;;  %v7892_v61 = vld [vmem:[#allocation27_spill] sm:$0xff] }
 0x355   : > { %4438 = vst.msk [vmem:[%s5648_s12 + $0x38] sm:$0xff] %vm621_vm3, %v4422_v39  ;;  %v4420_v33 = vmax.f32 %v4404_v62, 0.0  ;;  %v4409_v3 = vadd.f32 %v4393_v29, %v7436_v42  ;;  %v4391_v60 = vadd.f32 %v7515_v36, %v4368_v63  ;;  %v4114_v25 = vadd.f32 %v5387_v8, %v3966_v47  ;;  %v7894_v49 = vld [vmem:[#allocation15_spill] sm:$0xff] }
 0x356   : > { %v4371_v12 = vmul.f32 %v7502_v22, %v4243_v45  ;;  %v4241_v34 = vadd.f32 %v4204_v40, %v4109_v28  ;;  %v4085_v10 = vpop.f32.mrf.mxu1  ;;  %v4328_v5 = vrot.slane %v7891_v17, 1  ;;  %v3967_v52 = vadd.f32 %v7404_v21, %v3841_v11 }
 0x357   : > { %4436 = vst.msk [vmem:[%s5648_s12 + $0x28] sm:$0xff] %vm621_vm3, %v4420_v33  ;;  %v4425_v57 = vmax.f32 %v4409_v3, 0.0  ;;  %v4407_v46 = vadd.f32 %v4391_v60, %v7441_v37  ;;  %v4246_v32 = vadd.f32 %v5405_v54, %v4114_v25  ;;  %v4112_v42 = vadd.f32 %v4085_v10, %v3964_v59 }
 0x358   : > { %v4394_v38 = vadd.f32 %v7515_v36, %v4371_v12  ;;  %v4369_v4 = vmul.f32 %v7502_v22, %v4241_v34  ;;  %v5388_v40 = vpop.f32.mrf.mxu1  ;;  %v3965_v1 = vadd.f32 %v7417_v53, %v3839_v30  ;;  %v4268_v19 = vunpack.c.l.bf16 %v7892_v61 }
 0x359   : > { %4441 = vst.msk [vmem:[%s5648_s12 + $0x50] sm:$0xff] %vm621_vm3, %v4425_v57  ;;  %v4423_v21 = vmax.f32 %v4407_v46, 0.0  ;;  %v4374_v55 = vmul.f32 %v7502_v22, %v4246_v32  ;;  %v4244_v44 = vadd.f32 %v4217_v20, %v4112_v42  ;;  %v4115_v37 = vadd.f32 %v5388_v40, %v3967_v52 }
 0x35a   : > { %v4410_v23 = vadd.f32 %v4394_v38, %v7444_v7  ;;  %v4392_v2 = vadd.f32 %v7515_v36, %v4369_v4  ;;  %v4334_v13 = vsel %vm4296_vm0, %v7454_v9, %v7464_v31  ;;  %v7893_v14 = vunpack.c.l.bf16 %v7849_v51  ;;  %v4088_v0 = vpop.f32.mrf.mxu1  ;;  %v4220_v51 = vpop.f32.mrf.mxu0 }
 0x35b   : > { %4439 = vst.msk [vmem:[%s5648_s12 + $0x40] sm:$0xff] %vm621_vm3, %v4423_v21  ;;  %v4397_v27 = vadd.f32 %v7515_v36, %v4374_v55  ;;  %v4372_v41 = vmul.f32 %v7502_v22, %v4244_v44  ;;  %v4247_v56 = vadd.f32 %v5406_v18, %v4115_v37  ;;  %v4113_v54 = vadd.f32 %v4088_v0, %v3965_v1 }
 0x35c   : > { %v4335_v53 = vrot.slane %v7893_v14, 1  ;;  %v4426_v7 = vmax.f32 %v4410_v23, 0.0  ;;  %v4408_v48 = vadd.f32 %v4392_v2, %v7447_v50  ;;  %v4329_v9 = vsel %vm4296_vm0, %v7894_v49, %v4328_v5 }
 0x35d   : > { %v4330_v43 = vrot.slane %v4268_v19, 1  ;;  %v4413_v24 = vadd.f32 %v4397_v27, %v4334_v13  ;;  %v4395_v58 = vadd.f32 %v7515_v36, %v4372_v41  ;;  %v4375_v15 = vmul.f32 %v7502_v22, %v4247_v56 }
 0x35e   : > { %v4245_v11 = vadd.f32 %v4220_v51, %v4113_v54  ;;  %4442 = vst.msk [vmem:[%s5648_s12 + $0x58] sm:$0xff] %vm621_vm3, %v4426_v7  ;;  %v4424_v26 = vmax.f32 %v4408_v48, 0.0  ;;  %v4336_v50 = vsel %vm4296_vm0, %v7464_v31, %v4335_v53 }
 0x35f   : > { %v4429_v35 = vmax.f32 %v4413_v24, 0.0  ;;  %v4411_v6 = vadd.f32 %v4395_v58, %v4329_v9  ;;  %v4398_v16 = vadd.f32 %v7515_v36, %v4375_v15  ;;  %v4331_v39 = vsel %vm4296_vm0, %v4328_v5, %v4330_v43 }
 0x360   : > { %v4373_v47 = vmul.f32 %v7502_v22, %v4245_v11  ;;  %4440 = vst.msk [vmem:[%s5648_s12 + $0x48] sm:$0xff] %vm621_vm3, %v4424_v26 }
 0x361   : > { %4445 = vst.msk [vmem:[%s5648_s12 + $0x70] sm:$0xff] %vm621_vm3, %v4429_v35  ;;  %v4427_v62 = vmax.f32 %v4411_v6, 0.0  ;;  %v4414_v29 = vadd.f32 %v4398_v16, %v4336_v50 }
 0x362   : > { %v4396_v63 = vadd.f32 %v7515_v36, %v4373_v47 }
 0x363   : > { %4443 = vst.msk [vmem:[%s5648_s12 + $0x60] sm:$0xff] %vm621_vm3, %v4427_v62  ;;  %v4430_v31 = vmax.f32 %v4414_v29, 0.0 }
 0x364   : > { %v4412_v30 = vadd.f32 %v4396_v63, %v4331_v39 }
 0x365   : > { %4446 = vst.msk [vmem:[%s5648_s12 + $0x78] sm:$0xff] %vm621_vm3, %v4430_v31 }
 0x366   : > { %v4428_v45 = vmax.f32 %v4412_v30, 0.0 }
 0x368   : > { %4444 = vst.msk [vmem:[%s5648_s12 + $0x68] sm:$0xff] %vm621_vm3, %v4428_v45 }
 0x369 PF: > { %s17_s28 = sadd.s32 1, %s5528_s28   ;;  %s7895_s24 = smov %s5520_s26 }
 0x36a   : > { %p14_p9 = scmp.ge.s32.totalorder %s17_s28, 6   ;;  %s7896_s25 = smov %s5524_s27 }
 0x36b   : > { %s7897_s26 = smov %s7900_s29  ;;  %s7898_s27 = smov %s7904_s30 }
 0x36c   :  { %16 = sbr.rel (!%p14_p9) target bundleno = 3 (0x3), region = 104 }

</bundles_post_ra>
